<compile_context>
chip_gen: v7x
topology: tpu7x:2x2x1
jax: 0.10.0
libtpu: 0.0.40
codegen_flags: <defaults>
</compile_context>

<pallas_src>
import functools

import numpy as np

import jax
import jax.numpy as jnp
from jax import lax
from jax.experimental import pallas as pl
from jax.experimental.pallas import tpu as pltpu

BN_EPS = 1e-5


def _tap_border_masks(h, w):
    """(9, h*w) f32 validity mask per 3x3 tap (k = ky*3 + kx), built host-side."""
    m = np.zeros((9, h, w), np.float32)
    for ky in range(3):
        for kx in range(3):
            dy, dx = ky - 1, kx - 1
            hv = ((np.arange(h) + dy >= 0) & (np.arange(h) + dy < h))[:, None]
            wv = ((np.arange(w) + dx >= 0) & (np.arange(w) + dx < w))[None, :]
            m[ky * 3 + kx] = (hv & wv).astype(np.float32)
    return m.reshape(9, h * w)


def _default_channel_block(cout):
    """grid=1 on single-TensorCore chips (v2..v6e); 2 channel blocks on v7x."""
    try:
        kind = jax.devices()[0].device_kind.lower()
    except Exception:  # pragma: no cover - device query is best-effort
        kind = ""
    dual_tc = ("v7" in kind) or ("7x" in kind)
    if dual_tc and cout % 2 == 0 and (cout // 2) % 8 == 0:
        return cout // 2
    return cout


def _light_conv3x3_kernel(x_ref, w1_ref, wdw_ref, mask_ref, gamma_ref, beta_ref,
                          o_ref, *, hdim, wdim, n_batch, use_mxu, dot_precision):
    """One grid step = one block of output channels, full batch & spatial.

    x_ref:     (N, Cin, HW)  NCHW input with (H, W) fused into the lane dim
    w1_ref:    (Cb, Cin)     1x1 conv weight block (rows = out channels)
    wdw_ref:   (Cb, 9)       depthwise 3x3 taps, column k = ky*3 + kx
    mask_ref:  (9, HW)       precomputed border-validity mask per tap
    gamma_ref: (Cb, 1)       bn.weight block
    beta_ref:  (Cb, 1)       bn.bias block
    o_ref:     (N, Cb, HW)
    """
    hw = hdim * wdim
    n = n_batch
    cin = x_ref.shape[1]
    cb = w1_ref.shape[0]

    w1 = w1_ref[...].astype(jnp.float32)                 # (Cb, Cin), tiny

    # ---- 1x1 pointwise conv (MXU matmul per batch; VPU FMA fallback) -------
    ys = []
    for b in range(n):
        xb = x_ref[b].astype(jnp.float32)                # (Cin, HW) per-slice load
        if use_mxu:
            yb = jnp.dot(w1, xb, precision=dot_precision,
                         preferred_element_type=jnp.float32)
        else:
            yb = jnp.zeros((cb, hw), jnp.float32)
            for ci in range(cin):
                yb = yb + w1[:, ci:ci + 1] * xb[ci:ci + 1, :]
        ys.append(yb)
    y = jnp.stack(ys, axis=0)                            # (N, Cb, HW)

    # ---- depthwise 3x3, stride 1, pad 1: lane rolls + precomputed masks ----
    taps = wdw_ref[...].astype(jnp.float32)              # (Cb, 9)
    acc = y * taps[:, 4:5].reshape(1, cb, 1)             # center tap (dy = dx = 0)
    for ky in range(3):
        for kx in range(3):
            dy, dx = ky - 1, kx - 1
            if dy == 0 and dx == 0:
                continue
            k = ky * 3 + kx
            # shifted[b, c, p] == y[b, c, p + dy*W + dx]; circular wrap only
            # lands on border pixels which the mask zeroes out.
            shift = (-(dy * wdim + dx)) % hw
            shifted = pltpu.roll(y, shift=shift, axis=2)
            tap_k = taps[:, k:k + 1].reshape(1, cb, 1)
            mask_k = mask_ref[k:k + 1, :].reshape(1, 1, hw)
            acc = acc + shifted * (tap_k * mask_k)

    # ---- BatchNorm2d (training batch stats, two-pass variance) + ReLU ------
    inv_cnt = 1.0 / float(n * hw)
    s1 = jnp.sum(acc, axis=2, keepdims=True)             # (N, Cb, 1) lane reduce
    mean = jnp.sum(s1, axis=0, keepdims=True) * inv_cnt  # (1, Cb, 1)
    diff = acc - mean
    s2 = jnp.sum(diff * diff, axis=2, keepdims=True)     # (N, Cb, 1)
    var = jnp.sum(s2, axis=0, keepdims=True) * inv_cnt   # (1, Cb, 1)
    scale = (gamma_ref[...].astype(jnp.float32).reshape(1, cb, 1)
             * lax.rsqrt(var + BN_EPS))
    beta = beta_ref[...].astype(jnp.float32).reshape(1, cb, 1)
    z = jnp.maximum(diff * scale + beta, 0.0)
    o_ref[...] = z.astype(o_ref.dtype)                   # lane-dense NCHW store


def light_conv3x3(x_nchw, w1, wdw, gamma, beta, *, channel_block=None,
                  use_mxu=True, mxu_precision=jax.lax.Precision.HIGHEST):
    """x_nchw: (N, Cin, H, W); w1: (Cin, Cout); wdw: (9, Cout); gamma/beta: (Cout,).

    Returns (N, Cout, H, W) in x's dtype, matching LightConv3x3.forward in
    training mode (internal math in f32; pass bf16 x for bf16 HBM I/O).
    """
    N, Cin, H, W = x_nchw.shape
    Cout = w1.shape[1]
    HW = H * W

    cb = _default_channel_block(Cout) if channel_block is None else channel_block
    if Cout % cb != 0:
        raise ValueError("channel_block must divide Cout")
    if cb != Cout and cb % 8 != 0:
        raise ValueError("channel_block must be a multiple of 8 (sublane tile)")
    grid = (Cout // cb,)

    # Free trailing-dim reshape only -- no NCHW<->NHWC transpose anywhere.
    x_f = jnp.asarray(x_nchw).reshape(N, Cin, HW)
    io_dtype = x_f.dtype
    w1_t = jnp.transpose(w1).astype(jnp.float32)          # (Cout, Cin)  (tiny)
    wdw_t = jnp.transpose(wdw).astype(jnp.float32)        # (Cout, 9)    (tiny)
    gamma_c = gamma.reshape(Cout, 1).astype(jnp.float32)
    beta_c = beta.reshape(Cout, 1).astype(jnp.float32)
    masks = jnp.asarray(_tap_border_masks(H, W))          # (9, HW) f32, tiny

    kernel = functools.partial(
        _light_conv3x3_kernel, hdim=H, wdim=W, n_batch=N,
        use_mxu=use_mxu, dot_precision=mxu_precision)

    itemsize = jnp.dtype(io_dtype).itemsize
    bytes_x = N * Cin * HW * itemsize
    bytes_out = N * Cout * HW * itemsize
    bytes_params = (Cout * Cin + Cout * 9 + 2 * Cout + 9 * HW) * 4
    cost = pl.CostEstimate(
        flops=int(2 * N * HW * Cout * Cin      # 1x1 conv
                  + 3 * 9 * N * HW * Cout      # depthwise taps (mul, mask, add)
                  + 10 * N * HW * Cout),       # BN stats + affine + ReLU
        transcendentals=int(Cout),             # per-channel rsqrt
        bytes_accessed=int(bytes_x + bytes_out + bytes_params))
    # Double-buffered x + out block plus params + headroom; >=16 MiB is safe on
    # all generations (v7x physical VMEM is 64 MiB).
    vmem_limit = int(max(2 * (bytes_x + N * cb * HW * itemsize)
                         + bytes_params + (4 << 20), 16 << 20))

    # TODO(synk): for production shapes that exceed VMEM, tile over N/H with a
    # two-pass grid (pass 1: conv + per-channel sum/sumsq; pass 2: normalize),
    # re-deriving tile sizes against v7x's 64 MiB VMEM -- batch-global BN stats
    # make single-pass spatial tiling incorrect.
    out = pl.pallas_call(
        kernel,
        out_shape=jax.ShapeDtypeStruct((N, Cout, HW), io_dtype),
        grid=grid,
        in_specs=[
            pl.BlockSpec((N, Cin, HW), lambda i: (0, 0, 0)),  # resident across steps
            pl.BlockSpec((cb, Cin), lambda i: (i, 0)),
            pl.BlockSpec((cb, 9), lambda i: (i, 0)),
            pl.BlockSpec((9, HW), lambda i: (0, 0)),
            pl.BlockSpec((cb, 1), lambda i: (i, 0)),
            pl.BlockSpec((cb, 1), lambda i: (i, 0)),
        ],
        out_specs=pl.BlockSpec((N, cb, HW), lambda i: (0, i, 0)),
        compiler_params=pltpu.CompilerParams(
            dimension_semantics=("parallel",),   # channel blocks are independent
            vmem_limit_bytes=vmem_limit),
        cost_estimate=cost,
    )(x_f, w1_t, wdw_t, masks, gamma_c, beta_c)

    # Free trailing-dim split back to NCHW.
    return out.reshape(N, Cout, H, W)


def reference(x_nchw, w1, wdw, gamma, beta):
    """Pure-JAX reference with identical semantics (f32-exact convs)."""
    x = jnp.transpose(x_nchw, (0, 2, 3, 1)).astype(jnp.float32)
    Cin, Cout = w1.shape
    y = lax.conv_general_dilated(
        x, w1.reshape(1, 1, Cin, Cout), (1, 1), 'VALID',
        dimension_numbers=('NHWC', 'HWIO', 'NHWC'),
        precision=lax.Precision.HIGHEST)
    y = lax.conv_general_dilated(
        y, wdw.reshape(3, 3, 1, Cout), (1, 1), ((1, 1), (1, 1)),
        dimension_numbers=('NHWC', 'HWIO', 'NHWC'),
        feature_group_count=Cout, precision=lax.Precision.HIGHEST)
    mean = jnp.mean(y, axis=(0, 1, 2), keepdims=True)
    var = jnp.mean((y - mean) ** 2, axis=(0, 1, 2), keepdims=True)
    z = (y - mean) / jnp.sqrt(var + BN_EPS) * gamma + beta
    z = jnp.maximum(z, 0.0)
    return jnp.transpose(z, (0, 3, 1, 2))


if __name__ == "__main__":
    key = jax.random.PRNGKey(0)
    k1, k2, k3, k4, k5 = jax.random.split(key, 5)

    N, Cin, Cout, H, W = 2, 4, 16, 16, 16
    x = jax.random.normal(k1, (N, Cin, H, W), jnp.float32)
    w1 = jax.random.normal(k2, (Cin, Cout), jnp.float32) * 0.5     # conv1 (1x1)
    wdw = jax.random.normal(k3, (9, Cout), jnp.float32) * 0.5      # conv2 (dw 3x3)
    gamma = 1.0 + 0.1 * jax.random.normal(k4, (Cout,), jnp.float32)  # bn.weight
    beta = 0.1 * jax.random.normal(k5, (Cout,), jnp.float32)         # bn.bias
    # TODO(synk): BatchNorm running_mean/running_var buffer updates (momentum)
    # are not modeled -- they do not affect the training-mode forward output.

    # Primary path: MXU 1x1 at HIGHEST (exact f32) precision.  Graceful
    # degradation keeps the script runnable if a lowering rejects the precision
    # flag (then DEFAULT MXU precision may round through bf16 -> looser check)
    # or the tiny-K matmul itself (then the exact VPU-FMA form is used).
    attempts = (
        (dict(use_mxu=True, mxu_precision=jax.lax.Precision.HIGHEST), 2e-4),
        (dict(use_mxu=True, mxu_precision=None), 5e-2),
        (dict(use_mxu=False, mxu_precision=None), 2e-4),
    )
    out, tol, last_err = None, None, None
    for cfg, cfg_tol in attempts:
        try:
            out = jax.block_until_ready(
                light_conv3x3(x, w1, wdw, gamma, beta, **cfg))
            tol = cfg_tol
            break
        except Exception as e:  # pragma: no cover - lowering-compat fallback
            last_err, out = e, None
    if out is None:
        raise last_err

    ref = reference(x, w1, wdw, gamma, beta)
    assert out.shape == (N, Cout, H, W)
    assert jnp.allclose(out, ref, atol=tol, rtol=tol), \
        float(jnp.max(jnp.abs(out - ref)))
    print("KERNEL_OK")
</pallas_src>

<mosaic_0001>
module attributes {stable_mosaic.version = 11 : i64} {
  func.func @_light_conv3x3_kernel(%arg0: i32, %arg1: memref<2x4x256xf32, #tpu.memory_space<vmem>>, %arg2: memref<16x4xf32, #tpu.memory_space<vmem>>, %arg3: memref<16x9xf32, #tpu.memory_space<vmem>>, %arg4: memref<9x256xf32, #tpu.memory_space<vmem>>, %arg5: memref<16x1xf32, #tpu.memory_space<vmem>>, %arg6: memref<16x1xf32, #tpu.memory_space<vmem>>, %arg7: memref<2x16x256xf32, #tpu.memory_space<vmem>>) attributes {dimension_semantics = [#tpu.dimension_semantics<parallel>], iteration_bounds = array<i64: 1>, scalar_prefetch = 0 : i64, scratch_operands = 0 : i64, tpu.core_type = #tpu.core_type<tc>, window_params = [{pipeline_mode = #tpu.pipeline_mode<synchronous>, transform_indices = @transform_0, window_bounds = array<i64: 2, 4, 256>}, {transform_indices = @transform_1, window_bounds = array<i64: 16, 4>}, {transform_indices = @transform_2, window_bounds = array<i64: 16, 9>}, {pipeline_mode = #tpu.pipeline_mode<synchronous>, transform_indices = @transform_3, window_bounds = array<i64: 9, 256>}, {transform_indices = @transform_4, window_bounds = array<i64: 16, 1>}, {transform_indices = @transform_5, window_bounds = array<i64: 16, 1>}, {transform_indices = @transform_6, window_bounds = array<i64: 2, 16, 256>}]} {
    %c0 = arith.constant 0 : index
    %c0_0 = arith.constant 0 : index
    %0 = vector.load %arg2[%c0, %c0_0] : memref<16x4xf32, #tpu.memory_space<vmem>>, vector<16x4xf32>
    %c0_1 = arith.constant 0 : index
    %c0_2 = arith.constant 0 : index
    %c0_3 = arith.constant 0 : index
    %1 = vector.load %arg1[%c0_1, %c0_2, %c0_3] : memref<2x4x256xf32, #tpu.memory_space<vmem>>, vector<1x4x256xf32>
    %2 = vector.shape_cast %1 : vector<1x4x256xf32> to vector<4x256xf32>
    %cst = arith.constant dense<0.000000e+00> : vector<16x256xf32>
    %3 = tpu.matmul %0, %2, %cst {dimension_numbers = #tpu.dot_dimension_numbers<[1], [0], [0], [1], [0, 0, 1, 1], [], []>, precision = #tpu.contract_precision<fp32>} : vector<16x4xf32>, vector<4x256xf32>, vector<16x256xf32> -> vector<16x256xf32>
    %c1 = arith.constant 1 : index
    %c0_4 = arith.constant 0 : index
    %c0_5 = arith.constant 0 : index
    %4 = vector.load %arg1[%c1, %c0_4, %c0_5] : memref<2x4x256xf32, #tpu.memory_space<vmem>>, vector<1x4x256xf32>
    %5 = vector.shape_cast %4 : vector<1x4x256xf32> to vector<4x256xf32>
    %cst_6 = arith.constant dense<0.000000e+00> : vector<16x256xf32>
    %6 = tpu.matmul %0, %5, %cst_6 {dimension_numbers = #tpu.dot_dimension_numbers<[1], [0], [0], [1], [0, 0, 1, 1], [], []>, precision = #tpu.contract_precision<fp32>} : vector<16x4xf32>, vector<4x256xf32>, vector<16x256xf32> -> vector<16x256xf32>
    %7 = vector.shape_cast %3 : vector<16x256xf32> to vector<1x16x256xf32>
    %8 = vector.shape_cast %6 : vector<16x256xf32> to vector<1x16x256xf32>
    %9 = tpu.concatenate %7, %8 in 0 : vector<1x16x256xf32>, vector<1x16x256xf32> -> vector<2x16x256xf32>
    %c0_7 = arith.constant 0 : index
    %c0_8 = arith.constant 0 : index
    %10 = vector.load %arg3[%c0_7, %c0_8] : memref<16x9xf32, #tpu.memory_space<vmem>>, vector<16x9xf32>
    %11 = vector.extract_strided_slice %10 {offsets = [0, 4], sizes = [16, 1], strides = [1, 1]} : vector<16x9xf32> to vector<16x1xf32>
    %12 = vector.shape_cast %11 : vector<16x1xf32> to vector<1x16x1xf32>
    %13 = vector.broadcast %12 : vector<1x16x1xf32> to vector<2x16x256xf32>
    %14 = arith.mulf %9, %13 : vector<2x16x256xf32>
    %c17_i32 = arith.constant 17 : i32
    %15 = tpu.dynamic_rotate %9 by %c17_i32 dim 2 : vector<2x16x256xf32>, i32 -> vector<2x16x256xf32>
    %16 = vector.extract_strided_slice %10 {offsets = [0, 0], sizes = [16, 1], strides = [1, 1]} : vector<16x9xf32> to vector<16x1xf32>
    %17 = vector.shape_cast %16 : vector<16x1xf32> to vector<1x16x1xf32>
    %c0_9 = arith.constant 0 : index
    %c0_10 = arith.constant 0 : index
    %18 = vector.load %arg4[%c0_9, %c0_10] : memref<9x256xf32, #tpu.memory_space<vmem>>, vector<1x256xf32>
    %19 = vector.shape_cast %18 : vector<1x256xf32> to vector<1x1x256xf32>
    %20 = vector.broadcast %17 : vector<1x16x1xf32> to vector<1x16x256xf32>
    %21 = vector.broadcast %19 : vector<1x1x256xf32> to vector<1x16x256xf32>
    %22 = arith.mulf %20, %21 : vector<1x16x256xf32>
    %23 = vector.broadcast %22 : vector<1x16x256xf32> to vector<2x16x256xf32>
    %24 = arith.mulf %15, %23 : vector<2x16x256xf32>
    %25 = arith.addf %14, %24 : vector<2x16x256xf32>
    %c16_i32 = arith.constant 16 : i32
    %26 = tpu.dynamic_rotate %9 by %c16_i32 dim 2 : vector<2x16x256xf32>, i32 -> vector<2x16x256xf32>
    %27 = vector.extract_strided_slice %10 {offsets = [0, 1], sizes = [16, 1], strides = [1, 1]} : vector<16x9xf32> to vector<16x1xf32>
    %28 = vector.shape_cast %27 : vector<16x1xf32> to vector<1x16x1xf32>
    %c1_11 = arith.constant 1 : index
    %c0_12 = arith.constant 0 : index
    %29 = vector.load %arg4[%c1_11, %c0_12] : memref<9x256xf32, #tpu.memory_space<vmem>>, vector<1x256xf32>
    %30 = vector.shape_cast %29 : vector<1x256xf32> to vector<1x1x256xf32>
    %31 = vector.broadcast %28 : vector<1x16x1xf32> to vector<1x16x256xf32>
    %32 = vector.broadcast %30 : vector<1x1x256xf32> to vector<1x16x256xf32>
    %33 = arith.mulf %31, %32 : vector<1x16x256xf32>
    %34 = vector.broadcast %33 : vector<1x16x256xf32> to vector<2x16x256xf32>
    %35 = arith.mulf %26, %34 : vector<2x16x256xf32>
    %36 = arith.addf %25, %35 : vector<2x16x256xf32>
    %c15_i32 = arith.constant 15 : i32
    %37 = tpu.dynamic_rotate %9 by %c15_i32 dim 2 : vector<2x16x256xf32>, i32 -> vector<2x16x256xf32>
    %38 = vector.extract_strided_slice %10 {offsets = [0, 2], sizes = [16, 1], strides = [1, 1]} : vector<16x9xf32> to vector<16x1xf32>
    %39 = vector.shape_cast %38 : vector<16x1xf32> to vector<1x16x1xf32>
    %c2 = arith.constant 2 : index
    %c0_13 = arith.constant 0 : index
    %40 = vector.load %arg4[%c2, %c0_13] : memref<9x256xf32, #tpu.memory_space<vmem>>, vector<1x256xf32>
    %41 = vector.shape_cast %40 : vector<1x256xf32> to vector<1x1x256xf32>
    %42 = vector.broadcast %39 : vector<1x16x1xf32> to vector<1x16x256xf32>
    %43 = vector.broadcast %41 : vector<1x1x256xf32> to vector<1x16x256xf32>
    %44 = arith.mulf %42, %43 : vector<1x16x256xf32>
    %45 = vector.broadcast %44 : vector<1x16x256xf32> to vector<2x16x256xf32>
    %46 = arith.mulf %37, %45 : vector<2x16x256xf32>
    %47 = arith.addf %36, %46 : vector<2x16x256xf32>
    %c1_i32 = arith.constant 1 : i32
    %48 = tpu.dynamic_rotate %9 by %c1_i32 dim 2 : vector<2x16x256xf32>, i32 -> vector<2x16x256xf32>
    %49 = vector.extract_strided_slice %10 {offsets = [0, 3], sizes = [16, 1], strides = [1, 1]} : vector<16x9xf32> to vector<16x1xf32>
    %50 = vector.shape_cast %49 : vector<16x1xf32> to vector<1x16x1xf32>
    %c3 = arith.constant 3 : index
    %c0_14 = arith.constant 0 : index
    %51 = vector.load %arg4[%c3, %c0_14] : memref<9x256xf32, #tpu.memory_space<vmem>>, vector<1x256xf32>
    %52 = vector.shape_cast %51 : vector<1x256xf32> to vector<1x1x256xf32>
    %53 = vector.broadcast %50 : vector<1x16x1xf32> to vector<1x16x256xf32>
    %54 = vector.broadcast %52 : vector<1x1x256xf32> to vector<1x16x256xf32>
    %55 = arith.mulf %53, %54 : vector<1x16x256xf32>
    %56 = vector.broadcast %55 : vector<1x16x256xf32> to vector<2x16x256xf32>
    %57 = arith.mulf %48, %56 : vector<2x16x256xf32>
    %58 = arith.addf %47, %57 : vector<2x16x256xf32>
    %c255_i32 = arith.constant 255 : i32
    %59 = tpu.dynamic_rotate %9 by %c255_i32 dim 2 : vector<2x16x256xf32>, i32 -> vector<2x16x256xf32>
    %60 = vector.extract_strided_slice %10 {offsets = [0, 5], sizes = [16, 1], strides = [1, 1]} : vector<16x9xf32> to vector<16x1xf32>
    %61 = vector.shape_cast %60 : vector<16x1xf32> to vector<1x16x1xf32>
    %c5 = arith.constant 5 : index
    %c0_15 = arith.constant 0 : index
    %62 = vector.load %arg4[%c5, %c0_15] : memref<9x256xf32, #tpu.memory_space<vmem>>, vector<1x256xf32>
    %63 = vector.shape_cast %62 : vector<1x256xf32> to vector<1x1x256xf32>
    %64 = vector.broadcast %61 : vector<1x16x1xf32> to vector<1x16x256xf32>
    %65 = vector.broadcast %63 : vector<1x1x256xf32> to vector<1x16x256xf32>
    %66 = arith.mulf %64, %65 : vector<1x16x256xf32>
    %67 = vector.broadcast %66 : vector<1x16x256xf32> to vector<2x16x256xf32>
    %68 = arith.mulf %59, %67 : vector<2x16x256xf32>
    %69 = arith.addf %58, %68 : vector<2x16x256xf32>
    %c241_i32 = arith.constant 241 : i32
    %70 = tpu.dynamic_rotate %9 by %c241_i32 dim 2 : vector<2x16x256xf32>, i32 -> vector<2x16x256xf32>
    %71 = vector.extract_strided_slice %10 {offsets = [0, 6], sizes = [16, 1], strides = [1, 1]} : vector<16x9xf32> to vector<16x1xf32>
    %72 = vector.shape_cast %71 : vector<16x1xf32> to vector<1x16x1xf32>
    %c6 = arith.constant 6 : index
    %c0_16 = arith.constant 0 : index
    %73 = vector.load %arg4[%c6, %c0_16] : memref<9x256xf32, #tpu.memory_space<vmem>>, vector<1x256xf32>
    %74 = vector.shape_cast %73 : vector<1x256xf32> to vector<1x1x256xf32>
    %75 = vector.broadcast %72 : vector<1x16x1xf32> to vector<1x16x256xf32>
    %76 = vector.broadcast %74 : vector<1x1x256xf32> to vector<1x16x256xf32>
    %77 = arith.mulf %75, %76 : vector<1x16x256xf32>
    %78 = vector.broadcast %77 : vector<1x16x256xf32> to vector<2x16x256xf32>
    %79 = arith.mulf %70, %78 : vector<2x16x256xf32>
    %80 = arith.addf %69, %79 : vector<2x16x256xf32>
    %c240_i32 = arith.constant 240 : i32
    %81 = tpu.dynamic_rotate %9 by %c240_i32 dim 2 : vector<2x16x256xf32>, i32 -> vector<2x16x256xf32>
    %82 = vector.extract_strided_slice %10 {offsets = [0, 7], sizes = [16, 1], strides = [1, 1]} : vector<16x9xf32> to vector<16x1xf32>
    %83 = vector.shape_cast %82 : vector<16x1xf32> to vector<1x16x1xf32>
    %c7 = arith.constant 7 : index
    %c0_17 = arith.constant 0 : index
    %84 = vector.load %arg4[%c7, %c0_17] : memref<9x256xf32, #tpu.memory_space<vmem>>, vector<1x256xf32>
    %85 = vector.shape_cast %84 : vector<1x256xf32> to vector<1x1x256xf32>
    %86 = vector.broadcast %83 : vector<1x16x1xf32> to vector<1x16x256xf32>
    %87 = vector.broadcast %85 : vector<1x1x256xf32> to vector<1x16x256xf32>
    %88 = arith.mulf %86, %87 : vector<1x16x256xf32>
    %89 = vector.broadcast %88 : vector<1x16x256xf32> to vector<2x16x256xf32>
    %90 = arith.mulf %81, %89 : vector<2x16x256xf32>
    %91 = arith.addf %80, %90 : vector<2x16x256xf32>
    %c239_i32 = arith.constant 239 : i32
    %92 = tpu.dynamic_rotate %9 by %c239_i32 dim 2 : vector<2x16x256xf32>, i32 -> vector<2x16x256xf32>
    %93 = vector.extract_strided_slice %10 {offsets = [0, 8], sizes = [16, 1], strides = [1, 1]} : vector<16x9xf32> to vector<16x1xf32>
    %94 = vector.shape_cast %93 : vector<16x1xf32> to vector<1x16x1xf32>
    %c8 = arith.constant 8 : index
    %c0_18 = arith.constant 0 : index
    %95 = vector.load %arg4[%c8, %c0_18] : memref<9x256xf32, #tpu.memory_space<vmem>>, vector<1x256xf32>
    %96 = vector.shape_cast %95 : vector<1x256xf32> to vector<1x1x256xf32>
    %97 = vector.broadcast %94 : vector<1x16x1xf32> to vector<1x16x256xf32>
    %98 = vector.broadcast %96 : vector<1x1x256xf32> to vector<1x16x256xf32>
    %99 = arith.mulf %97, %98 : vector<1x16x256xf32>
    %100 = vector.broadcast %99 : vector<1x16x256xf32> to vector<2x16x256xf32>
    %101 = arith.mulf %92, %100 : vector<2x16x256xf32>
    %102 = arith.addf %91, %101 : vector<2x16x256xf32>
    %cst_19 = arith.constant dense<0.000000e+00> : vector<2x16xf32>
    %103 = vector.multi_reduction <add>, %102, %cst_19 [2] : vector<2x16x256xf32> to vector<2x16xf32>
    %104 = vector.shape_cast %103 : vector<2x16xf32> to vector<2x16x1xf32>
    %cst_20 = arith.constant dense<0.000000e+00> : vector<16x1xf32>
    %105 = vector.multi_reduction <add>, %104, %cst_20 [0] : vector<2x16x1xf32> to vector<16x1xf32>
    %106 = vector.shape_cast %105 : vector<16x1xf32> to vector<1x16x1xf32>
    %cst_21 = arith.constant 0.001953125 : f32
    %107 = vector.broadcast %cst_21 : f32 to vector<1x16x1xf32>
    %108 = arith.mulf %106, %107 : vector<1x16x1xf32>
    %109 = vector.broadcast %108 : vector<1x16x1xf32> to vector<2x16x256xf32>
    %110 = arith.subf %102, %109 : vector<2x16x256xf32>
    %111 = arith.mulf %110, %110 : vector<2x16x256xf32>
    %cst_22 = arith.constant dense<0.000000e+00> : vector<2x16xf32>
    %112 = vector.multi_reduction <add>, %111, %cst_22 [2] : vector<2x16x256xf32> to vector<2x16xf32>
    %113 = vector.shape_cast %112 : vector<2x16xf32> to vector<2x16x1xf32>
    %cst_23 = arith.constant dense<0.000000e+00> : vector<16x1xf32>
    %114 = vector.multi_reduction <add>, %113, %cst_23 [0] : vector<2x16x1xf32> to vector<16x1xf32>
    %115 = vector.shape_cast %114 : vector<16x1xf32> to vector<1x16x1xf32>
    %cst_24 = arith.constant 0.001953125 : f32
    %116 = vector.broadcast %cst_24 : f32 to vector<1x16x1xf32>
    %117 = arith.mulf %115, %116 : vector<1x16x1xf32>
    %c0_25 = arith.constant 0 : index
    %c0_26 = arith.constant 0 : index
    %118 = vector.load %arg5[%c0_25, %c0_26] : memref<16x1xf32, #tpu.memory_space<vmem>>, vector<16x1xf32>
    %119 = vector.shape_cast %118 : vector<16x1xf32> to vector<1x16x1xf32>
    %cst_27 = arith.constant 9.99999974E-6 : f32
    %120 = vector.broadcast %cst_27 : f32 to vector<1x16x1xf32>
    %121 = arith.addf %117, %120 : vector<1x16x1xf32>
    %122 = math.rsqrt %121 : vector<1x16x1xf32>
    %123 = arith.mulf %119, %122 : vector<1x16x1xf32>
    %c0_28 = arith.constant 0 : index
    %c0_29 = arith.constant 0 : index
    %124 = vector.load %arg6[%c0_28, %c0_29] : memref<16x1xf32, #tpu.memory_space<vmem>>, vector<16x1xf32>
    %125 = vector.shape_cast %124 : vector<16x1xf32> to vector<1x16x1xf32>
    %126 = vector.broadcast %123 : vector<1x16x1xf32> to vector<2x16x256xf32>
    %127 = arith.mulf %110, %126 : vector<2x16x256xf32>
    %128 = vector.broadcast %125 : vector<1x16x1xf32> to vector<2x16x256xf32>
    %129 = arith.addf %127, %128 : vector<2x16x256xf32>
    %cst_30 = arith.constant 0.000000e+00 : f32
    %130 = vector.broadcast %cst_30 : f32 to vector<2x16x256xf32>
    %131 = arith.maximumf %129, %130 : vector<2x16x256xf32>
    %c0_31 = arith.constant 0 : index
    %c0_32 = arith.constant 0 : index
    %c0_33 = arith.constant 0 : index
    %132 = vector.load %arg7[%c0_31, %c0_32, %c0_33] : memref<2x16x256xf32, #tpu.memory_space<vmem>>, vector<2x16x256xf32>
    tpu.vector_store %arg7[%c0_31, %c0_32, %c0_33], %131 {strides = array<i32>} : memref<2x16x256xf32, #tpu.memory_space<vmem>>, vector<2x16x256xf32>,
    return
  }
  func.func @transform_0(%arg0: i32) -> (i32, i32, i32) {
    %c0_i32 = arith.constant 0 : i32
    %c0_i32_0 = arith.constant 0 : i32
    %c0_i32_1 = arith.constant 0 : i32
    %c0_i32_2 = arith.constant 0 : i32
    return %c0_i32, %c0_i32_0, %c0_i32_1 : i32, i32, i32
  }
  func.func @transform_1(%arg0: i32) -> (i32, i32) {
    %c0_i32 = arith.constant 0 : i32
    %c0_i32_0 = arith.constant 0 : i32
    return %arg0, %c0_i32 : i32, i32
  }
  func.func @transform_2(%arg0: i32) -> (i32, i32) {
    %c0_i32 = arith.constant 0 : i32
    %c0_i32_0 = arith.constant 0 : i32
    return %arg0, %c0_i32 : i32, i32
  }
  func.func @transform_3(%arg0: i32) -> (i32, i32) {
    %c0_i32 = arith.constant 0 : i32
    %c0_i32_0 = arith.constant 0 : i32
    %c0_i32_1 = arith.constant 0 : i32
    return %c0_i32, %c0_i32_0 : i32, i32
  }
  func.func @transform_4(%arg0: i32) -> (i32, i32) {
    %c0_i32 = arith.constant 0 : i32
    %c0_i32_0 = arith.constant 0 : i32
    return %arg0, %c0_i32 : i32, i32
  }
  func.func @transform_5(%arg0: i32) -> (i32, i32) {
    %c0_i32 = arith.constant 0 : i32
    %c0_i32_0 = arith.constant 0 : i32
    return %arg0, %c0_i32 : i32, i32
  }
  func.func @transform_6(%arg0: i32) -> (i32, i32, i32) {
    %c0_i32 = arith.constant 0 : i32
    %c0_i32_0 = arith.constant 0 : i32
    %c0_i32_1 = arith.constant 0 : i32
    return %c0_i32, %arg0, %c0_i32_0 : i32, i32, i32
  }
}

module attributes {stable_mosaic.version = 11 : i64} {
  func.func @_light_conv3x3_kernel(%arg0: i32, %arg1: memref<2x4x256xf32, #tpu.memory_space<vmem>>, %arg2: memref<16x4xf32, #tpu.memory_space<vmem>>, %arg3: memref<16x9xf32, #tpu.memory_space<vmem>>, %arg4: memref<9x256xf32, #tpu.memory_space<vmem>>, %arg5: memref<16x1xf32, #tpu.memory_space<vmem>>, %arg6: memref<16x1xf32, #tpu.memory_space<vmem>>, %arg7: memref<2x16x256xf32, #tpu.memory_space<vmem>>) attributes {dimension_semantics = [#tpu.dimension_semantics<parallel>], iteration_bounds = array<i64: 1>, scalar_prefetch = 0 : i64, scratch_operands = 0 : i64, tpu.core_type = #tpu.core_type<tc>, window_params = [{pipeline_mode = #tpu.pipeline_mode<synchronous>, transform_indices = @transform_0, window_bounds = array<i64: 2, 4, 256>}, {transform_indices = @transform_1, window_bounds = array<i64: 16, 4>}, {transform_indices = @transform_2, window_bounds = array<i64: 16, 9>}, {pipeline_mode = #tpu.pipeline_mode<synchronous>, transform_indices = @transform_3, window_bounds = array<i64: 9, 256>}, {transform_indices = @transform_4, window_bounds = array<i64: 16, 1>}, {transform_indices = @transform_5, window_bounds = array<i64: 16, 1>}, {transform_indices = @transform_6, window_bounds = array<i64: 2, 16, 256>}]} {
    %c0 = arith.constant 0 : index
    %c0_0 = arith.constant 0 : index
    %0 = vector.load %arg2[%c0, %c0_0] : memref<16x4xf32, #tpu.memory_space<vmem>>, vector<16x4xf32>
    %c0_1 = arith.constant 0 : index
    %c0_2 = arith.constant 0 : index
    %c0_3 = arith.constant 0 : index
    %1 = vector.load %arg1[%c0_1, %c0_2, %c0_3] : memref<2x4x256xf32, #tpu.memory_space<vmem>>, vector<1x4x256xf32>
    %2 = vector.shape_cast %1 : vector<1x4x256xf32> to vector<4x256xf32>
    %cst = arith.constant dense<0.000000e+00> : vector<16x256xf32>
    %3 = tpu.matmul %0, %2, %cst {dimension_numbers = #tpu.dot_dimension_numbers<[1], [0], [0], [1], [0, 0, 1, 1], [], []>} : vector<16x4xf32>, vector<4x256xf32>, vector<16x256xf32> -> vector<16x256xf32>
    %c1 = arith.constant 1 : index
    %c0_4 = arith.constant 0 : index
    %c0_5 = arith.constant 0 : index
    %4 = vector.load %arg1[%c1, %c0_4, %c0_5] : memref<2x4x256xf32, #tpu.memory_space<vmem>>, vector<1x4x256xf32>
    %5 = vector.shape_cast %4 : vector<1x4x256xf32> to vector<4x256xf32>
    %cst_6 = arith.constant dense<0.000000e+00> : vector<16x256xf32>
    %6 = tpu.matmul %0, %5, %cst_6 {dimension_numbers = #tpu.dot_dimension_numbers<[1], [0], [0], [1], [0, 0, 1, 1], [], []>} : vector<16x4xf32>, vector<4x256xf32>, vector<16x256xf32> -> vector<16x256xf32>
    %7 = vector.shape_cast %3 : vector<16x256xf32> to vector<1x16x256xf32>
    %8 = vector.shape_cast %6 : vector<16x256xf32> to vector<1x16x256xf32>
    %9 = tpu.concatenate %7, %8 in 0 : vector<1x16x256xf32>, vector<1x16x256xf32> -> vector<2x16x256xf32>
    %c0_7 = arith.constant 0 : index
    %c0_8 = arith.constant 0 : index
    %10 = vector.load %arg3[%c0_7, %c0_8] : memref<16x9xf32, #tpu.memory_space<vmem>>, vector<16x9xf32>
    %11 = vector.extract_strided_slice %10 {offsets = [0, 4], sizes = [16, 1], strides = [1, 1]} : vector<16x9xf32> to vector<16x1xf32>
    %12 = vector.shape_cast %11 : vector<16x1xf32> to vector<1x16x1xf32>
    %13 = vector.broadcast %12 : vector<1x16x1xf32> to vector<2x16x256xf32>
    %14 = arith.mulf %9, %13 : vector<2x16x256xf32>
    %c17_i32 = arith.constant 17 : i32
    %15 = tpu.dynamic_rotate %9 by %c17_i32 dim 2 : vector<2x16x256xf32>, i32 -> vector<2x16x256xf32>
    %16 = vector.extract_strided_slice %10 {offsets = [0, 0], sizes = [16, 1], strides = [1, 1]} : vector<16x9xf32> to vector<16x1xf32>
    %17 = vector.shape_cast %16 : vector<16x1xf32> to vector<1x16x1xf32>
    %c0_9 = arith.constant 0 : index
    %c0_10 = arith.constant 0 : index
    %18 = vector.load %arg4[%c0_9, %c0_10] : memref<9x256xf32, #tpu.memory_space<vmem>>, vector<1x256xf32>
    %19 = vector.shape_cast %18 : vector<1x256xf32> to vector<1x1x256xf32>
    %20 = vector.broadcast %17 : vector<1x16x1xf32> to vector<1x16x256xf32>
    %21 = vector.broadcast %19 : vector<1x1x256xf32> to vector<1x16x256xf32>
    %22 = arith.mulf %20, %21 : vector<1x16x256xf32>
    %23 = vector.broadcast %22 : vector<1x16x256xf32> to vector<2x16x256xf32>
    %24 = arith.mulf %15, %23 : vector<2x16x256xf32>
    %25 = arith.addf %14, %24 : vector<2x16x256xf32>
    %c16_i32 = arith.constant 16 : i32
    %26 = tpu.dynamic_rotate %9 by %c16_i32 dim 2 : vector<2x16x256xf32>, i32 -> vector<2x16x256xf32>
    %27 = vector.extract_strided_slice %10 {offsets = [0, 1], sizes = [16, 1], strides = [1, 1]} : vector<16x9xf32> to vector<16x1xf32>
    %28 = vector.shape_cast %27 : vector<16x1xf32> to vector<1x16x1xf32>
    %c1_11 = arith.constant 1 : index
    %c0_12 = arith.constant 0 : index
    %29 = vector.load %arg4[%c1_11, %c0_12] : memref<9x256xf32, #tpu.memory_space<vmem>>, vector<1x256xf32>
    %30 = vector.shape_cast %29 : vector<1x256xf32> to vector<1x1x256xf32>
    %31 = vector.broadcast %28 : vector<1x16x1xf32> to vector<1x16x256xf32>
    %32 = vector.broadcast %30 : vector<1x1x256xf32> to vector<1x16x256xf32>
    %33 = arith.mulf %31, %32 : vector<1x16x256xf32>
    %34 = vector.broadcast %33 : vector<1x16x256xf32> to vector<2x16x256xf32>
    %35 = arith.mulf %26, %34 : vector<2x16x256xf32>
    %36 = arith.addf %25, %35 : vector<2x16x256xf32>
    %c15_i32 = arith.constant 15 : i32
    %37 = tpu.dynamic_rotate %9 by %c15_i32 dim 2 : vector<2x16x256xf32>, i32 -> vector<2x16x256xf32>
    %38 = vector.extract_strided_slice %10 {offsets = [0, 2], sizes = [16, 1], strides = [1, 1]} : vector<16x9xf32> to vector<16x1xf32>
    %39 = vector.shape_cast %38 : vector<16x1xf32> to vector<1x16x1xf32>
    %c2 = arith.constant 2 : index
    %c0_13 = arith.constant 0 : index
    %40 = vector.load %arg4[%c2, %c0_13] : memref<9x256xf32, #tpu.memory_space<vmem>>, vector<1x256xf32>
    %41 = vector.shape_cast %40 : vector<1x256xf32> to vector<1x1x256xf32>
    %42 = vector.broadcast %39 : vector<1x16x1xf32> to vector<1x16x256xf32>
    %43 = vector.broadcast %41 : vector<1x1x256xf32> to vector<1x16x256xf32>
    %44 = arith.mulf %42, %43 : vector<1x16x256xf32>
    %45 = vector.broadcast %44 : vector<1x16x256xf32> to vector<2x16x256xf32>
    %46 = arith.mulf %37, %45 : vector<2x16x256xf32>
    %47 = arith.addf %36, %46 : vector<2x16x256xf32>
    %c1_i32 = arith.constant 1 : i32
    %48 = tpu.dynamic_rotate %9 by %c1_i32 dim 2 : vector<2x16x256xf32>, i32 -> vector<2x16x256xf32>
    %49 = vector.extract_strided_slice %10 {offsets = [0, 3], sizes = [16, 1], strides = [1, 1]} : vector<16x9xf32> to vector<16x1xf32>
    %50 = vector.shape_cast %49 : vector<16x1xf32> to vector<1x16x1xf32>
    %c3 = arith.constant 3 : index
    %c0_14 = arith.constant 0 : index
    %51 = vector.load %arg4[%c3, %c0_14] : memref<9x256xf32, #tpu.memory_space<vmem>>, vector<1x256xf32>
    %52 = vector.shape_cast %51 : vector<1x256xf32> to vector<1x1x256xf32>
    %53 = vector.broadcast %50 : vector<1x16x1xf32> to vector<1x16x256xf32>
    %54 = vector.broadcast %52 : vector<1x1x256xf32> to vector<1x16x256xf32>
    %55 = arith.mulf %53, %54 : vector<1x16x256xf32>
    %56 = vector.broadcast %55 : vector<1x16x256xf32> to vector<2x16x256xf32>
    %57 = arith.mulf %48, %56 : vector<2x16x256xf32>
    %58 = arith.addf %47, %57 : vector<2x16x256xf32>
    %c255_i32 = arith.constant 255 : i32
    %59 = tpu.dynamic_rotate %9 by %c255_i32 dim 2 : vector<2x16x256xf32>, i32 -> vector<2x16x256xf32>
    %60 = vector.extract_strided_slice %10 {offsets = [0, 5], sizes = [16, 1], strides = [1, 1]} : vector<16x9xf32> to vector<16x1xf32>
    %61 = vector.shape_cast %60 : vector<16x1xf32> to vector<1x16x1xf32>
    %c5 = arith.constant 5 : index
    %c0_15 = arith.constant 0 : index
    %62 = vector.load %arg4[%c5, %c0_15] : memref<9x256xf32, #tpu.memory_space<vmem>>, vector<1x256xf32>
    %63 = vector.shape_cast %62 : vector<1x256xf32> to vector<1x1x256xf32>
    %64 = vector.broadcast %61 : vector<1x16x1xf32> to vector<1x16x256xf32>
    %65 = vector.broadcast %63 : vector<1x1x256xf32> to vector<1x16x256xf32>
    %66 = arith.mulf %64, %65 : vector<1x16x256xf32>
    %67 = vector.broadcast %66 : vector<1x16x256xf32> to vector<2x16x256xf32>
    %68 = arith.mulf %59, %67 : vector<2x16x256xf32>
    %69 = arith.addf %58, %68 : vector<2x16x256xf32>
    %c241_i32 = arith.constant 241 : i32
    %70 = tpu.dynamic_rotate %9 by %c241_i32 dim 2 : vector<2x16x256xf32>, i32 -> vector<2x16x256xf32>
    %71 = vector.extract_strided_slice %10 {offsets = [0, 6], sizes = [16, 1], strides = [1, 1]} : vector<16x9xf32> to vector<16x1xf32>
    %72 = vector.shape_cast %71 : vector<16x1xf32> to vector<1x16x1xf32>
    %c6 = arith.constant 6 : index
    %c0_16 = arith.constant 0 : index
    %73 = vector.load %arg4[%c6, %c0_16] : memref<9x256xf32, #tpu.memory_space<vmem>>, vector<1x256xf32>
    %74 = vector.shape_cast %73 : vector<1x256xf32> to vector<1x1x256xf32>
    %75 = vector.broadcast %72 : vector<1x16x1xf32> to vector<1x16x256xf32>
    %76 = vector.broadcast %74 : vector<1x1x256xf32> to vector<1x16x256xf32>
    %77 = arith.mulf %75, %76 : vector<1x16x256xf32>
    %78 = vector.broadcast %77 : vector<1x16x256xf32> to vector<2x16x256xf32>
    %79 = arith.mulf %70, %78 : vector<2x16x256xf32>
    %80 = arith.addf %69, %79 : vector<2x16x256xf32>
    %c240_i32 = arith.constant 240 : i32
    %81 = tpu.dynamic_rotate %9 by %c240_i32 dim 2 : vector<2x16x256xf32>, i32 -> vector<2x16x256xf32>
    %82 = vector.extract_strided_slice %10 {offsets = [0, 7], sizes = [16, 1], strides = [1, 1]} : vector<16x9xf32> to vector<16x1xf32>
    %83 = vector.shape_cast %82 : vector<16x1xf32> to vector<1x16x1xf32>
    %c7 = arith.constant 7 : index
    %c0_17 = arith.constant 0 : index
    %84 = vector.load %arg4[%c7, %c0_17] : memref<9x256xf32, #tpu.memory_space<vmem>>, vector<1x256xf32>
    %85 = vector.shape_cast %84 : vector<1x256xf32> to vector<1x1x256xf32>
    %86 = vector.broadcast %83 : vector<1x16x1xf32> to vector<1x16x256xf32>
    %87 = vector.broadcast %85 : vector<1x1x256xf32> to vector<1x16x256xf32>
    %88 = arith.mulf %86, %87 : vector<1x16x256xf32>
    %89 = vector.broadcast %88 : vector<1x16x256xf32> to vector<2x16x256xf32>
    %90 = arith.mulf %81, %89 : vector<2x16x256xf32>
    %91 = arith.addf %80, %90 : vector<2x16x256xf32>
    %c239_i32 = arith.constant 239 : i32
    %92 = tpu.dynamic_rotate %9 by %c239_i32 dim 2 : vector<2x16x256xf32>, i32 -> vector<2x16x256xf32>
    %93 = vector.extract_strided_slice %10 {offsets = [0, 8], sizes = [16, 1], strides = [1, 1]} : vector<16x9xf32> to vector<16x1xf32>
    %94 = vector.shape_cast %93 : vector<16x1xf32> to vector<1x16x1xf32>
    %c8 = arith.constant 8 : index
    %c0_18 = arith.constant 0 : index
    %95 = vector.load %arg4[%c8, %c0_18] : memref<9x256xf32, #tpu.memory_space<vmem>>, vector<1x256xf32>
    %96 = vector.shape_cast %95 : vector<1x256xf32> to vector<1x1x256xf32>
    %97 = vector.broadcast %94 : vector<1x16x1xf32> to vector<1x16x256xf32>
    %98 = vector.broadcast %96 : vector<1x1x256xf32> to vector<1x16x256xf32>
    %99 = arith.mulf %97, %98 : vector<1x16x256xf32>
    %100 = vector.broadcast %99 : vector<1x16x256xf32> to vector<2x16x256xf32>
    %101 = arith.mulf %92, %100 : vector<2x16x256xf32>
    %102 = arith.addf %91, %101 : vector<2x16x256xf32>
    %cst_19 = arith.constant dense<0.000000e+00> : vector<2x16xf32>
    %103 = vector.multi_reduction <add>, %102, %cst_19 [2] : vector<2x16x256xf32> to vector<2x16xf32>
    %104 = vector.shape_cast %103 : vector<2x16xf32> to vector<2x16x1xf32>
    %cst_20 = arith.constant dense<0.000000e+00> : vector<16x1xf32>
    %105 = vector.multi_reduction <add>, %104, %cst_20 [0] : vector<2x16x1xf32> to vector<16x1xf32>
    %106 = vector.shape_cast %105 : vector<16x1xf32> to vector<1x16x1xf32>
    %cst_21 = arith.constant 0.001953125 : f32
    %107 = vector.broadcast %cst_21 : f32 to vector<1x16x1xf32>
    %108 = arith.mulf %106, %107 : vector<1x16x1xf32>
    %109 = vector.broadcast %108 : vector<1x16x1xf32> to vector<2x16x256xf32>
    %110 = arith.subf %102, %109 : vector<2x16x256xf32>
    %111 = arith.mulf %110, %110 : vector<2x16x256xf32>
    %cst_22 = arith.constant dense<0.000000e+00> : vector<2x16xf32>
    %112 = vector.multi_reduction <add>, %111, %cst_22 [2] : vector<2x16x256xf32> to vector<2x16xf32>
    %113 = vector.shape_cast %112 : vector<2x16xf32> to vector<2x16x1xf32>
    %cst_23 = arith.constant dense<0.000000e+00> : vector<16x1xf32>
    %114 = vector.multi_reduction <add>, %113, %cst_23 [0] : vector<2x16x1xf32> to vector<16x1xf32>
    %115 = vector.shape_cast %114 : vector<16x1xf32> to vector<1x16x1xf32>
    %cst_24 = arith.constant 0.001953125 : f32
    %116 = vector.broadcast %cst_24 : f32 to vector<1x16x1xf32>
    %117 = arith.mulf %115, %116 : vector<1x16x1xf32>
    %c0_25 = arith.constant 0 : index
    %c0_26 = arith.constant 0 : index
    %118 = vector.load %arg5[%c0_25, %c0_26] : memref<16x1xf32, #tpu.memory_space<vmem>>, vector<16x1xf32>
    %119 = vector.shape_cast %118 : vector<16x1xf32> to vector<1x16x1xf32>
    %cst_27 = arith.constant 9.99999974E-6 : f32
    %120 = vector.broadcast %cst_27 : f32 to vector<1x16x1xf32>
    %121 = arith.addf %117, %120 : vector<1x16x1xf32>
    %122 = math.rsqrt %121 : vector<1x16x1xf32>
    %123 = arith.mulf %119, %122 : vector<1x16x1xf32>
    %c0_28 = arith.constant 0 : index
    %c0_29 = arith.constant 0 : index
    %124 = vector.load %arg6[%c0_28, %c0_29] : memref<16x1xf32, #tpu.memory_space<vmem>>, vector<16x1xf32>
    %125 = vector.shape_cast %124 : vector<16x1xf32> to vector<1x16x1xf32>
    %126 = vector.broadcast %123 : vector<1x16x1xf32> to vector<2x16x256xf32>
    %127 = arith.mulf %110, %126 : vector<2x16x256xf32>
    %128 = vector.broadcast %125 : vector<1x16x1xf32> to vector<2x16x256xf32>
    %129 = arith.addf %127, %128 : vector<2x16x256xf32>
    %cst_30 = arith.constant 0.000000e+00 : f32
    %130 = vector.broadcast %cst_30 : f32 to vector<2x16x256xf32>
    %131 = arith.maximumf %129, %130 : vector<2x16x256xf32>
    %c0_31 = arith.constant 0 : index
    %c0_32 = arith.constant 0 : index
    %c0_33 = arith.constant 0 : index
    %132 = vector.load %arg7[%c0_31, %c0_32, %c0_33] : memref<2x16x256xf32, #tpu.memory_space<vmem>>, vector<2x16x256xf32>
    tpu.vector_store %arg7[%c0_31, %c0_32, %c0_33], %131 {strides = array<i32>} : memref<2x16x256xf32, #tpu.memory_space<vmem>>, vector<2x16x256xf32>,
    return
  }
  func.func @transform_0(%arg0: i32) -> (i32, i32, i32) {
    %c0_i32 = arith.constant 0 : i32
    %c0_i32_0 = arith.constant 0 : i32
    %c0_i32_1 = arith.constant 0 : i32
    %c0_i32_2 = arith.constant 0 : i32
    return %c0_i32, %c0_i32_0, %c0_i32_1 : i32, i32, i32
  }
  func.func @transform_1(%arg0: i32) -> (i32, i32) {
    %c0_i32 = arith.constant 0 : i32
    %c0_i32_0 = arith.constant 0 : i32
    return %arg0, %c0_i32 : i32, i32
  }
  func.func @transform_2(%arg0: i32) -> (i32, i32) {
    %c0_i32 = arith.constant 0 : i32
    %c0_i32_0 = arith.constant 0 : i32
    return %arg0, %c0_i32 : i32, i32
  }
  func.func @transform_3(%arg0: i32) -> (i32, i32) {
    %c0_i32 = arith.constant 0 : i32
    %c0_i32_0 = arith.constant 0 : i32
    %c0_i32_1 = arith.constant 0 : i32
    return %c0_i32, %c0_i32_0 : i32, i32
  }
  func.func @transform_4(%arg0: i32) -> (i32, i32) {
    %c0_i32 = arith.constant 0 : i32
    %c0_i32_0 = arith.constant 0 : i32
    return %arg0, %c0_i32 : i32, i32
  }
  func.func @transform_5(%arg0: i32) -> (i32, i32) {
    %c0_i32 = arith.constant 0 : i32
    %c0_i32_0 = arith.constant 0 : i32
    return %arg0, %c0_i32 : i32, i32
  }
  func.func @transform_6(%arg0: i32) -> (i32, i32, i32) {
    %c0_i32 = arith.constant 0 : i32
    %c0_i32_0 = arith.constant 0 : i32
    %c0_i32_1 = arith.constant 0 : i32
    return %c0_i32, %arg0, %c0_i32_0 : i32, i32, i32
  }
}

module attributes {stable_mosaic.version = 11 : i64} {
  func.func @_light_conv3x3_kernel(%arg0: i32, %arg1: memref<2x4x256xf32, #tpu.memory_space<vmem>>, %arg2: memref<16x4xf32, #tpu.memory_space<vmem>>, %arg3: memref<16x9xf32, #tpu.memory_space<vmem>>, %arg4: memref<9x256xf32, #tpu.memory_space<vmem>>, %arg5: memref<16x1xf32, #tpu.memory_space<vmem>>, %arg6: memref<16x1xf32, #tpu.memory_space<vmem>>, %arg7: memref<2x16x256xf32, #tpu.memory_space<vmem>>) attributes {dimension_semantics = [#tpu.dimension_semantics<parallel>], iteration_bounds = array<i64: 1>, scalar_prefetch = 0 : i64, scratch_operands = 0 : i64, tpu.core_type = #tpu.core_type<tc>, window_params = [{pipeline_mode = #tpu.pipeline_mode<synchronous>, transform_indices = @transform_0, window_bounds = array<i64: 2, 4, 256>}, {transform_indices = @transform_1, window_bounds = array<i64: 16, 4>}, {transform_indices = @transform_2, window_bounds = array<i64: 16, 9>}, {pipeline_mode = #tpu.pipeline_mode<synchronous>, transform_indices = @transform_3, window_bounds = array<i64: 9, 256>}, {transform_indices = @transform_4, window_bounds = array<i64: 16, 1>}, {transform_indices = @transform_5, window_bounds = array<i64: 16, 1>}, {transform_indices = @transform_6, window_bounds = array<i64: 2, 16, 256>}]} {
    %c0 = arith.constant 0 : index
    %c0_0 = arith.constant 0 : index
    %0 = vector.load %arg2[%c0, %c0_0] : memref<16x4xf32, #tpu.memory_space<vmem>>, vector<16x4xf32>
    %c0_1 = arith.constant 0 : index
    %c0_2 = arith.constant 0 : index
    %c0_3 = arith.constant 0 : index
    %1 = vector.load %arg1[%c0_1, %c0_2, %c0_3] : memref<2x4x256xf32, #tpu.memory_space<vmem>>, vector<1x4x256xf32>
    %2 = vector.shape_cast %1 : vector<1x4x256xf32> to vector<4x256xf32>
    %cst = arith.constant 0.000000e+00 : f32
    %3 = vector.broadcast %cst : f32 to vector<16x256xf32>
    %4 = vector.extract_strided_slice %0 {offsets = [0, 0], sizes = [16, 1], strides = [1, 1]} : vector<16x4xf32> to vector<16x1xf32>
    %5 = vector.extract_strided_slice %2 {offsets = [0, 0], sizes = [1, 256], strides = [1, 1]} : vector<4x256xf32> to vector<1x256xf32>
    %6 = vector.broadcast %4 : vector<16x1xf32> to vector<16x256xf32>
    %7 = vector.broadcast %5 : vector<1x256xf32> to vector<16x256xf32>
    %8 = arith.mulf %6, %7 : vector<16x256xf32>
    %9 = arith.addf %3, %8 : vector<16x256xf32>
    %10 = vector.extract_strided_slice %0 {offsets = [0, 1], sizes = [16, 1], strides = [1, 1]} : vector<16x4xf32> to vector<16x1xf32>
    %11 = vector.extract_strided_slice %2 {offsets = [1, 0], sizes = [1, 256], strides = [1, 1]} : vector<4x256xf32> to vector<1x256xf32>
    %12 = vector.broadcast %10 : vector<16x1xf32> to vector<16x256xf32>
    %13 = vector.broadcast %11 : vector<1x256xf32> to vector<16x256xf32>
    %14 = arith.mulf %12, %13 : vector<16x256xf32>
    %15 = arith.addf %9, %14 : vector<16x256xf32>
    %16 = vector.extract_strided_slice %0 {offsets = [0, 2], sizes = [16, 1], strides = [1, 1]} : vector<16x4xf32> to vector<16x1xf32>
    %17 = vector.extract_strided_slice %2 {offsets = [2, 0], sizes = [1, 256], strides = [1, 1]} : vector<4x256xf32> to vector<1x256xf32>
    %18 = vector.broadcast %16 : vector<16x1xf32> to vector<16x256xf32>
    %19 = vector.broadcast %17 : vector<1x256xf32> to vector<16x256xf32>
    %20 = arith.mulf %18, %19 : vector<16x256xf32>
    %21 = arith.addf %15, %20 : vector<16x256xf32>
    %22 = vector.extract_strided_slice %0 {offsets = [0, 3], sizes = [16, 1], strides = [1, 1]} : vector<16x4xf32> to vector<16x1xf32>
    %23 = vector.extract_strided_slice %2 {offsets = [3, 0], sizes = [1, 256], strides = [1, 1]} : vector<4x256xf32> to vector<1x256xf32>
    %24 = vector.broadcast %22 : vector<16x1xf32> to vector<16x256xf32>
    %25 = vector.broadcast %23 : vector<1x256xf32> to vector<16x256xf32>
    %26 = arith.mulf %24, %25 : vector<16x256xf32>
    %27 = arith.addf %21, %26 : vector<16x256xf32>
    %c1 = arith.constant 1 : index
    %c0_4 = arith.constant 0 : index
    %c0_5 = arith.constant 0 : index
    %28 = vector.load %arg1[%c1, %c0_4, %c0_5] : memref<2x4x256xf32, #tpu.memory_space<vmem>>, vector<1x4x256xf32>
    %29 = vector.shape_cast %28 : vector<1x4x256xf32> to vector<4x256xf32>
    %cst_6 = arith.constant 0.000000e+00 : f32
    %30 = vector.broadcast %cst_6 : f32 to vector<16x256xf32>
    %31 = vector.extract_strided_slice %0 {offsets = [0, 0], sizes = [16, 1], strides = [1, 1]} : vector<16x4xf32> to vector<16x1xf32>
    %32 = vector.extract_strided_slice %29 {offsets = [0, 0], sizes = [1, 256], strides = [1, 1]} : vector<4x256xf32> to vector<1x256xf32>
    %33 = vector.broadcast %31 : vector<16x1xf32> to vector<16x256xf32>
    %34 = vector.broadcast %32 : vector<1x256xf32> to vector<16x256xf32>
    %35 = arith.mulf %33, %34 : vector<16x256xf32>
    %36 = arith.addf %30, %35 : vector<16x256xf32>
    %37 = vector.extract_strided_slice %0 {offsets = [0, 1], sizes = [16, 1], strides = [1, 1]} : vector<16x4xf32> to vector<16x1xf32>
    %38 = vector.extract_strided_slice %29 {offsets = [1, 0], sizes = [1, 256], strides = [1, 1]} : vector<4x256xf32> to vector<1x256xf32>
    %39 = vector.broadcast %37 : vector<16x1xf32> to vector<16x256xf32>
    %40 = vector.broadcast %38 : vector<1x256xf32> to vector<16x256xf32>
    %41 = arith.mulf %39, %40 : vector<16x256xf32>
    %42 = arith.addf %36, %41 : vector<16x256xf32>
    %43 = vector.extract_strided_slice %0 {offsets = [0, 2], sizes = [16, 1], strides = [1, 1]} : vector<16x4xf32> to vector<16x1xf32>
    %44 = vector.extract_strided_slice %29 {offsets = [2, 0], sizes = [1, 256], strides = [1, 1]} : vector<4x256xf32> to vector<1x256xf32>
    %45 = vector.broadcast %43 : vector<16x1xf32> to vector<16x256xf32>
    %46 = vector.broadcast %44 : vector<1x256xf32> to vector<16x256xf32>
    %47 = arith.mulf %45, %46 : vector<16x256xf32>
    %48 = arith.addf %42, %47 : vector<16x256xf32>
    %49 = vector.extract_strided_slice %0 {offsets = [0, 3], sizes = [16, 1], strides = [1, 1]} : vector<16x4xf32> to vector<16x1xf32>
    %50 = vector.extract_strided_slice %29 {offsets = [3, 0], sizes = [1, 256], strides = [1, 1]} : vector<4x256xf32> to vector<1x256xf32>
    %51 = vector.broadcast %49 : vector<16x1xf32> to vector<16x256xf32>
    %52 = vector.broadcast %50 : vector<1x256xf32> to vector<16x256xf32>
    %53 = arith.mulf %51, %52 : vector<16x256xf32>
    %54 = arith.addf %48, %53 : vector<16x256xf32>
    %55 = vector.shape_cast %27 : vector<16x256xf32> to vector<1x16x256xf32>
    %56 = vector.shape_cast %54 : vector<16x256xf32> to vector<1x16x256xf32>
    %57 = tpu.concatenate %55, %56 in 0 : vector<1x16x256xf32>, vector<1x16x256xf32> -> vector<2x16x256xf32>
    %c0_7 = arith.constant 0 : index
    %c0_8 = arith.constant 0 : index
    %58 = vector.load %arg3[%c0_7, %c0_8] : memref<16x9xf32, #tpu.memory_space<vmem>>, vector<16x9xf32>
    %59 = vector.extract_strided_slice %58 {offsets = [0, 4], sizes = [16, 1], strides = [1, 1]} : vector<16x9xf32> to vector<16x1xf32>
    %60 = vector.shape_cast %59 : vector<16x1xf32> to vector<1x16x1xf32>
    %61 = vector.broadcast %60 : vector<1x16x1xf32> to vector<2x16x256xf32>
    %62 = arith.mulf %57, %61 : vector<2x16x256xf32>
    %c17_i32 = arith.constant 17 : i32
    %63 = tpu.dynamic_rotate %57 by %c17_i32 dim 2 : vector<2x16x256xf32>, i32 -> vector<2x16x256xf32>
    %64 = vector.extract_strided_slice %58 {offsets = [0, 0], sizes = [16, 1], strides = [1, 1]} : vector<16x9xf32> to vector<16x1xf32>
    %65 = vector.shape_cast %64 : vector<16x1xf32> to vector<1x16x1xf32>
    %c0_9 = arith.constant 0 : index
    %c0_10 = arith.constant 0 : index
    %66 = vector.load %arg4[%c0_9, %c0_10] : memref<9x256xf32, #tpu.memory_space<vmem>>, vector<1x256xf32>
    %67 = vector.shape_cast %66 : vector<1x256xf32> to vector<1x1x256xf32>
    %68 = vector.broadcast %65 : vector<1x16x1xf32> to vector<1x16x256xf32>
    %69 = vector.broadcast %67 : vector<1x1x256xf32> to vector<1x16x256xf32>
    %70 = arith.mulf %68, %69 : vector<1x16x256xf32>
    %71 = vector.broadcast %70 : vector<1x16x256xf32> to vector<2x16x256xf32>
    %72 = arith.mulf %63, %71 : vector<2x16x256xf32>
    %73 = arith.addf %62, %72 : vector<2x16x256xf32>
    %c16_i32 = arith.constant 16 : i32
    %74 = tpu.dynamic_rotate %57 by %c16_i32 dim 2 : vector<2x16x256xf32>, i32 -> vector<2x16x256xf32>
    %75 = vector.extract_strided_slice %58 {offsets = [0, 1], sizes = [16, 1], strides = [1, 1]} : vector<16x9xf32> to vector<16x1xf32>
    %76 = vector.shape_cast %75 : vector<16x1xf32> to vector<1x16x1xf32>
    %c1_11 = arith.constant 1 : index
    %c0_12 = arith.constant 0 : index
    %77 = vector.load %arg4[%c1_11, %c0_12] : memref<9x256xf32, #tpu.memory_space<vmem>>, vector<1x256xf32>
    %78 = vector.shape_cast %77 : vector<1x256xf32> to vector<1x1x256xf32>
    %79 = vector.broadcast %76 : vector<1x16x1xf32> to vector<1x16x256xf32>
    %80 = vector.broadcast %78 : vector<1x1x256xf32> to vector<1x16x256xf32>
    %81 = arith.mulf %79, %80 : vector<1x16x256xf32>
    %82 = vector.broadcast %81 : vector<1x16x256xf32> to vector<2x16x256xf32>
    %83 = arith.mulf %74, %82 : vector<2x16x256xf32>
    %84 = arith.addf %73, %83 : vector<2x16x256xf32>
    %c15_i32 = arith.constant 15 : i32
    %85 = tpu.dynamic_rotate %57 by %c15_i32 dim 2 : vector<2x16x256xf32>, i32 -> vector<2x16x256xf32>
    %86 = vector.extract_strided_slice %58 {offsets = [0, 2], sizes = [16, 1], strides = [1, 1]} : vector<16x9xf32> to vector<16x1xf32>
    %87 = vector.shape_cast %86 : vector<16x1xf32> to vector<1x16x1xf32>
    %c2 = arith.constant 2 : index
    %c0_13 = arith.constant 0 : index
    %88 = vector.load %arg4[%c2, %c0_13] : memref<9x256xf32, #tpu.memory_space<vmem>>, vector<1x256xf32>
    %89 = vector.shape_cast %88 : vector<1x256xf32> to vector<1x1x256xf32>
    %90 = vector.broadcast %87 : vector<1x16x1xf32> to vector<1x16x256xf32>
    %91 = vector.broadcast %89 : vector<1x1x256xf32> to vector<1x16x256xf32>
    %92 = arith.mulf %90, %91 : vector<1x16x256xf32>
    %93 = vector.broadcast %92 : vector<1x16x256xf32> to vector<2x16x256xf32>
    %94 = arith.mulf %85, %93 : vector<2x16x256xf32>
    %95 = arith.addf %84, %94 : vector<2x16x256xf32>
    %c1_i32 = arith.constant 1 : i32
    %96 = tpu.dynamic_rotate %57 by %c1_i32 dim 2 : vector<2x16x256xf32>, i32 -> vector<2x16x256xf32>
    %97 = vector.extract_strided_slice %58 {offsets = [0, 3], sizes = [16, 1], strides = [1, 1]} : vector<16x9xf32> to vector<16x1xf32>
    %98 = vector.shape_cast %97 : vector<16x1xf32> to vector<1x16x1xf32>
    %c3 = arith.constant 3 : index
    %c0_14 = arith.constant 0 : index
    %99 = vector.load %arg4[%c3, %c0_14] : memref<9x256xf32, #tpu.memory_space<vmem>>, vector<1x256xf32>
    %100 = vector.shape_cast %99 : vector<1x256xf32> to vector<1x1x256xf32>
    %101 = vector.broadcast %98 : vector<1x16x1xf32> to vector<1x16x256xf32>
    %102 = vector.broadcast %100 : vector<1x1x256xf32> to vector<1x16x256xf32>
    %103 = arith.mulf %101, %102 : vector<1x16x256xf32>
    %104 = vector.broadcast %103 : vector<1x16x256xf32> to vector<2x16x256xf32>
    %105 = arith.mulf %96, %104 : vector<2x16x256xf32>
    %106 = arith.addf %95, %105 : vector<2x16x256xf32>
    %c255_i32 = arith.constant 255 : i32
    %107 = tpu.dynamic_rotate %57 by %c255_i32 dim 2 : vector<2x16x256xf32>, i32 -> vector<2x16x256xf32>
    %108 = vector.extract_strided_slice %58 {offsets = [0, 5], sizes = [16, 1], strides = [1, 1]} : vector<16x9xf32> to vector<16x1xf32>
    %109 = vector.shape_cast %108 : vector<16x1xf32> to vector<1x16x1xf32>
    %c5 = arith.constant 5 : index
    %c0_15 = arith.constant 0 : index
    %110 = vector.load %arg4[%c5, %c0_15] : memref<9x256xf32, #tpu.memory_space<vmem>>, vector<1x256xf32>
    %111 = vector.shape_cast %110 : vector<1x256xf32> to vector<1x1x256xf32>
    %112 = vector.broadcast %109 : vector<1x16x1xf32> to vector<1x16x256xf32>
    %113 = vector.broadcast %111 : vector<1x1x256xf32> to vector<1x16x256xf32>
    %114 = arith.mulf %112, %113 : vector<1x16x256xf32>
    %115 = vector.broadcast %114 : vector<1x16x256xf32> to vector<2x16x256xf32>
    %116 = arith.mulf %107, %115 : vector<2x16x256xf32>
    %117 = arith.addf %106, %116 : vector<2x16x256xf32>
    %c241_i32 = arith.constant 241 : i32
    %118 = tpu.dynamic_rotate %57 by %c241_i32 dim 2 : vector<2x16x256xf32>, i32 -> vector<2x16x256xf32>
    %119 = vector.extract_strided_slice %58 {offsets = [0, 6], sizes = [16, 1], strides = [1, 1]} : vector<16x9xf32> to vector<16x1xf32>
    %120 = vector.shape_cast %119 : vector<16x1xf32> to vector<1x16x1xf32>
    %c6 = arith.constant 6 : index
    %c0_16 = arith.constant 0 : index
    %121 = vector.load %arg4[%c6, %c0_16] : memref<9x256xf32, #tpu.memory_space<vmem>>, vector<1x256xf32>
    %122 = vector.shape_cast %121 : vector<1x256xf32> to vector<1x1x256xf32>
    %123 = vector.broadcast %120 : vector<1x16x1xf32> to vector<1x16x256xf32>
    %124 = vector.broadcast %122 : vector<1x1x256xf32> to vector<1x16x256xf32>
    %125 = arith.mulf %123, %124 : vector<1x16x256xf32>
    %126 = vector.broadcast %125 : vector<1x16x256xf32> to vector<2x16x256xf32>
    %127 = arith.mulf %118, %126 : vector<2x16x256xf32>
    %128 = arith.addf %117, %127 : vector<2x16x256xf32>
    %c240_i32 = arith.constant 240 : i32
    %129 = tpu.dynamic_rotate %57 by %c240_i32 dim 2 : vector<2x16x256xf32>, i32 -> vector<2x16x256xf32>
    %130 = vector.extract_strided_slice %58 {offsets = [0, 7], sizes = [16, 1], strides = [1, 1]} : vector<16x9xf32> to vector<16x1xf32>
    %131 = vector.shape_cast %130 : vector<16x1xf32> to vector<1x16x1xf32>
    %c7 = arith.constant 7 : index
    %c0_17 = arith.constant 0 : index
    %132 = vector.load %arg4[%c7, %c0_17] : memref<9x256xf32, #tpu.memory_space<vmem>>, vector<1x256xf32>
    %133 = vector.shape_cast %132 : vector<1x256xf32> to vector<1x1x256xf32>
    %134 = vector.broadcast %131 : vector<1x16x1xf32> to vector<1x16x256xf32>
    %135 = vector.broadcast %133 : vector<1x1x256xf32> to vector<1x16x256xf32>
    %136 = arith.mulf %134, %135 : vector<1x16x256xf32>
    %137 = vector.broadcast %136 : vector<1x16x256xf32> to vector<2x16x256xf32>
    %138 = arith.mulf %129, %137 : vector<2x16x256xf32>
    %139 = arith.addf %128, %138 : vector<2x16x256xf32>
    %c239_i32 = arith.constant 239 : i32
    %140 = tpu.dynamic_rotate %57 by %c239_i32 dim 2 : vector<2x16x256xf32>, i32 -> vector<2x16x256xf32>
    %141 = vector.extract_strided_slice %58 {offsets = [0, 8], sizes = [16, 1], strides = [1, 1]} : vector<16x9xf32> to vector<16x1xf32>
    %142 = vector.shape_cast %141 : vector<16x1xf32> to vector<1x16x1xf32>
    %c8 = arith.constant 8 : index
    %c0_18 = arith.constant 0 : index
    %143 = vector.load %arg4[%c8, %c0_18] : memref<9x256xf32, #tpu.memory_space<vmem>>, vector<1x256xf32>
    %144 = vector.shape_cast %143 : vector<1x256xf32> to vector<1x1x256xf32>
    %145 = vector.broadcast %142 : vector<1x16x1xf32> to vector<1x16x256xf32>
    %146 = vector.broadcast %144 : vector<1x1x256xf32> to vector<1x16x256xf32>
    %147 = arith.mulf %145, %146 : vector<1x16x256xf32>
    %148 = vector.broadcast %147 : vector<1x16x256xf32> to vector<2x16x256xf32>
    %149 = arith.mulf %140, %148 : vector<2x16x256xf32>
    %150 = arith.addf %139, %149 : vector<2x16x256xf32>
    %cst_19 = arith.constant dense<0.000000e+00> : vector<2x16xf32>
    %151 = vector.multi_reduction <add>, %150, %cst_19 [2] : vector<2x16x256xf32> to vector<2x16xf32>
    %152 = vector.shape_cast %151 : vector<2x16xf32> to vector<2x16x1xf32>
    %cst_20 = arith.constant dense<0.000000e+00> : vector<16x1xf32>
    %153 = vector.multi_reduction <add>, %152, %cst_20 [0] : vector<2x16x1xf32> to vector<16x1xf32>
    %154 = vector.shape_cast %153 : vector<16x1xf32> to vector<1x16x1xf32>
    %cst_21 = arith.constant 0.001953125 : f32
    %155 = vector.broadcast %cst_21 : f32 to vector<1x16x1xf32>
    %156 = arith.mulf %154, %155 : vector<1x16x1xf32>
    %157 = vector.broadcast %156 : vector<1x16x1xf32> to vector<2x16x256xf32>
    %158 = arith.subf %150, %157 : vector<2x16x256xf32>
    %159 = arith.mulf %158, %158 : vector<2x16x256xf32>
    %cst_22 = arith.constant dense<0.000000e+00> : vector<2x16xf32>
    %160 = vector.multi_reduction <add>, %159, %cst_22 [2] : vector<2x16x256xf32> to vector<2x16xf32>
    %161 = vector.shape_cast %160 : vector<2x16xf32> to vector<2x16x1xf32>
    %cst_23 = arith.constant dense<0.000000e+00> : vector<16x1xf32>
    %162 = vector.multi_reduction <add>, %161, %cst_23 [0] : vector<2x16x1xf32> to vector<16x1xf32>
    %163 = vector.shape_cast %162 : vector<16x1xf32> to vector<1x16x1xf32>
    %cst_24 = arith.constant 0.001953125 : f32
    %164 = vector.broadcast %cst_24 : f32 to vector<1x16x1xf32>
    %165 = arith.mulf %163, %164 : vector<1x16x1xf32>
    %c0_25 = arith.constant 0 : index
    %c0_26 = arith.constant 0 : index
    %166 = vector.load %arg5[%c0_25, %c0_26] : memref<16x1xf32, #tpu.memory_space<vmem>>, vector<16x1xf32>
    %167 = vector.shape_cast %166 : vector<16x1xf32> to vector<1x16x1xf32>
    %cst_27 = arith.constant 9.99999974E-6 : f32
    %168 = vector.broadcast %cst_27 : f32 to vector<1x16x1xf32>
    %169 = arith.addf %165, %168 : vector<1x16x1xf32>
    %170 = math.rsqrt %169 : vector<1x16x1xf32>
    %171 = arith.mulf %167, %170 : vector<1x16x1xf32>
    %c0_28 = arith.constant 0 : index
    %c0_29 = arith.constant 0 : index
    %172 = vector.load %arg6[%c0_28, %c0_29] : memref<16x1xf32, #tpu.memory_space<vmem>>, vector<16x1xf32>
    %173 = vector.shape_cast %172 : vector<16x1xf32> to vector<1x16x1xf32>
    %174 = vector.broadcast %171 : vector<1x16x1xf32> to vector<2x16x256xf32>
    %175 = arith.mulf %158, %174 : vector<2x16x256xf32>
    %176 = vector.broadcast %173 : vector<1x16x1xf32> to vector<2x16x256xf32>
    %177 = arith.addf %175, %176 : vector<2x16x256xf32>
    %cst_30 = arith.constant 0.000000e+00 : f32
    %178 = vector.broadcast %cst_30 : f32 to vector<2x16x256xf32>
    %179 = arith.maximumf %177, %178 : vector<2x16x256xf32>
    %c0_31 = arith.constant 0 : index
    %c0_32 = arith.constant 0 : index
    %c0_33 = arith.constant 0 : index
    %180 = vector.load %arg7[%c0_31, %c0_32, %c0_33] : memref<2x16x256xf32, #tpu.memory_space<vmem>>, vector<2x16x256xf32>
    tpu.vector_store %arg7[%c0_31, %c0_32, %c0_33], %179 {strides = array<i32>} : memref<2x16x256xf32, #tpu.memory_space<vmem>>, vector<2x16x256xf32>,
    return
  }
  func.func @transform_0(%arg0: i32) -> (i32, i32, i32) {
    %c0_i32 = arith.constant 0 : i32
    %c0_i32_0 = arith.constant 0 : i32
    %c0_i32_1 = arith.constant 0 : i32
    %c0_i32_2 = arith.constant 0 : i32
    return %c0_i32, %c0_i32_0, %c0_i32_1 : i32, i32, i32
  }
  func.func @transform_1(%arg0: i32) -> (i32, i32) {
    %c0_i32 = arith.constant 0 : i32
    %c0_i32_0 = arith.constant 0 : i32
    return %arg0, %c0_i32 : i32, i32
  }
  func.func @transform_2(%arg0: i32) -> (i32, i32) {
    %c0_i32 = arith.constant 0 : i32
    %c0_i32_0 = arith.constant 0 : i32
    return %arg0, %c0_i32 : i32, i32
  }
  func.func @transform_3(%arg0: i32) -> (i32, i32) {
    %c0_i32 = arith.constant 0 : i32
    %c0_i32_0 = arith.constant 0 : i32
    %c0_i32_1 = arith.constant 0 : i32
    return %c0_i32, %c0_i32_0 : i32, i32
  }
  func.func @transform_4(%arg0: i32) -> (i32, i32) {
    %c0_i32 = arith.constant 0 : i32
    %c0_i32_0 = arith.constant 0 : i32
    return %arg0, %c0_i32 : i32, i32
  }
  func.func @transform_5(%arg0: i32) -> (i32, i32) {
    %c0_i32 = arith.constant 0 : i32
    %c0_i32_0 = arith.constant 0 : i32
    return %arg0, %c0_i32 : i32, i32
  }
  func.func @transform_6(%arg0: i32) -> (i32, i32, i32) {
    %c0_i32 = arith.constant 0 : i32
    %c0_i32_0 = arith.constant 0 : i32
    %c0_i32_1 = arith.constant 0 : i32
    return %c0_i32, %arg0, %c0_i32_0 : i32, i32, i32
  }
}

</mosaic_0001>

<bundles_post_ra>
// kernel: tpu_custom_call.1
= control target key start
LH: loop header
LB: loop body
LE: loop exit
PB: predicated region body
PF: predicated region fallthrough
CT: control target
= control target key end

     0   :  { %vm36_vm0 = vcmask 1043456   ;;  %vm29_vm1 = vcmask 31744   ;;  %v1866_v6 = vmov 0.0   ;;  %s2704_s0 = inlined_call_operand.vmem [shape: f32[2,4,256], index: 0, kind: input, shape index: {}]   ;;  %s2705_s1 = inlined_call_operand.vmem [shape: f32[16,4], index: 1, kind: input, shape index: {}]   ;;  %s2706_s2 = inlined_call_operand.vmem [shape: f32[16,9], index: 2, kind: input, shape index: {}]   ;;  %s2707_s3 = inlined_call_operand.vmem [shape: f32[9,256], index: 3, kind: input, shape index: {}]   ;;  %s2708_s4 = inlined_call_operand.vmem [shape: f32[16,1], index: 4, kind: input, shape index: {}]   ;;  %s2709_s5 = inlined_call_operand.vmem [shape: f32[16,1], index: 5, kind: input, shape index: {}]   ;;  %s2710_s6 = inlined_call_operand.hbm [shape: f32[2,16,256], index: 6, kind: output, shape index: {}]  }
   0x1   :  { %v26_v0 = vld [vmem:[%s2704_s0] sm:$0xff]  ;;  %v1752_v1 = vld [vmem:[%s2704_s0 + $0x8] sm:$0xff]  ;;  %107 = vmatprep.mubr.f32.mxu0 %v1866_v6  ;;  %629 = vmatprep.mubr.f32.mxu1 %v1866_v6 }
   0x2   :  { %v24_v2 = vld [vmem:[%s2705_s1] sm:$0xff]  ;;  %v28_v3 = vcombine.high %v26_v0, %v26_v0  ;;  %v558_v4 = vcombine.high %v1752_v1, %v1752_v1  ;;  %v37_v5 = vsel %vm36_vm0, %v26_v0, 0  ;;  %v559_v7 = vsel %vm36_vm0, %v1752_v1, 0  ;;  %v25_v8 = vld [vmem:[%s2705_s1 + $0x8] sm:$0xff] }
   0x3   :  { %v1937_v9 = vand.u32 4294901760, %v37_v5  ;;  %v1939_v10 = vand.u32 4294901760, %v559_v7  ;;  %v31_v11 = vsel %vm29_vm1, %v24_v2, 0  ;;  %v34_v12 = vsel %vm29_vm1, %v25_v8, 0 }
   0x4   :  { %11 = vsyncpa [#allocation3], 0  ;;  %v39_v13 = vsel %vm36_vm0, %v28_v3, 0  ;;  %v561_v14 = vsel %vm36_vm0, %v558_v4, 0  ;;  %v1943_v15 = vand.u32 4294901760, %v31_v11  ;;  %v1945_v16 = vand.u32 4294901760, %v34_v12 }
   0x5   :  { %v1947_v17 = vand.u32 4294901760, %v39_v13  ;;  %v1949_v18 = vand.u32 4294901760, %v561_v14  ;;  %v1952_v19 = vsub.f32 %v37_v5, %v1937_v9  ;;  %v1955_v20 = vsub.f32 %v559_v7, %v1939_v10  ;;  %v1976_v27 = vld [vmem:[%s2706_s2] sm:$0xff]  ;;  %v2008_v46 = vld [vmem:[%s2706_s2 + $0x8] sm:$0xff]  ;;  %s1876_s2 = smov 16   ;;  %s1877_s7 = smov 17  }
   0x6   :  { %v1958_v21 = vsub.f32 %v31_v11, %v1943_v15  ;;  %v1961_v22 = vsub.f32 %v34_v12, %v1945_v16  ;;  %v1867_v33 = vmov 4   ;;  %v1868_v34 = vmov 1   ;;  %s1878_s8 = smov 15   ;;  %s1879_s9 = smov 1  }
   0x7   :  { %42 = vmatprep.subr.mxu0 %v1947_v17  ;;  %564 = vmatprep.subr.mxu1 %v1949_v18  ;;  %v1966_v23 = vsub.f32 %v39_v13, %v1947_v17  ;;  %v138_v24 = vand.u32 4294901760, %v1952_v19  ;;  %v1970_v25 = vsub.f32 %v561_v14, %v1949_v18  ;;  %v660_v26 = vand.u32 4294901760, %v1955_v20  ;;  %s1880_s10 = smov 127   ;;  %s1881_s11 = smov 113  }
   0x8   :  { %44 = vmatpush1.msra.mxu0 %v1937_v9  ;;  %566 = vmatpush1.msra.mxu1 %v1939_v10  ;;  %v1981_v28 = vand.u32 4294901760, %v1958_v21  ;;  %v1984_v29 = vand.u32 4294901760, %v1961_v22  ;;  %v1869_v47 = vmov 2   ;;  %v1870_v48 = vmov 5   ;;  %s1882_s12 = smov 112   ;;  %s1883_s13 = smov 111  }
   0x9   :  { %v132_v30 = vand.u32 4294901760, %v1966_v23  ;;  %v139_v31 = vsub.f32 %v1952_v19, %v138_v24  ;;  %v654_v32 = vand.u32 4294901760, %v1970_v25  ;;  %1820 = vset.pattern.permute.xlu1 %v1867_v33  ;;  %1821 = vset.pattern.permute.xlu0 %v1868_v34  ;;  %v661_v39 = vsub.f32 %v1955_v20, %v660_v26 }
   0xa   :  { %v111_v35 = vsub.f32 %v1958_v21, %v1981_v28  ;;  %v122_v36 = vsub.f32 %v1961_v22, %v1984_v29  ;;  %1081 = vperm.xlu1 %1820, %v1976_v27   ;;  %1192 = vperm.xlu0 %1821, %v1976_v27   ;;  %v1871_v49 = vmov 3   ;;  %v1872_v50 = vmov 6  }
   0xb   :  { %v133_v37 = vsub.f32 %v1966_v23, %v132_v30  ;;  %v655_v38 = vsub.f32 %v1970_v25, %v654_v32  ;;  %v140_v41 = vand.u32 4294901760, %v139_v31  ;;  %v662_v45 = vand.u32 4294901760, %v661_v39 }
   0xc   :  { %v112_v40 = vand.u32 4294901760, %v111_v35  ;;  %v123_v44 = vand.u32 4294901760, %v122_v36  ;;  %v1873_v51 = vmov 7   ;;  %v1874_v52 = vmov 8  }
   0xd   :  { %v134_v42 = vand.u32 4294901760, %v133_v37  ;;  %v656_v43 = vand.u32 4294901760, %v655_v38  ;;  %v1875_v53 = vmov 0   ;;  %v1753_v35 = vld [vmem:[%s2707_s3 + $0x1] ss:$8 sm:$0x3] }
   0xe   :  { %113 = vmatmul.mubr.f32.vlgmr.msra.gmra.mrb[0].mxu0 %v112_v40  ;;  %635 = vmatmul.mubr.f32.vlgmr.msra.gmra.mrb[0].mxu1 %v112_v40 }
   0xf   :  { %135 = vmatprep.subr.mxu0 %v134_v42  ;;  %118 = vmatprep.mubr.f32.mxu0 %v1866_v6 }
  0x10   :  { %141 = vmatpush1.msra.mxu0 %v140_v41  ;;  %640 = vmatprep.mubr.f32.mxu1 %v1866_v6 }
  0x11   :  { %657 = vmatprep.subr.mxu1 %v656_v43  ;;  %221 = vmatprep.subr.mxu0 %v1966_v23 }
  0x12   :  { %124 = vmatmul.mubr.f32.gmra.mrb[2].mxu0 %v123_v44  ;;  %646 = vmatmul.mubr.f32.gmra.mrb[2].mxu1 %v123_v44  ;;  %v1755_v44 = vld [vmem:[%s2707_s3 + $0x3] ss:$8 sm:$0x3] }
  0x13   :  { %204 = vmatprep.mubr.f32.mxu0 %v1866_v6  ;;  %663 = vmatpush1.msra.mxu1 %v662_v45 }
  0x14   :  { %726 = vmatprep.mubr.f32.mxu1 %v1866_v6  ;;  %743 = vmatprep.subr.mxu1 %v1970_v25 }
  0x15   :  { %1086 = vperm.xlu1 %1820, %v2008_v46   ;;  %1824 = vset.pattern.permute.xlu0 %v1869_v47 }
  0x16   :  { %206 = vmatmul.mubr.f32.vlgmr.msra.gmra.mrb[0].mxu0 %v1943_v15  ;;  %728 = vmatmul.mubr.f32.vlgmr.msra.gmra.mrb[0].mxu1 %v1943_v15 }
  0x17   :  { %211 = vmatprep.mubr.f32.mxu0 %v1866_v6  ;;  %224 = vmatpush1.msra.mxu0 %v1952_v19 }
  0x18   :  { %733 = vmatprep.mubr.f32.mxu1 %v1866_v6  ;;  %746 = vmatpush1.msra.mxu1 %v1955_v20 }
  0x19   :  { %305 = vmatprep.subr.mxu0 %v1947_v17  ;;  %827 = vmatprep.subr.mxu1 %v1949_v18 }
  0x1a   :  { %213 = vmatmul.mubr.f32.gmra.mrb[2].mxu0 %v1945_v16  ;;  %735 = vmatmul.mubr.f32.gmra.mrb[2].mxu1 %v1945_v16 }
  0x1b   :  { %287 = vmatprep.mubr.f32.mxu0 %v1866_v6  ;;  %809 = vmatprep.mubr.f32.mxu1 %v1866_v6 }
  0x1c   :  { %1822 = vset.pattern.permute.xlu1 %v1868_v34  ;;  %1262 = vperm.xlu0 %1824, %v2008_v46  }
  0x1d   :  { %1196 = vperm.xlu1 %1822, %v2008_v46  }
  0x1e   :  { %290 = vmatmul.mubr.f32.vlgmr.msra.gmra.mrb[0].mxu0 %v1958_v21  ;;  %812 = vmatmul.mubr.f32.vlgmr.msra.gmra.mrb[0].mxu1 %v1958_v21 }
  0x1f   :  { %295 = vmatprep.mubr.f32.mxu0 %v1866_v6  ;;  %307 = vmatpush1.msra.mxu0 %v1937_v9 }
  0x20   :  { %817 = vmatprep.mubr.f32.mxu1 %v1866_v6  ;;  %829 = vmatpush1.msra.mxu1 %v1939_v10 }
  0x21   :  { %392 = vmatprep.subr.mxu0 %v132_v30  ;;  %914 = vmatprep.subr.mxu1 %v654_v32 }
  0x22   :  { %298 = vmatmul.mubr.f32.gmra.mrb[2].mxu0 %v1961_v22  ;;  %820 = vmatmul.mubr.f32.gmra.mrb[2].mxu1 %v1961_v22 }
  0x23   :  { %370 = vmatprep.mubr.f32.mxu0 %v1866_v6  ;;  %892 = vmatprep.mubr.f32.mxu1 %v1866_v6 }
  0x24   :  { %1823 = vset.pattern.permute.xlu1 %v1869_v47  ;;  %1826 = vset.pattern.permute.xlu0 %v1870_v48 }
  0x25   :  { %1258 = vperm.xlu1 %1823, %v1976_v27   ;;  %1390 = vperm.xlu0 %1826, %v1976_v27  }
  0x26   :  { %374 = vmatmul.mubr.f32.vlgmr.msra.gmra.mrb[0].mxu0 %v1981_v28  ;;  %896 = vmatmul.mubr.f32.vlgmr.msra.gmra.mrb[0].mxu1 %v1981_v28 }
  0x27   :  { %379 = vmatprep.mubr.f32.mxu0 %v1866_v6  ;;  %396 = vmatpush1.msra.mxu0 %v138_v24 }
  0x28   :  { %901 = vmatprep.mubr.f32.mxu1 %v1866_v6  ;;  %918 = vmatpush1.msra.mxu1 %v660_v26  ;;  %v1113_v26 = vlaneseq }
  0x29   :  { %475 = vmatprep.subr.mxu0 %v1947_v17  ;;  %997 = vmatprep.subr.mxu1 %v1949_v18 }
  0x2a   :  { %383 = vmatmul.mubr.f32.gmra.mrb[2].mxu0 %v1984_v29  ;;  %905 = vmatmul.mubr.f32.gmra.mrb[2].mxu1 %v1984_v29  ;;  %v1135_v29 = vshrl.u32 %v1113_v26, 7  ;;  %v2281_v32 = vand.u32 127, %v1113_v26  ;;  %v1124_v26 = vld [vmem:[%s2707_s3] ss:$8 sm:$0x3] }
  0x2b   :  { %459 = vmatprep.mubr.f32.mxu0 %v1866_v6  ;;  %981 = vmatprep.mubr.f32.mxu1 %v1866_v6 }
  0x2c   :  { %1825 = vset.pattern.permute.xlu1 %v1871_v49  ;;  %1829 = vset.pattern.permute.xlu0 %v1872_v50  ;;  %v2283_v33 = vsub.s32 0, %v1135_v29  ;;  %v2285_v34 = vsub.s32 1, %v1135_v29  ;;  %vm1180_vm2 = vcmp.lt.s32.totalorder %v2281_v32, 16  ;;  %vm1312_vm3 = vcmp.lt.s32.totalorder %v2281_v32, 1 }
  0x2d   :  { %1324 = vperm.xlu1 %1825, %v1976_v27   ;;  %1460 = vperm.xlu0 %1829, %v2008_v46   ;;  %vm1115_vm4 = vcmp.lt.s32.totalorder %v2281_v32, 17  ;;  %vm1246_vm5 = vcmp.lt.s32.totalorder %v2281_v32, 15  ;;  %vm1378_vm6 = vcmp.lt.s32.totalorder %v2281_v32, 127  ;;  %vm1444_vm7 = vcmp.lt.s32.totalorder %v2281_v32, 113 }
  0x2e   :  { %461 = vmatmul.mubr.f32.vlgmr.msra.gmra.mrb[0].mxu0 %v1943_v15  ;;  %983 = vmatmul.mubr.f32.vlgmr.msra.gmra.mrb[0].mxu1 %v1943_v15  ;;  %v2297_v38 = vrot.slane %v1753_v35, %v2283_v33  ;;  %v2300_v39 = vrot.slane %v1753_v35, %v2285_v34  ;;  %v2317_v49 = vrot.slane %v1755_v44, %v2283_v33  ;;  %vm1510_vm8 = vcmp.lt.s32.totalorder %v2281_v32, 112 }
  0x2f   :  { %466 = vmatprep.mubr.f32.mxu0 %v1866_v6  ;;  %477 = vmatpush1.msra.mxu0 %v1937_v9  ;;  %vm1576_vm9 = vcmp.lt.s32.totalorder %v2281_v32, 111 }
  0x30   :  { %988 = vmatprep.mubr.f32.mxu1 %v1866_v6  ;;  %999 = vmatpush1.msra.mxu1 %v1939_v10 }
  0x31   :  { %1328 = vperm.xlu1 %1825, %v2008_v46   ;;  %1830 = vset.pattern.permute.xlu0 %v1873_v51 }
  0x32   :  { %468 = vmatmul.mubr.f32.gmra.mrb[2].mxu0 %v1945_v16  ;;  %990 = vmatmul.mubr.f32.gmra.mrb[2].mxu1 %v1945_v16 }
  0x33   :  { %540 = vmatprep.mubr.f32.mxu0 %v1866_v6  ;;  %1062 = vmatprep.mubr.f32.mxu1 %v1866_v6 }
  0x34   :  { %1522 = vperm.xlu0 %1830, %v1976_v27  }
  0x35   :  { %1827 = vset.pattern.permute.xlu1 %v1870_v48 }
  0x36   :  { %542 = vmatmul.mubr.f32.vlgmr.msra.gmra.mrb[0].mxu0 %v1943_v15  ;;  %1064 = vmatmul.mubr.f32.vlgmr.msra.gmra.mrb[0].mxu1 %v1943_v15 }
  0x37   :  { %547 = vmatprep.mubr.f32.mxu0 %v1866_v6  ;;  %1069 = vmatprep.mubr.f32.mxu1 %v1866_v6 }
  0x38   :  { %1394 = vperm.xlu1 %1827, %v2008_v46   ;;  %1833 = vset.pattern.permute.xlu0 %v1874_v52 }
  0x39   :  { %1592 = vperm.xlu0 %1833, %v2008_v46  }
  0x3a   :  { %549 = vmatmul.mubr.f32.gmra.mrb[2].mxu0 %v1945_v16  ;;  %1071 = vmatmul.mubr.f32.gmra.mrb[2].mxu1 %v1945_v16 }
  0x3c   :  { %1828 = vset.pattern.permute.xlu1 %v1872_v50  ;;  %v2320_v50 = vrot.slane %v1755_v44, %v2285_v34 }
  0x3d   :  { %1456 = vperm.xlu1 %1828, %v1976_v27   ;;  %1834 = vset.pattern.permute.xlu0 %v1875_v53 }
  0x3e   :  { %1126 = vperm.xlu0 %1834, %v1976_v27  }
  0x41   :  { %1831 = vset.pattern.permute.xlu1 %v1873_v51 }
  0x42   :  { %1526 = vperm.xlu1 %1831, %v2008_v46   ;;  %1130 = vperm.xlu0 %1834, %v2008_v46  }
  0x46   :  { %1832 = vset.pattern.permute.xlu1 %v1874_v52 }
  0x47   :  { %1588 = vperm.xlu1 %1832, %v1976_v27  }
  0x4b   :  { %1835 = vset.pattern.permute.xlu1 %v1875_v53 }
  0x89   :  { %v2081_v54 = vpop.permute.xlu1 %1081  ;;  %v2179_v4 = vpop.permute.xlu0 %1192 }
  0x8a   :  { %v1210_v40 = vmul.f32 %v2297_v38, %v2179_v4  ;;  %v1211_v41 = vmul.f32 %v2300_v39, %v2179_v4 }
  0x94   :  { %v1087_v59 = vpop.permute.xlu1 %1086 }
  0x9b   :  { %v2191_v6 = vpop.permute.xlu0 %1262 }
  0x9c   :  { %v2185_v5 = vpop.permute.xlu1 %1196 }
  0xa4   :  { %v2193_v7 = vpop.permute.xlu1 %1258  ;;  %v2199_v8 = vpop.permute.xlu0 %1390 }
  0xac   :  { %v2205_v9 = vpop.permute.xlu1 %1324  ;;  %v2211_v10 = vpop.permute.xlu0 %1460 }
  0xb0   :  { %v2213_v11 = vpop.permute.xlu1 %1328 }
  0xb3   :  { %v2219_v12 = vpop.permute.xlu0 %1522 }
  0xb7   :  { %v2221_v13 = vpop.permute.xlu1 %1394 }
  0xb8   :  { %v2231_v14 = vpop.permute.xlu0 %1592 }
  0xb9   :  { %2715 = vst [vmem:[#allocation5_spill] sm:$0xff] %v2231_v14 }
  0xbc   :  { %v2233_v15 = vpop.permute.xlu1 %1456 }
  0xbd   :  { %v2239_v16 = vpop.permute.xlu0 %1126 }
  0xc1   :  { %v2241_v17 = vpop.permute.xlu1 %1526  ;;  %v2251_v18 = vpop.permute.xlu0 %1130 }
  0xc2   :  { %2716 = vst [vmem:[#allocation6_spill] sm:$0xff] %v2241_v17 }
  0xc6   :  { %v2253_v19 = vpop.permute.xlu1 %1588 }
 0x109   :  { %v2083_v55 = vpop.f32.mrb[0].mxu0  ;;  %v2085_v56 = vpop.f32.mrb[0].mxu1 }
 0x10a   :  { %v2087_v57 = vpop.f32.mrb[1].mxu1  ;;  %1164 = vrot.lane.b32.xlu1 %v2083_v55, %s1876_s2  ;;  %1097 = vrot.lane.b32.xlu0 %v2083_v55, %s1877_s7  ;;  %v2093_v58 = vpop.f32.mrb[1].mxu0 }
 0x10d   :  { %v2095_v60 = vpop.f32.mrb[2].mxu0  ;;  %v2097_v61 = vpop.f32.mrb[2].mxu1 }
 0x10e   :  { %v2099_v62 = vpop.f32.mrb[3].mxu1  ;;  %1168 = vrot.lane.b32.xlu1 %v2085_v56, %s1876_s2  ;;  %1101 = vrot.lane.b32.xlu0 %v2085_v56, %s1877_s7  ;;  %v2105_v63 = vpop.f32.mrb[3].mxu0  ;;  %v2108_v0 = vmul.f32 %v1087_v59, %v2095_v60  ;;  %v2111_v1 = vmul.f32 %v1087_v59, %v2097_v61 }
 0x10f   :  { %v2114_v2 = vmul.f32 %v1087_v59, %v2105_v63  ;;  %v2117_v3 = vmul.f32 %v1087_v59, %v2099_v62 }
 0x112   :  { %1230 = vrot.lane.b32.xlu1 %v2083_v55, %s1878_s8  ;;  %1234 = vrot.lane.b32.xlu0 %v2085_v56, %s1878_s8 }
 0x116   :  { %1296 = vrot.lane.b32.xlu1 %v2083_v55, %s1879_s9  ;;  %1366 = vrot.lane.b32.xlu0 %v2085_v56, %s1880_s10 }
 0x11a   :  { %1300 = vrot.lane.b32.xlu1 %v2085_v56, %s1879_s9  ;;  %1428 = vrot.lane.b32.xlu0 %v2083_v55, %s1881_s11 }
 0x11e   :  { %1362 = vrot.lane.b32.xlu1 %v2083_v55, %s1880_s10  ;;  %1432 = vrot.lane.b32.xlu0 %v2085_v56, %s1881_s11 }
 0x122   :  { %1494 = vrot.lane.b32.xlu0 %v2083_v55, %s1882_s12  ;;  %1172 = vrot.lane.b32.xlu1 %v2093_v58, %s1876_s2 }
 0x126   :  { %1498 = vrot.lane.b32.xlu0 %v2085_v56, %s1882_s12  ;;  %1176 = vrot.lane.b32.xlu1 %v2087_v57, %s1876_s2 }
 0x12a   :  { %1560 = vrot.lane.b32.xlu0 %v2083_v55, %s1883_s13  ;;  %1304 = vrot.lane.b32.xlu1 %v2093_v58, %s1879_s9 }
 0x12e   :  { %1564 = vrot.lane.b32.xlu0 %v2085_v56, %s1883_s13  ;;  %1308 = vrot.lane.b32.xlu1 %v2087_v57, %s1879_s9 }
 0x132   :  { %1105 = vrot.lane.b32.xlu0 %v2093_v58, %s1877_s7  ;;  %1099 = vrot.lane.b32.xlu1 %v2095_v60, %s1877_s7 }
 0x136   :  { %1109 = vrot.lane.b32.xlu0 %v2087_v57, %s1877_s7  ;;  %1103 = vrot.lane.b32.xlu1 %v2097_v61, %s1877_s7 }
 0x13a   :  { %1238 = vrot.lane.b32.xlu0 %v2093_v58, %s1878_s8  ;;  %1232 = vrot.lane.b32.xlu1 %v2095_v60, %s1878_s8 }
 0x13e   :  { %1242 = vrot.lane.b32.xlu0 %v2087_v57, %s1878_s8  ;;  %1236 = vrot.lane.b32.xlu1 %v2097_v61, %s1878_s8 }
 0x142   :  { %1370 = vrot.lane.b32.xlu0 %v2093_v58, %s1880_s10  ;;  %1364 = vrot.lane.b32.xlu1 %v2095_v60, %s1880_s10 }
 0x146   :  { %1374 = vrot.lane.b32.xlu0 %v2087_v57, %s1880_s10  ;;  %1368 = vrot.lane.b32.xlu1 %v2097_v61, %s1880_s10 }
 0x14a   :  { %1436 = vrot.lane.b32.xlu0 %v2093_v58, %s1881_s11  ;;  %1430 = vrot.lane.b32.xlu1 %v2095_v60, %s1881_s11 }
 0x14e   :  { %1440 = vrot.lane.b32.xlu0 %v2087_v57, %s1881_s11  ;;  %1434 = vrot.lane.b32.xlu1 %v2097_v61, %s1881_s11 }
 0x152   :  { %1502 = vrot.lane.b32.xlu0 %v2093_v58, %s1882_s12  ;;  %1496 = vrot.lane.b32.xlu1 %v2095_v60, %s1882_s12 }
 0x156   :  { %1506 = vrot.lane.b32.xlu0 %v2087_v57, %s1882_s12  ;;  %1500 = vrot.lane.b32.xlu1 %v2097_v61, %s1882_s12 }
 0x15a   :  { %1166 = vrot.lane.b32.xlu0 %v2095_v60, %s1876_s2  ;;  %1562 = vrot.lane.b32.xlu1 %v2095_v60, %s1883_s13 }
 0x15e   :  { %1170 = vrot.lane.b32.xlu0 %v2097_v61, %s1876_s2  ;;  %1566 = vrot.lane.b32.xlu1 %v2097_v61, %s1883_s13 }
 0x162   :  { %1298 = vrot.lane.b32.xlu0 %v2095_v60, %s1879_s9  ;;  %1107 = vrot.lane.b32.xlu1 %v2105_v63, %s1877_s7 }
 0x166   :  { %1302 = vrot.lane.b32.xlu0 %v2097_v61, %s1879_s9  ;;  %1111 = vrot.lane.b32.xlu1 %v2099_v62, %s1877_s7 }
 0x16a   :  { %1174 = vrot.lane.b32.xlu0 %v2105_v63, %s1876_s2  ;;  %1240 = vrot.lane.b32.xlu1 %v2105_v63, %s1878_s8 }
 0x16e   :  { %1178 = vrot.lane.b32.xlu0 %v2099_v62, %s1876_s2  ;;  %1244 = vrot.lane.b32.xlu1 %v2099_v62, %s1878_s8 }
 0x172   :  { %1306 = vrot.lane.b32.xlu0 %v2105_v63, %s1879_s9  ;;  %1372 = vrot.lane.b32.xlu1 %v2105_v63, %s1880_s10 }
 0x176   :  { %1310 = vrot.lane.b32.xlu0 %v2099_v62, %s1879_s9  ;;  %1376 = vrot.lane.b32.xlu1 %v2099_v62, %s1880_s10 }
 0x17a   :  { %1568 = vrot.lane.b32.xlu0 %v2093_v58, %s1883_s13  ;;  %1438 = vrot.lane.b32.xlu1 %v2105_v63, %s1881_s11 }
 0x17c   :  { %v1165_v20 = vpop.permute.xlu1 %1164  ;;  %v2259_v21 = vpop.permute.xlu0 %1097 }
 0x17e   :  { %1572 = vrot.lane.b32.xlu0 %v2087_v57, %s1883_s13  ;;  %1442 = vrot.lane.b32.xlu1 %v2099_v62, %s1881_s11 }
 0x180   :  { %v1169_v22 = vpop.permute.xlu1 %1168  ;;  %v2265_v23 = vpop.permute.xlu0 %1101 }
 0x182   :  { %1504 = vrot.lane.b32.xlu1 %v2105_v63, %s1882_s12 }
 0x184   :  { %v2269_v24 = vpop.permute.xlu1 %1230  ;;  %v2271_v25 = vpop.permute.xlu0 %1234 }
 0x186   :  { %1508 = vrot.lane.b32.xlu1 %v2099_v62, %s1882_s12 }
 0x188   :  { %v1297_v27 = vpop.permute.xlu1 %1296  ;;  %v2275_v28 = vpop.permute.xlu0 %1366 }
 0x18a   :  { %1570 = vrot.lane.b32.xlu1 %v2105_v63, %s1883_s13  ;;  %v1343_v63 = vmul.f32 %v2320_v50, %v2205_v9 }
 0x18c   :  { %v1301_v30 = vpop.permute.xlu1 %1300  ;;  %v2279_v31 = vpop.permute.xlu0 %1428 }
 0x18e   :  { %1574 = vrot.lane.b32.xlu1 %v2099_v62, %s1883_s13  ;;  %v1342_v62 = vmul.f32 %v2317_v49, %v2205_v9  ;;  %v2346_v9 = vrot.slane %v1124_v26, %v2285_v34 }
 0x190   :  { %v2292_v36 = vpop.permute.xlu1 %1362  ;;  %v2294_v37 = vpop.permute.xlu0 %1432 }
 0x194   :  { %v2307_v42 = vpop.permute.xlu0 %1494  ;;  %v1173_v43 = vpop.permute.xlu1 %1172 }
 0x195   :  { %v1181_v45 = vsel %vm1180_vm2, %v1165_v20, %v1173_v43  ;;  %v1185_v46 = vsel %vm1180_vm2, %v1173_v43, %v1165_v20 }
 0x196   :  { %v1214_v47 = vmul.f32 %v1210_v40, %v1185_v46  ;;  %v1215_v48 = vmul.f32 %v1211_v41, %v1181_v45 }
 0x198   :  { %v2322_v51 = vpop.permute.xlu0 %1498  ;;  %v1177_v52 = vpop.permute.xlu1 %1176 }
 0x199   :  { %v1183_v53 = vsel %vm1180_vm2, %v1169_v22, %v1177_v52  ;;  %v1187_v59 = vsel %vm1180_vm2, %v1177_v52, %v1169_v22 }
 0x19a   :  { %v1218_v60 = vmul.f32 %v1210_v40, %v1187_v59  ;;  %v1219_v61 = vmul.f32 %v1211_v41, %v1183_v53  ;;  %v2343_v41 = vrot.slane %v1124_v26, %v2283_v33  ;;  %v1754_v53 = vld [vmem:[%s2707_s3 + $0x2] ss:$8 sm:$0x3] }
 0x19c   :  { %v2333_v4 = vpop.permute.xlu0 %1560  ;;  %v1305_v20 = vpop.permute.xlu1 %1304  ;;  %v1144_v59 = vmul.f32 %v2343_v41, %v2239_v16 }
 0x19d   :  { %2717 = vst [vmem:[#allocation7_spill] sm:$0xff] %v2333_v4  ;;  %v1313_v22 = vsel %vm1312_vm3, %v1297_v27, %v1305_v20  ;;  %v1317_v29 = vsel %vm1312_vm3, %v1305_v20, %v1297_v27  ;;  %v1145_v20 = vmul.f32 %v2346_v9, %v2239_v16  ;;  %v2379_v16 = vrot.slane %v1754_v53, %v2283_v33 }
 0x19e   :  { %v1346_v35 = vmul.f32 %v1342_v62, %v1317_v29  ;;  %v1347_v40 = vmul.f32 %v1343_v63, %v1313_v22  ;;  %v1090_v29 = vmul.f32 %v2081_v54, %v2093_v58 }
 0x1a0   :  { %v2348_v43 = vpop.permute.xlu0 %1564  ;;  %v1309_v44 = vpop.permute.xlu1 %1308 }
 0x1a1   :  { %2718 = vst [vmem:[#allocation8_spill] sm:$0xff] %v2348_v43  ;;  %v1315_v45 = vsel %vm1312_vm3, %v1301_v30, %v1309_v44  ;;  %v1319_v46 = vsel %vm1312_vm3, %v1309_v44, %v1301_v30  ;;  %v1093_v43 = vmul.f32 %v2081_v54, %v2085_v56 }
 0x1a2   :  { %v2354_v52 = vmul.f32 %v1342_v62, %v1319_v46  ;;  %v2356_v27 = vmul.f32 %v1343_v63, %v1315_v45  ;;  %v1089_v63 = vmul.f32 %v2081_v54, %v2083_v55  ;;  %v2382_v46 = vrot.slane %v1754_v53, %v2285_v34 }
 0x1a3   :  { %v1094_v55 = vmul.f32 %v2081_v54, %v2087_v57 }
 0x1a4   :  { %v1106_v26 = vpop.permute.xlu0 %1105  ;;  %v2366_v22 = vpop.permute.xlu1 %1099  ;;  %v1277_v54 = vmul.f32 %v2382_v46, %v2193_v7 }
 0x1a5   :  { %v1116_v30 = vsel %vm1115_vm4, %v2259_v21, %v1106_v26  ;;  %v1120_v62 = vsel %vm1115_vm4, %v1106_v26, %v2259_v21 }
 0x1a6   :  { %v1148_v44 = vmul.f32 %v1144_v59, %v1120_v62  ;;  %v1149_v45 = vmul.f32 %v1145_v20, %v1116_v30 }
 0x1a8   :  { %v1156_v14 = vadd.f32 %v1148_v44, %v1089_v63  ;;  %v1157_v17 = vadd.f32 %v1149_v45, %v1090_v29  ;;  %v1110_v21 = vpop.permute.xlu0 %1109  ;;  %v2386_v26 = vpop.permute.xlu1 %1103  ;;  %v1276_v29 = vmul.f32 %v2379_v16, %v2193_v7 }
 0x1a9   :  { %v1118_v58 = vsel %vm1115_vm4, %v2265_v23, %v1110_v21  ;;  %v1122_v53 = vsel %vm1115_vm4, %v1110_v21, %v2265_v23  ;;  %v1756_v23 = vld [vmem:[%s2707_s3 + $0x5] ss:$8 sm:$0x3] }
 0x1aa   :  { %v1152_v30 = vmul.f32 %v1144_v59, %v1122_v53  ;;  %v1153_v62 = vmul.f32 %v1145_v20, %v1118_v58  ;;  %v1222_v63 = vadd.f32 %v1214_v47, %v1156_v14  ;;  %v1223_v56 = vadd.f32 %v1215_v48, %v1157_v17 }
 0x1ab   :  { %v2413_v59 = vrot.slane %v1756_v23, %v2283_v33  ;;  %v2416_v20 = vrot.slane %v1756_v23, %v2285_v34 }
 0x1ac   :  { %v1160_v57 = vadd.f32 %v1152_v30, %v1093_v43  ;;  %v1161_v44 = vadd.f32 %v1153_v62, %v1094_v55  ;;  %v1239_v45 = vpop.permute.xlu0 %1238  ;;  %v2401_v4 = vpop.permute.xlu1 %1232 }
 0x1ad   :  { %v1247_v14 = vsel %vm1246_vm5, %v2269_v24, %v1239_v45  ;;  %v1251_v17 = vsel %vm1246_vm5, %v1239_v45, %v2269_v24 }
 0x1ae   :  { %v1280_v47 = vmul.f32 %v1276_v29, %v1251_v17  ;;  %v1281_v48 = vmul.f32 %v1277_v54, %v1247_v14  ;;  %v1226_v7 = vadd.f32 %v1218_v60, %v1160_v57  ;;  %v1227_v43 = vadd.f32 %v1219_v61, %v1161_v44 }
 0x1b0   :  { %v1288_v21 = vadd.f32 %v1280_v47, %v1222_v63  ;;  %v1289_v55 = vadd.f32 %v1281_v48, %v1223_v56  ;;  %v1243_v58 = vpop.permute.xlu0 %1242  ;;  %v2418_v53 = vpop.permute.xlu1 %1236  ;;  %v1408_v63 = vmul.f32 %v2413_v59, %v2199_v8  ;;  %v1409_v56 = vmul.f32 %v2416_v20, %v2199_v8 }
 0x1b1   :  { %v1249_v30 = vsel %vm1246_vm5, %v2271_v25, %v1243_v58  ;;  %v1253_v24 = vsel %vm1246_vm5, %v1243_v58, %v2271_v25  ;;  %v1757_v25 = vld [vmem:[%s2707_s3 + $0x6] ss:$8 sm:$0x3] }
 0x1b2   :  { %v1284_v60 = vmul.f32 %v1276_v29, %v1253_v24  ;;  %v1285_v61 = vmul.f32 %v1277_v54, %v1249_v30  ;;  %v1354_v62 = vadd.f32 %v1346_v35, %v1288_v21  ;;  %v1355_v57 = vadd.f32 %v1347_v40, %v1289_v55 }
 0x1b3   :  { %v2445_v47 = vrot.slane %v1757_v25, %v2283_v33  ;;  %v2448_v48 = vrot.slane %v1757_v25, %v2285_v34 }
 0x1b4   :  { %v1292_v44 = vadd.f32 %v1284_v60, %v1226_v7  ;;  %v1293_v45 = vadd.f32 %v1285_v61, %v1227_v43  ;;  %v1371_v23 = vpop.permute.xlu0 %1370  ;;  %v2431_v14 = vpop.permute.xlu1 %1364 }
 0x1b5   :  { %v1379_v35 = vsel %vm1378_vm6, %v2292_v36, %v1371_v23  ;;  %v1383_v40 = vsel %vm1378_vm6, %v1371_v23, %v2292_v36  ;;  %v1474_v30 = vmul.f32 %v2445_v47, %v2233_v15  ;;  %v1475_v24 = vmul.f32 %v2448_v48, %v2233_v15 }
 0x1b6   :  { %v1412_v29 = vmul.f32 %v1408_v63, %v1379_v35  ;;  %v1413_v54 = vmul.f32 %v1409_v56, %v1383_v40  ;;  %v1358_v8 = vadd.f32 %v2354_v52, %v1292_v44  ;;  %v1359_v17 = vadd.f32 %v2356_v27, %v1293_v45  ;;  %v1758_v44 = vld [vmem:[%s2707_s3 + $0x7] ss:$8 sm:$0x3] }
 0x1b7   :  { %v2475_v15 = vrot.slane %v1758_v44, %v2283_v33  ;;  %v2478_v23 = vrot.slane %v1758_v44, %v2285_v34 }
 0x1b8   :  { %v1420_v7 = vadd.f32 %v1412_v29, %v1354_v62  ;;  %v1421_v43 = vadd.f32 %v1413_v54, %v1355_v57  ;;  %v1375_v21 = vpop.permute.xlu0 %1374  ;;  %v2450_v55 = vpop.permute.xlu1 %1368 }
 0x1b9   :  { %v1381_v36 = vsel %vm1378_vm6, %v2275_v28, %v1375_v21  ;;  %v1385_v52 = vsel %vm1378_vm6, %v1375_v21, %v2275_v28  ;;  %v1540_v21 = vmul.f32 %v2475_v15, %v2219_v12 }
 0x1ba   :  { %v1416_v27 = vmul.f32 %v1408_v63, %v1381_v36  ;;  %v1417_v58 = vmul.f32 %v1409_v56, %v1385_v52 }
 0x1bc   :  { %v1424_v60 = vadd.f32 %v1416_v27, %v1358_v8  ;;  %v1425_v61 = vadd.f32 %v1417_v58, %v1359_v17  ;;  %v1437_v62 = vpop.permute.xlu0 %1436  ;;  %v2463_v57 = vpop.permute.xlu1 %1430 }
 0x1bd   :  { %v1445_v28 = vsel %vm1444_vm7, %v2279_v31, %v1437_v62  ;;  %v1449_v63 = vsel %vm1444_vm7, %v1437_v62, %v2279_v31 }
 0x1be   :  { %v1478_v56 = vmul.f32 %v1474_v30, %v1445_v28  ;;  %v1479_v45 = vmul.f32 %v1475_v24, %v1449_v63 }
 0x1c0   :  { %v1486_v25 = vadd.f32 %v1478_v56, %v1420_v7  ;;  %v1487_v35 = vadd.f32 %v1479_v45, %v1421_v43  ;;  %v1441_v40 = vpop.permute.xlu0 %1440  ;;  %v2480_v29 = vpop.permute.xlu1 %1434  ;;  %v1541_v7 = vmul.f32 %v2478_v23, %v2219_v12 }
 0x1c1   :  { %v1447_v54 = vsel %vm1444_vm7, %v2294_v37, %v1441_v40  ;;  %v1451_v31 = vsel %vm1444_vm7, %v1441_v40, %v2294_v37 }
 0x1c2   :  { %v1482_v8 = vmul.f32 %v1474_v30, %v1447_v54  ;;  %v1483_v17 = vmul.f32 %v1475_v24, %v1451_v31  ;;  %v1146_v31 = vmul.f32 %v2343_v41, %v2251_v18 }
 0x1c4   :  { %v1490_v43 = vadd.f32 %v1482_v8, %v1424_v60  ;;  %v1491_v36 = vadd.f32 %v1483_v17, %v1425_v61  ;;  %v1503_v52 = vpop.permute.xlu0 %1502  ;;  %v2493_v27 = vpop.permute.xlu1 %1496  ;;  %v1147_v8 = vmul.f32 %v2346_v9, %v2251_v18 }
 0x1c5   :  { %v1511_v58 = vsel %vm1510_vm8, %v2307_v42, %v1503_v52  ;;  %v1515_v37 = vsel %vm1510_vm8, %v1503_v52, %v2307_v42 }
 0x1c6   :  { %v1544_v30 = vmul.f32 %v1540_v21, %v1511_v58  ;;  %v1545_v24 = vmul.f32 %v1541_v7, %v1515_v37 }
 0x1c8   :  { %v2501_v62 = vadd.f32 %v1544_v30, %v1486_v25  ;;  %v2503_v44 = vadd.f32 %v1545_v24, %v1487_v35  ;;  %v1507_v12 = vpop.permute.xlu0 %1506  ;;  %v2505_v60 = vpop.permute.xlu1 %1500 }
 0x1c9   :  { %v1513_v61 = vsel %vm1510_vm8, %v2322_v51, %v1507_v12  ;;  %v1517_v28 = vsel %vm1510_vm8, %v1507_v12, %v2322_v51  ;;  %v1279_v12 = vmul.f32 %v2382_v46, %v2191_v6 }
 0x1ca   :  { %v1548_v63 = vmul.f32 %v1540_v21, %v1513_v61  ;;  %v1549_v56 = vmul.f32 %v1541_v7, %v1517_v28 }
 0x1cc   :  { %v2513_v42 = vadd.f32 %v1548_v63, %v1490_v43  ;;  %v2515_v45 = vadd.f32 %v1549_v56, %v1491_v36  ;;  %v1167_v25 = vpop.permute.xlu0 %1166  ;;  %v2517_v35 = vpop.permute.xlu1 %1562 }
 0x1d0   :  { %v1171_v40 = vpop.permute.xlu0 %1170  ;;  %v2519_v54 = vpop.permute.xlu1 %1566 }
 0x1d4   :  { %v1299_v17 = vpop.permute.xlu0 %1298  ;;  %v1108_v51 = vpop.permute.xlu1 %1107 }
 0x1d5   :  { %v1117_v21 = vsel %vm1115_vm4, %v2366_v22, %v1108_v51  ;;  %v1121_v7 = vsel %vm1115_vm4, %v1108_v51, %v2366_v22  ;;  %v1212_v22 = vmul.f32 %v2297_v38, %v2185_v5 }
 0x1d6   :  { %v1150_v43 = vmul.f32 %v1146_v31, %v1121_v7  ;;  %v1151_v36 = vmul.f32 %v1147_v8, %v1117_v21 }
 0x1d8   :  { %v1158_v52 = vadd.f32 %v1150_v43, %v2108_v0  ;;  %v1159_v58 = vadd.f32 %v1151_v36, %v2114_v2  ;;  %v2533_v41 = vpop.permute.xlu0 %1302  ;;  %v1112_v37 = vpop.permute.xlu1 %1111  ;;  %v1213_v0 = vmul.f32 %v2300_v39, %v2185_v5  ;;  %v1278_v2 = vmul.f32 %v2379_v16, %v2191_v6 }
 0x1d9   :  { %v1119_v18 = vsel %vm1115_vm4, %v2386_v26, %v1112_v37  ;;  %v1123_v9 = vsel %vm1115_vm4, %v1112_v37, %v2386_v26  ;;  %v1344_v37 = vmul.f32 %v2317_v49, %v2213_v11 }
 0x1da   :  { %v1154_v30 = vmul.f32 %v1146_v31, %v1123_v9  ;;  %v1155_v24 = vmul.f32 %v1147_v8, %v1119_v18  ;;  %v1345_v18 = vmul.f32 %v2320_v50, %v2213_v11 }
 0x1dc   :  { %v1162_v61 = vadd.f32 %v1154_v30, %v2111_v1  ;;  %v1163_v28 = vadd.f32 %v1155_v24, %v2117_v3  ;;  %v1175_v63 = vpop.permute.xlu0 %1174  ;;  %v1241_v26 = vpop.permute.xlu1 %1240  ;;  %v1410_v30 = vmul.f32 %v2413_v59, %v2221_v13  ;;  %v1411_v24 = vmul.f32 %v2416_v20, %v2221_v13 }
 0x1dd   :  { %v1182_v56 = vsel %vm1180_vm2, %v1167_v25, %v1175_v63  ;;  %v1186_v38 = vsel %vm1180_vm2, %v1175_v63, %v1167_v25  ;;  %v1248_v5 = vsel %vm1246_vm5, %v2401_v4, %v1241_v26  ;;  %v1252_v6 = vsel %vm1246_vm5, %v1241_v26, %v2401_v4 }
 0x1de   :  { %v1216_v39 = vmul.f32 %v1212_v22, %v1186_v38  ;;  %v1217_v1 = vmul.f32 %v1213_v0, %v1182_v56  ;;  %v1282_v16 = vmul.f32 %v1278_v2, %v1252_v6  ;;  %v1283_v3 = vmul.f32 %v1279_v12, %v1248_v5 }
 0x1e0   :  { %v1224_v46 = vadd.f32 %v1216_v39, %v1158_v52  ;;  %v1225_v31 = vadd.f32 %v1217_v1, %v1159_v58  ;;  %v1179_v8 = vpop.permute.xlu0 %1178  ;;  %v1245_v51 = vpop.permute.xlu1 %1244 }
 0x1e1   :  { %v1184_v21 = vsel %vm1180_vm2, %v1171_v40, %v1179_v8  ;;  %v1188_v25 = vsel %vm1180_vm2, %v1179_v8, %v1171_v40  ;;  %v1250_v7 = vsel %vm1246_vm5, %v2418_v53, %v1245_v51  ;;  %v1254_v4 = vsel %vm1246_vm5, %v1245_v51, %v2418_v53  ;;  %v1759_v53 = vld [vmem:[%s2707_s3 + $0x10] ss:$8 sm:$0x3] }
 0x1e2   :  { %v1290_v43 = vadd.f32 %v1282_v16, %v1224_v46  ;;  %v1291_v36 = vadd.f32 %v1283_v3, %v1225_v31  ;;  %v1220_v52 = vmul.f32 %v1212_v22, %v1188_v25  ;;  %v1221_v58 = vmul.f32 %v1213_v0, %v1184_v21 }
 0x1e3   :  { %v1286_v9 = vmul.f32 %v1278_v2, %v1254_v4  ;;  %v1287_v40 = vmul.f32 %v1279_v12, %v1250_v7  ;;  %v2596_v38 = vrot.slane %v1759_v53, %v2285_v34  ;;  %v1476_v8 = vmul.f32 %v2445_v47, %v2211_v10 }
 0x1e4   :  { %v1228_v22 = vadd.f32 %v1220_v52, %v1162_v61  ;;  %v1229_v0 = vadd.f32 %v1221_v58, %v1163_v28  ;;  %v1307_v63 = vpop.permute.xlu0 %1306  ;;  %v1373_v26 = vpop.permute.xlu1 %1372  ;;  %v2593_v61 = vrot.slane %v1759_v53, %v2283_v33  ;;  %v1477_v51 = vmul.f32 %v2448_v48, %v2211_v10  ;;  %v2719_v52 = vld [vmem:[#allocation7_spill] sm:$0xff] }
 0x1e5   :  { %v1314_v49 = vsel %vm1312_vm3, %v1299_v17, %v1307_v63  ;;  %v1318_v11 = vsel %vm1312_vm3, %v1307_v63, %v1299_v17  ;;  %v1380_v50 = vsel %vm1378_vm6, %v2431_v14, %v1373_v26  ;;  %v1384_v13 = vsel %vm1378_vm6, %v1373_v26, %v2431_v14 }
 0x1e6   :  { %v1294_v59 = vadd.f32 %v1286_v9, %v1228_v22  ;;  %v1295_v20 = vadd.f32 %v1287_v40, %v1229_v0  ;;  %v1348_v2 = vmul.f32 %v1344_v37, %v1318_v11  ;;  %v1349_v12 = vmul.f32 %v1345_v18, %v1314_v49  ;;  %v2720_v49 = vld [vmem:[#allocation8_spill] sm:$0xff] }
 0x1e7   :  { %v1414_v28 = vmul.f32 %v1410_v30, %v1380_v50  ;;  %v1415_v56 = vmul.f32 %v1411_v24, %v1384_v13  ;;  %v1606_v25 = vmul.f32 %v2593_v61, %v2253_v19  ;;  %v1607_v7 = vmul.f32 %v2596_v38, %v2253_v19 }
 0x1e8   :  { %v1356_v17 = vadd.f32 %v1348_v2, %v1290_v43  ;;  %v1357_v5 = vadd.f32 %v1349_v12, %v1291_v36  ;;  %v1311_v6 = vpop.permute.xlu0 %1310  ;;  %v1377_v39 = vpop.permute.xlu1 %1376  ;;  %v2721_v12 = vld [vmem:[#allocation6_spill] sm:$0xff] }
 0x1e9   :  { %v1316_v14 = vsel %vm1312_vm3, %v2533_v41, %v1311_v6  ;;  %v1320_v33 = vsel %vm1312_vm3, %v1311_v6, %v2533_v41  ;;  %v1382_v1 = vsel %vm1378_vm6, %v2450_v55, %v1377_v39  ;;  %v1386_v34 = vsel %vm1378_vm6, %v1377_v39, %v2450_v55 }
 0x1ea   :  { %v1422_v16 = vadd.f32 %v1414_v28, %v1356_v17  ;;  %v1423_v3 = vadd.f32 %v1415_v56, %v1357_v5  ;;  %v1352_v46 = vmul.f32 %v1344_v37, %v1320_v33  ;;  %v1353_v31 = vmul.f32 %v1345_v18, %v1316_v14 }
 0x1eb   :  { %v1418_v21 = vmul.f32 %v1410_v30, %v1382_v1  ;;  %v1419_v41 = vmul.f32 %v1411_v24, %v1386_v34  ;;  %v1542_v28 = vmul.f32 %v2475_v15, %v2721_v12  ;;  %v1543_v56 = vmul.f32 %v2478_v23, %v2721_v12 }
 0x1ec   :  { %v1360_v4 = vadd.f32 %v1352_v46, %v1294_v59  ;;  %v1361_v55 = vadd.f32 %v1353_v31, %v1295_v20  ;;  %v1569_v43 = vpop.permute.xlu0 %1568  ;;  %v1439_v36 = vpop.permute.xlu1 %1438 }
 0x1ed   :  { %v1577_v58 = vsel %vm1576_vm9, %v2719_v52, %v1569_v43  ;;  %v1581_v10 = vsel %vm1576_vm9, %v1569_v43, %v2719_v52  ;;  %v1446_v47 = vsel %vm1444_vm7, %v2463_v57, %v1439_v36  ;;  %v1450_v19 = vsel %vm1444_vm7, %v1439_v36, %v2463_v57 }
 0x1ee   :  { %v1426_v48 = vadd.f32 %v1418_v21, %v1360_v4  ;;  %v1427_v37 = vadd.f32 %v1419_v41, %v1361_v55  ;;  %v1610_v18 = vmul.f32 %v1606_v25, %v1577_v58  ;;  %v1611_v9 = vmul.f32 %v1607_v7, %v1581_v10 }
 0x1ef   :  { %v1480_v40 = vmul.f32 %v1476_v8, %v1446_v47  ;;  %v1481_v30 = vmul.f32 %v1477_v51, %v1450_v19 }
 0x1f0   :  { %v1573_v24 = vpop.permute.xlu0 %1572  ;;  %v1443_v53 = vpop.permute.xlu1 %1442  ;;  %v1618_v22 = vadd.f32 %v1610_v18, %v2501_v62  ;;  %v1619_v0 = vadd.f32 %v1611_v9, %v2503_v44 }
 0x1f1   :  { %v1488_v63 = vadd.f32 %v1480_v40, %v1422_v16  ;;  %v1489_v26 = vadd.f32 %v1481_v30, %v1423_v3  ;;  %v1579_v11 = vsel %vm1576_vm9, %v2720_v49, %v1573_v24  ;;  %v1583_v57 = vsel %vm1576_vm9, %v1573_v24, %v2720_v49 }
 0x1f2   :  { %v1614_v50 = vmul.f32 %v1606_v25, %v1579_v11  ;;  %v1615_v13 = vmul.f32 %v1607_v7, %v1583_v57  ;;  %v1448_v59 = vsel %vm1444_vm7, %v2480_v29, %v1443_v53  ;;  %v1452_v62 = vsel %vm1444_vm7, %v1443_v53, %v2480_v29 }
 0x1f3   :  { %v1484_v44 = vmul.f32 %v1476_v8, %v1448_v59  ;;  %v1485_v20 = vmul.f32 %v1477_v51, %v1452_v62  ;;  %v1626_v2 = vadd.f32 %v1619_v0, %v1618_v22  ;;  %v2722_v8 = vld [vmem:[#allocation5_spill] sm:$0xff] }
 0x1f4   :  { %v1505_v17 = vpop.permute.xlu1 %1504  ;;  %v1622_v5 = vadd.f32 %v1614_v50, %v2513_v42  ;;  %v1623_v6 = vadd.f32 %v1615_v13, %v2515_v45  ;;  %v1609_v51 = vmul.f32 %v2596_v38, %v2722_v8 }
 0x1f5   :  { %v1492_v39 = vadd.f32 %v1484_v44, %v1426_v48  ;;  %v1493_v14 = vadd.f32 %v1485_v20, %v1427_v37  ;;  %1627 = vadd.xlane.f32.xlu0 %v1626_v2  ;;  %v1512_v29 = vsel %vm1510_vm8, %v2493_v27, %v1505_v17  ;;  %v1516_v33 = vsel %vm1510_vm8, %v1505_v17, %v2493_v27 }
 0x1f6   :  { %v1546_v15 = vmul.f32 %v1542_v28, %v1512_v29  ;;  %v1547_v1 = vmul.f32 %v1543_v56, %v1516_v33  ;;  %v1632_v34 = vadd.f32 %v1623_v6, %v1622_v5  ;;  %v1608_v27 = vmul.f32 %v2593_v61, %v2722_v8  ;;  %v1675_v8 = vld [vmem:[%s2708_s4 + $0x8] sm:$0xff] }
 0x1f8   :  { %v1554_v23 = vadd.f32 %v1546_v15, %v1488_v63  ;;  %v1555_v16 = vadd.f32 %v1547_v1, %v1489_v26  ;;  %v1509_v3 = vpop.permute.xlu1 %1508 }
 0x1f9   :  { %1633 = vadd.xlane.f32.xlu0 %v1632_v34  ;;  %v1514_v42 = vsel %vm1510_vm8, %v2505_v60, %v1509_v3  ;;  %v1518_v45 = vsel %vm1510_vm8, %v1509_v3, %v2505_v60  ;;  %v1674_v34 = vld [vmem:[%s2708_s4] sm:$0xff]  ;;  %s1884_s4 = smov [#allocation2]  }
 0x1fa   :  { %v1550_v46 = vmul.f32 %v1542_v28, %v1514_v42  ;;  %v1551_v31 = vmul.f32 %v1543_v56, %v1518_v45 }
 0x1fc   :  { %v1558_v21 = vadd.f32 %v1550_v46, %v1492_v39  ;;  %v1559_v41 = vadd.f32 %v1551_v31, %v1493_v14  ;;  %v1571_v25 = vpop.permute.xlu1 %1570  ;;  %v1682_v46 = vld [vmem:[%s2709_s5] sm:$0xff]  ;;  %v1683_v31 = vld [vmem:[%s2709_s5 + $0x8] sm:$0xff]  ;;  %s1741_s5 = sshll.u32 %s1884_s4, 4  ;;  %s1742_s5 = int_to_ptr.vmem [resolvable:$true] %s1741_s5 }
 0x1fd   :  { %v1578_v7 = vsel %vm1576_vm9, %v2517_v35, %v1571_v25  ;;  %v1582_v4 = vsel %vm1576_vm9, %v1571_v25, %v2517_v35  ;;  %s1842_s11 = scalar_lea.vmem %s1742_s5, 1024  ;;  %p1847_p1 = scmp.lt.s32.totalorder %s1742_s5, %s1742_s5 }
 0x1fe   :  { %v1612_v60 = vmul.f32 %v1608_v27, %v1578_v7  ;;  %v1613_v55 = vmul.f32 %v1609_v51, %v1582_v4  ;;  %p1843_p0 = scmp.ne.s32.totalorder %s1742_s5, %s1842_s11  ;;  %p1848_p2 = scmp.lt.s32.totalorder %s1842_s11, %s1842_s11 }
 0x200   :  { %v1575_v43 = vpop.permute.xlu1 %1574  ;;  %v1620_v36 = vadd.f32 %v1612_v60, %v1554_v23  ;;  %v1621_v52 = vadd.f32 %v1613_v55, %v1555_v16  ;;  %p1849_p3 = por %p1848_p2, %p1847_p1 }
 0x201   :  { %v1580_v61 = vsel %vm1576_vm9, %v2519_v54, %v1575_v43  ;;  %v1584_v38 = vsel %vm1576_vm9, %v1575_v43, %v2519_v54 }
 0x202   :  { %v1616_v58 = vmul.f32 %v1608_v27, %v1580_v61  ;;  %v1617_v10 = vmul.f32 %v1609_v51, %v1584_v38  ;;  %v1629_v47 = vadd.f32 %v1621_v52, %v1620_v36  ;;  %p1850_p4 = pnand %p1849_p3, %p1843_p0 }
 0x204   :  { %1630 = vadd.xlane.f32.xlu1 %v1629_v47  ;;  %v1624_v19 = vadd.f32 %v1616_v58, %v1558_v21  ;;  %v1625_v48 = vadd.f32 %v1617_v10, %v1559_v41 }
 0x206   :  { %v1635_v35 = vadd.f32 %v1625_v48, %v1624_v19 }
 0x208   :  { %1636 = vadd.xlane.f32.xlu0 %v1635_v35 }
 0x282   :  { %v1628_v37 = vpop.xlane.xlu0 %1627 }
 0x286   :  { %v1634_v18 = vpop.xlane.xlu0 %1633 }
 0x287   :  { %v1638_v9 = vadd.f32 %v1634_v18, %v1628_v37 }
 0x289   :  { %v1640_v40 = vmul.f32 0.001953125, %v1638_v9 }
 0x28b   :  { %v1642_v30 = vsub.f32 %v1618_v22, %v1640_v40  ;;  %v1643_v24 = vsub.f32 %v1619_v0, %v1640_v40  ;;  %v1646_v53 = vsub.f32 %v1622_v5, %v1640_v40  ;;  %v1647_v63 = vsub.f32 %v1623_v6, %v1640_v40 }
 0x28d   :  { %v1650_v26 = vmul.f32 %v1642_v30, %v1642_v30  ;;  %v1651_v49 = vmul.f32 %v1643_v24, %v1643_v24  ;;  %v1654_v54 = vmul.f32 %v1646_v53, %v1646_v53  ;;  %v1655_v11 = vmul.f32 %v1647_v63, %v1647_v63 }
 0x28f   :  { %v1658_v32 = vadd.f32 %v1651_v49, %v1650_v26  ;;  %v1664_v57 = vadd.f32 %v1655_v11, %v1654_v54 }
 0x291   :  { %1659 = vadd.xlane.f32.xlu1 %v1658_v32  ;;  %v1631_v50 = vpop.xlane.xlu1 %1630 }
 0x295   :  { %1665 = vadd.xlane.f32.xlu1 %v1664_v57  ;;  %v1637_v13 = vpop.xlane.xlu0 %1636 }
 0x296   :  { %v1639_v59 = vadd.f32 %v1637_v13, %v1631_v50 }
 0x298   :  { %v1641_v62 = vmul.f32 0.001953125, %v1639_v59 }
 0x29a   :  { %v1644_v44 = vsub.f32 %v1620_v36, %v1641_v62  ;;  %v1645_v20 = vsub.f32 %v1621_v52, %v1641_v62  ;;  %v1648_v2 = vsub.f32 %v1624_v19, %v1641_v62  ;;  %v1649_v12 = vsub.f32 %v1625_v48, %v1641_v62 }
 0x29c   :  { %v1652_v22 = vmul.f32 %v1644_v44, %v1644_v44  ;;  %v1653_v0 = vmul.f32 %v1645_v20, %v1645_v20  ;;  %v1656_v56 = vmul.f32 %v1648_v2, %v1648_v2  ;;  %v1657_v17 = vmul.f32 %v1649_v12, %v1649_v12 }
 0x29e   :  { %v1661_v28 = vadd.f32 %v1653_v0, %v1652_v22  ;;  %v1667_v5 = vadd.f32 %v1657_v17, %v1656_v56 }
 0x2a0   :  { %1662 = vadd.xlane.f32.xlu0 %v1661_v28 }
 0x2a4   :  { %1668 = vadd.xlane.f32.xlu0 %v1667_v5 }
 0x31e   :  { %v1660_v6 = vpop.xlane.xlu1 %1659 }
 0x322   :  { %v1666_v39 = vpop.xlane.xlu1 %1665 }
 0x323   :  { %v1670_v14 = vadd.f32 %v1666_v39, %v1660_v6 }
 0x325   :  { %v1672_v29 = vmul.f32 0.001953125, %v1670_v14 }
 0x327   :  { %v1676_v33 = vadd.f32 1e-05, %v1672_v29 }
 0x329   :  { %1838 = vrsqrt.f32 %v1676_v33 }
 0x32d   :  { %v1663_v15 = vpop.xlane.xlu0 %1662 }
 0x331   :  { %v1669_v1 = vpop.xlane.xlu0 %1668 }
 0x332   :  { %v1671_v23 = vadd.f32 %v1669_v1, %v1663_v15 }
 0x333   :  { %v1839_v16 = vpop.eup %1838 }
 0x334   :  { %v1673_v3 = vmul.f32 0.001953125, %v1671_v23  ;;  %v1680_v42 = vmul.f32 %v1839_v16, %v1674_v34 }
 0x336   :  { %v1677_v45 = vadd.f32 1e-05, %v1673_v3  ;;  %1686 = vperm.xlu1 %1835, %v1680_v42  }
 0x338   :  { %1840 = vrsqrt.f32 %v1677_v45 }
 0x33a   :  { %1704 = vperm.xlu1 %1835, %v1682_v46  }
 0x33e   :  { %1709 = vperm.xlu1 %1835, %v1683_v31  }
 0x342   :  { %v1841_v27 = vpop.eup %1840 }
 0x343   :  { %v1681_v51 = vmul.f32 %v1841_v27, %v1675_v8 }
 0x345   :  { %1691 = vperm.xlu0 %1834, %v1681_v51  }
 0x3b5   :  { %v1687_v21 = vpop.permute.xlu1 %1686 }
 0x3b6   :  { %v1694_v41 = vmul.f32 %v1687_v21, %v1642_v30  ;;  %v1695_v25 = vmul.f32 %v1687_v21, %v1643_v24  ;;  %v1698_v7 = vmul.f32 %v1687_v21, %v1646_v53  ;;  %v1699_v4 = vmul.f32 %v1687_v21, %v1647_v63 }
 0x3b9   :  { %v1705_v60 = vpop.permute.xlu1 %1704 }
 0x3ba   :  { %v1712_v55 = vadd.f32 %v1705_v60, %v1694_v41  ;;  %v1713_v43 = vadd.f32 %v1705_v60, %v1695_v25  ;;  %v1716_v36 = vadd.f32 %v1705_v60, %v1698_v7  ;;  %v1717_v52 = vadd.f32 %v1705_v60, %v1699_v4 }
 0x3bc   :  { %v1720_v61 = vmax.f32 %v1712_v55, 0.0  ;;  %v1721_v38 = vmax.f32 %v1713_v43, 0.0  ;;  %v1724_v58 = vmax.f32 %v1716_v36, 0.0  ;;  %v1725_v10 = vmax.f32 %v1717_v52, 0.0 }
 0x3bd   :  { %v1710_v18 = vpop.permute.xlu1 %1709 }
 0x3be   :  { %1728 = vst [vmem:[#allocation2] sm:$0xff] %v1720_v61  ;;  %1729 = vst [vmem:[#allocation2 + $0x8] sm:$0xff] %v1721_v38 }
 0x3bf   :  { %1732 = vst [vmem:[#allocation2 + $0x20] sm:$0xff] %v1724_v58  ;;  %1733 = vst [vmem:[#allocation2 + $0x28] sm:$0xff] %v1725_v10 }
 0x3c4   :  { %v1692_v47 = vpop.permute.xlu0 %1691 }
 0x3c5   :  { %v1696_v19 = vmul.f32 %v1692_v47, %v1644_v44  ;;  %v1697_v48 = vmul.f32 %v1692_v47, %v1645_v20  ;;  %v1700_v35 = vmul.f32 %v1692_v47, %v1648_v2  ;;  %v1701_v37 = vmul.f32 %v1692_v47, %v1649_v12 }
 0x3c7   :  { %v1714_v9 = vadd.f32 %v1710_v18, %v1696_v19  ;;  %v1715_v40 = vadd.f32 %v1710_v18, %v1697_v48  ;;  %v1718_v30 = vadd.f32 %v1710_v18, %v1700_v35  ;;  %v1719_v24 = vadd.f32 %v1710_v18, %v1701_v37 }
 0x3c9   :  { %v1722_v53 = vmax.f32 %v1714_v9, 0.0  ;;  %v1723_v63 = vmax.f32 %v1715_v40, 0.0  ;;  %v1726_v26 = vmax.f32 %v1718_v30, 0.0  ;;  %v1727_v49 = vmax.f32 %v1719_v24, 0.0 }
 0x3cb   :  { %1730 = vst [vmem:[#allocation2 + $0x10] sm:$0xff] %v1722_v53  ;;  %1731 = vst [vmem:[#allocation2 + $0x18] sm:$0xff] %v1723_v63 }
 0x3cc   :  { %1734 = vst [vmem:[#allocation2 + $0x30] sm:$0xff] %v1726_v26  ;;  %1735 = vst [vmem:[#allocation2 + $0x38] sm:$0xff] %v1727_v49 }
 0x3cd   :  { %1853 = shalt.err (!%p1850_p4)
}
 0x3ce   :  { %s1854_s14 = scalar_lea.hbm %s2710_s6, 1024 }
 0x3cf   :  { %p1855_p5 = scmp.ne.s32.totalorder %s2710_s6, %s1854_s14  ;;  %p1858_p6 = scmp.lt.u32.totalorder %s1854_s14, %s2710_s6 }
 0x3d1   :  { %p1860_p7 = pnand %p1858_p6, %p1855_p5 }
 0x3d3   :  { %1863 = shalt.err (!%p1860_p7)
}
 0x3d4   :  { %s1885_s19 = smov 256  }
 0x3d5   :  { %1747 = dma.vmem_to_hbm [thread:$0]  %s1742_s5, 1024, %s2710_s6, [#allocation3], %s1885_s19, %s1885_s19, %s1876_s2  }
 0x3d6   :  { %1864 = dma.done.wait [#allocation3], 1024  }
 0x3d7   :  { %1865 = vsyncadd [#allocation3], 4294966272 }
 0x3d8   :  { %1751 = vsyncpa [#allocation3], 1 }

// kernel: tpu_custom_call.1
= control target key start
LH: loop header
LB: loop body
LE: loop exit
PB: predicated region body
PF: predicated region fallthrough
CT: control target
= control target key end

     0   :  { %vm36_vm0 = vcmask 1043456   ;;  %v960_v3 = vmov 0.0   ;;  %vm29_vm1 = vcmask 31744   ;;  %v961_v6 = vmov 4   ;;  %s1664_s0 = inlined_call_operand.vmem [shape: f32[2,4,256], index: 0, kind: input, shape index: {}]   ;;  %s1665_s1 = inlined_call_operand.vmem [shape: f32[16,4], index: 1, kind: input, shape index: {}]   ;;  %s1666_s2 = inlined_call_operand.vmem [shape: f32[16,9], index: 2, kind: input, shape index: {}]   ;;  %s1667_s3 = inlined_call_operand.vmem [shape: f32[9,256], index: 3, kind: input, shape index: {}]   ;;  %s1668_s4 = inlined_call_operand.vmem [shape: f32[16,1], index: 4, kind: input, shape index: {}]   ;;  %s1669_s5 = inlined_call_operand.vmem [shape: f32[16,1], index: 5, kind: input, shape index: {}]   ;;  %s1670_s6 = inlined_call_operand.hbm [shape: f32[2,16,256], index: 6, kind: output, shape index: {}]  }
   0x1   :  { %v26_v0 = vld [vmem:[%s1664_s0] sm:$0xff]  ;;  %v882_v1 = vld [vmem:[%s1664_s0 + $0x8] sm:$0xff]  ;;  %105 = vmatprep.mubr.f32.mxu0 %v960_v3  ;;  %190 = vmatprep.mubr.f32.mxu1 %v960_v3  ;;  %v962_v7 = vmov 1  }
   0x2   :  { %v28_v2 = vcombine.high %v26_v0, %v26_v0  ;;  %v121_v4 = vcombine.high %v882_v1, %v882_v1  ;;  %v24_v5 = vld [vmem:[%s1665_s1] sm:$0xff]  ;;  %914 = vset.pattern.permute.xlu1 %v961_v6  ;;  %915 = vset.pattern.permute.xlu0 %v962_v7 }
   0x3   :  { %11 = vsyncpa [#allocation3], 0  ;;  %v203_v8 = vld [vmem:[%s1666_s2] sm:$0xff]  ;;  %v25_v9 = vld [vmem:[%s1665_s1 + $0x8] sm:$0xff]  ;;  %v963_v11 = vmov 2   ;;  %v964_v12 = vmov 5   ;;  %v239_v54 = vlaneseq }
   0x4   :  { %878 = vmatprep.subr.msk.mxu0 %vm36_vm0, %v28_v2  ;;  %883 = vmatprep.subr.msk.mxu1 %vm36_vm0, %v121_v4  ;;  %v204_v10 = vld [vmem:[%s1666_s2 + $0x8] sm:$0xff]  ;;  %v965_v13 = vmov 6   ;;  %v966_v14 = vmov 3   ;;  %v967_v15 = vmov 7   ;;  %v968_v16 = vmov 8   ;;  %s970_s1 = smov 16  }
   0x5   :  { %879 = vmatpush1.msk.msra.mxu0 %vm36_vm0, %v26_v0  ;;  %884 = vmatpush1.msk.msra.mxu1 %vm36_vm0, %v882_v1  ;;  %v969_v17 = vmov 0   ;;  %s971_s2 = smov 17   ;;  %s972_s8 = smov 15   ;;  %v261_v57 = vshrl.u32 %v239_v54, 7  ;;  %v1241_v60 = vand.u32 127, %v239_v54 }
   0x6   :  { %880 = vmatmul.mubr.msk.f32.vlgmr.msra.gmra.mrb[0].mxu0 %vm29_vm1, %v24_v5  ;;  %885 = vmatmul.mubr.msk.f32.vlgmr.msra.gmra.mrb[0].mxu1 %vm29_vm1, %v24_v5  ;;  %s973_s9 = smov 1   ;;  %s974_s10 = smov 127   ;;  %v887_v63 = vld [vmem:[%s1667_s3 + $0x1] ss:$8 sm:$0x3] }
   0x7   :  { %111 = vmatprep.mubr.f32.mxu0 %v960_v3  ;;  %196 = vmatprep.mubr.f32.mxu1 %v960_v3  ;;  %s975_s11 = smov 113   ;;  %s976_s12 = smov 112   ;;  %v1243_v61 = vsub.s32 0, %v261_v57  ;;  %v1245_v62 = vsub.s32 1, %v261_v57  ;;  %vm306_vm2 = vcmp.lt.s32.totalorder %v1241_v60, 16  ;;  %vm438_vm3 = vcmp.lt.s32.totalorder %v1241_v60, 1 }
   0x8   :  { %207 = vperm.xlu1 %914, %v203_v8   ;;  %318 = vperm.xlu0 %915, %v203_v8   ;;  %s977_s13 = smov 111   ;;  %v250_v54 = vld [vmem:[%s1667_s3] ss:$8 sm:$0x3]  ;;  %vm241_vm4 = vcmp.lt.s32.totalorder %v1241_v60, 17  ;;  %vm372_vm5 = vcmp.lt.s32.totalorder %v1241_v60, 15 }
   0x9   :  { %v1257_v2 = vrot.slane %v887_v63, %v1243_v61  ;;  %v1260_v3 = vrot.slane %v887_v63, %v1245_v62  ;;  %vm504_vm6 = vcmp.lt.s32.totalorder %v1241_v60, 127  ;;  %vm570_vm7 = vcmp.lt.s32.totalorder %v1241_v60, 113 }
   0xa   :  { %881 = vmatmul.mubr.msk.f32.gmra.mrb[2].mxu0 %vm29_vm1, %v25_v9  ;;  %886 = vmatmul.mubr.msk.f32.gmra.mrb[2].mxu1 %vm29_vm1, %v25_v9  ;;  %vm636_vm8 = vcmp.lt.s32.totalorder %v1241_v60, 112  ;;  %vm702_vm9 = vcmp.lt.s32.totalorder %v1241_v60, 111 }
   0xc   :  { %212 = vperm.xlu1 %914, %v204_v10   ;;  %918 = vset.pattern.permute.xlu0 %v963_v11 }
   0xd   :  { %388 = vperm.xlu0 %918, %v204_v10  }
  0x10   :  { %916 = vset.pattern.permute.xlu1 %v962_v7 }
  0x11   :  { %322 = vperm.xlu1 %916, %v204_v10   ;;  %920 = vset.pattern.permute.xlu0 %v964_v12 }
  0x12   :  { %516 = vperm.xlu0 %920, %v203_v8  }
  0x15   :  { %917 = vset.pattern.permute.xlu1 %v963_v11 }
  0x16   :  { %384 = vperm.xlu1 %917, %v203_v8   ;;  %923 = vset.pattern.permute.xlu0 %v965_v13 }
  0x17   :  { %586 = vperm.xlu0 %923, %v204_v10  }
  0x1a   :  { %919 = vset.pattern.permute.xlu1 %v966_v14 }
  0x1b   :  { %450 = vperm.xlu1 %919, %v203_v8   ;;  %924 = vset.pattern.permute.xlu0 %v967_v15 }
  0x1c   :  { %648 = vperm.xlu0 %924, %v203_v8  }
  0x1f   :  { %454 = vperm.xlu1 %919, %v204_v10  }
  0x20   :  { %927 = vset.pattern.permute.xlu0 %v968_v16 }
  0x21   :  { %718 = vperm.xlu0 %927, %v204_v10  }
  0x23   :  { %921 = vset.pattern.permute.xlu1 %v964_v12 }
  0x24   :  { %520 = vperm.xlu1 %921, %v204_v10  }
  0x25   :  { %928 = vset.pattern.permute.xlu0 %v969_v17 }
  0x26   :  { %252 = vperm.xlu0 %928, %v203_v8  }
  0x28   :  { %922 = vset.pattern.permute.xlu1 %v965_v13 }
  0x29   :  { %582 = vperm.xlu1 %922, %v203_v8  }
  0x2a   :  { %256 = vperm.xlu0 %928, %v204_v10  }
  0x2d   :  { %925 = vset.pattern.permute.xlu1 %v967_v15 }
  0x2e   :  { %652 = vperm.xlu1 %925, %v204_v10  }
  0x32   :  { %926 = vset.pattern.permute.xlu1 %v968_v16 }
  0x33   :  { %714 = vperm.xlu1 %926, %v203_v8   ;;  %v889_v8 = vld [vmem:[%s1667_s3 + $0x3] ss:$8 sm:$0x3] }
  0x34   :  { %v1277_v13 = vrot.slane %v889_v8, %v1243_v61  ;;  %v1280_v14 = vrot.slane %v889_v8, %v1245_v62 }
  0x37   :  { %929 = vset.pattern.permute.xlu1 %v969_v17 }
  0x87   :  { %v1041_v18 = vpop.permute.xlu1 %207  ;;  %v1139_v32 = vpop.permute.xlu0 %318 }
  0x88   :  { %v336_v4 = vmul.f32 %v1257_v2, %v1139_v32  ;;  %v337_v5 = vmul.f32 %v1260_v3, %v1139_v32 }
  0x8b   :  { %v213_v23 = vpop.permute.xlu1 %212 }
  0x8c   :  { %v1151_v34 = vpop.permute.xlu0 %388 }
  0x90   :  { %v1145_v33 = vpop.permute.xlu1 %322 }
  0x91   :  { %v1159_v36 = vpop.permute.xlu0 %516 }
  0x95   :  { %v1153_v35 = vpop.permute.xlu1 %384 }
  0x96   :  { %v1171_v38 = vpop.permute.xlu0 %586 }
  0x9a   :  { %v1165_v37 = vpop.permute.xlu1 %450 }
  0x9b   :  { %v1181_v41 = vpop.permute.xlu0 %648 }
  0x9e   :  { %v1173_v39 = vpop.permute.xlu1 %454 }
  0xa0   :  { %v1193_v43 = vpop.permute.xlu0 %718 }
  0xa1   :  { %1675 = vst [vmem:[#allocation5_spill] sm:$0xff] %v1193_v43 }
  0xa3   :  { %v1179_v40 = vpop.permute.xlu1 %520 }
  0xa5   :  { %v1201_v45 = vpop.permute.xlu0 %252 }
  0xa8   :  { %v1191_v42 = vpop.permute.xlu1 %582 }
  0xa9   :  { %v1211_v46 = vpop.permute.xlu0 %256 }
  0xad   :  { %v1199_v44 = vpop.permute.xlu1 %652 }
  0xae   :  { %1676 = vst [vmem:[#allocation6_spill] sm:$0xff] %v1199_v44 }
  0xb2   :  { %v1213_v47 = vpop.permute.xlu1 %714 }
  0xd9   :  { %v1043_v19 = vpop.f32.mrb[0].mxu0  ;;  %v1045_v20 = vpop.f32.mrb[0].mxu1 }
  0xda   :  { %290 = vrot.lane.b32.xlu1 %v1043_v19, %s970_s1  ;;  %223 = vrot.lane.b32.xlu0 %v1043_v19, %s971_s2  ;;  %v1051_v21 = vpop.f32.mrb[1].mxu0  ;;  %v1053_v22 = vpop.f32.mrb[1].mxu1 }
  0xdd   :  { %v1055_v24 = vpop.f32.mrb[2].mxu0  ;;  %v1057_v25 = vpop.f32.mrb[2].mxu1 }
  0xde   :  { %294 = vrot.lane.b32.xlu1 %v1045_v20, %s970_s1  ;;  %227 = vrot.lane.b32.xlu0 %v1045_v20, %s971_s2  ;;  %v1064_v26 = vmul.f32 %v213_v23, %v1055_v24  ;;  %v1066_v27 = vpop.f32.mrb[3].mxu0  ;;  %v1068_v28 = vpop.f32.mrb[3].mxu1  ;;  %v1071_v29 = vmul.f32 %v213_v23, %v1057_v25 }
  0xdf   :  { %v1074_v30 = vmul.f32 %v213_v23, %v1066_v27  ;;  %v1077_v31 = vmul.f32 %v213_v23, %v1068_v28 }
  0xe2   :  { %356 = vrot.lane.b32.xlu1 %v1043_v19, %s972_s8  ;;  %360 = vrot.lane.b32.xlu0 %v1045_v20, %s972_s8 }
  0xe6   :  { %422 = vrot.lane.b32.xlu1 %v1043_v19, %s973_s9  ;;  %492 = vrot.lane.b32.xlu0 %v1045_v20, %s974_s10 }
  0xea   :  { %426 = vrot.lane.b32.xlu1 %v1045_v20, %s973_s9  ;;  %554 = vrot.lane.b32.xlu0 %v1043_v19, %s975_s11 }
  0xee   :  { %488 = vrot.lane.b32.xlu1 %v1043_v19, %s974_s10  ;;  %558 = vrot.lane.b32.xlu0 %v1045_v20, %s975_s11 }
  0xf2   :  { %620 = vrot.lane.b32.xlu0 %v1043_v19, %s976_s12  ;;  %298 = vrot.lane.b32.xlu1 %v1051_v21, %s970_s1 }
  0xf6   :  { %624 = vrot.lane.b32.xlu0 %v1045_v20, %s976_s12  ;;  %302 = vrot.lane.b32.xlu1 %v1053_v22, %s970_s1 }
  0xfa   :  { %686 = vrot.lane.b32.xlu0 %v1043_v19, %s977_s13  ;;  %430 = vrot.lane.b32.xlu1 %v1051_v21, %s973_s9 }
  0xfe   :  { %690 = vrot.lane.b32.xlu0 %v1045_v20, %s977_s13  ;;  %434 = vrot.lane.b32.xlu1 %v1053_v22, %s973_s9 }
 0x102   :  { %231 = vrot.lane.b32.xlu0 %v1051_v21, %s971_s2  ;;  %225 = vrot.lane.b32.xlu1 %v1055_v24, %s971_s2 }
 0x106   :  { %235 = vrot.lane.b32.xlu0 %v1053_v22, %s971_s2  ;;  %229 = vrot.lane.b32.xlu1 %v1057_v25, %s971_s2 }
 0x10a   :  { %364 = vrot.lane.b32.xlu0 %v1051_v21, %s972_s8  ;;  %358 = vrot.lane.b32.xlu1 %v1055_v24, %s972_s8 }
 0x10e   :  { %368 = vrot.lane.b32.xlu0 %v1053_v22, %s972_s8  ;;  %362 = vrot.lane.b32.xlu1 %v1057_v25, %s972_s8 }
 0x112   :  { %496 = vrot.lane.b32.xlu0 %v1051_v21, %s974_s10  ;;  %490 = vrot.lane.b32.xlu1 %v1055_v24, %s974_s10 }
 0x116   :  { %500 = vrot.lane.b32.xlu0 %v1053_v22, %s974_s10  ;;  %494 = vrot.lane.b32.xlu1 %v1057_v25, %s974_s10 }
 0x11a   :  { %562 = vrot.lane.b32.xlu0 %v1051_v21, %s975_s11  ;;  %556 = vrot.lane.b32.xlu1 %v1055_v24, %s975_s11 }
 0x11e   :  { %566 = vrot.lane.b32.xlu0 %v1053_v22, %s975_s11  ;;  %560 = vrot.lane.b32.xlu1 %v1057_v25, %s975_s11 }
 0x122   :  { %628 = vrot.lane.b32.xlu0 %v1051_v21, %s976_s12  ;;  %622 = vrot.lane.b32.xlu1 %v1055_v24, %s976_s12 }
 0x126   :  { %632 = vrot.lane.b32.xlu0 %v1053_v22, %s976_s12  ;;  %626 = vrot.lane.b32.xlu1 %v1057_v25, %s976_s12 }
 0x12a   :  { %292 = vrot.lane.b32.xlu0 %v1055_v24, %s970_s1  ;;  %688 = vrot.lane.b32.xlu1 %v1055_v24, %s977_s13 }
 0x12e   :  { %296 = vrot.lane.b32.xlu0 %v1057_v25, %s970_s1  ;;  %692 = vrot.lane.b32.xlu1 %v1057_v25, %s977_s13 }
 0x132   :  { %424 = vrot.lane.b32.xlu0 %v1055_v24, %s973_s9  ;;  %233 = vrot.lane.b32.xlu1 %v1066_v27, %s971_s2 }
 0x136   :  { %428 = vrot.lane.b32.xlu0 %v1057_v25, %s973_s9  ;;  %237 = vrot.lane.b32.xlu1 %v1068_v28, %s971_s2 }
 0x13a   :  { %300 = vrot.lane.b32.xlu0 %v1066_v27, %s970_s1  ;;  %366 = vrot.lane.b32.xlu1 %v1066_v27, %s972_s8 }
 0x13e   :  { %304 = vrot.lane.b32.xlu0 %v1068_v28, %s970_s1  ;;  %370 = vrot.lane.b32.xlu1 %v1068_v28, %s972_s8 }
 0x142   :  { %432 = vrot.lane.b32.xlu0 %v1066_v27, %s973_s9  ;;  %498 = vrot.lane.b32.xlu1 %v1066_v27, %s974_s10 }
 0x146   :  { %436 = vrot.lane.b32.xlu0 %v1068_v28, %s973_s9  ;;  %502 = vrot.lane.b32.xlu1 %v1068_v28, %s974_s10 }
 0x14a   :  { %694 = vrot.lane.b32.xlu0 %v1051_v21, %s977_s13  ;;  %564 = vrot.lane.b32.xlu1 %v1066_v27, %s975_s11 }
 0x14c   :  { %v291_v48 = vpop.permute.xlu1 %290  ;;  %v1219_v49 = vpop.permute.xlu0 %223 }
 0x14e   :  { %698 = vrot.lane.b32.xlu0 %v1053_v22, %s977_s13  ;;  %568 = vrot.lane.b32.xlu1 %v1068_v28, %s975_s11 }
 0x150   :  { %v295_v50 = vpop.permute.xlu1 %294  ;;  %v1225_v51 = vpop.permute.xlu0 %227 }
 0x152   :  { %630 = vrot.lane.b32.xlu1 %v1066_v27, %s976_s12 }
 0x154   :  { %v1229_v52 = vpop.permute.xlu1 %356  ;;  %v1231_v53 = vpop.permute.xlu0 %360 }
 0x156   :  { %634 = vrot.lane.b32.xlu1 %v1068_v28, %s976_s12 }
 0x158   :  { %v423_v55 = vpop.permute.xlu1 %422  ;;  %v1235_v56 = vpop.permute.xlu0 %492 }
 0x15a   :  { %696 = vrot.lane.b32.xlu1 %v1066_v27, %s977_s13  ;;  %v468_v27 = vmul.f32 %v1277_v13, %v1165_v37 }
 0x15c   :  { %v427_v58 = vpop.permute.xlu1 %426  ;;  %v1239_v59 = vpop.permute.xlu0 %554 }
 0x15e   :  { %700 = vrot.lane.b32.xlu1 %v1068_v28, %s977_s13  ;;  %v469_v28 = vmul.f32 %v1280_v14, %v1165_v37  ;;  %v1306_v37 = vrot.slane %v250_v54, %v1245_v62 }
 0x160   :  { %v1252_v0 = vpop.permute.xlu1 %488  ;;  %v1254_v1 = vpop.permute.xlu0 %558 }
 0x164   :  { %v1267_v6 = vpop.permute.xlu0 %620  ;;  %v299_v7 = vpop.permute.xlu1 %298 }
 0x165   :  { %v307_v9 = vsel %vm306_vm2, %v291_v48, %v299_v7  ;;  %v311_v10 = vsel %vm306_vm2, %v299_v7, %v291_v48 }
 0x166   :  { %v340_v11 = vmul.f32 %v336_v4, %v311_v10  ;;  %v341_v12 = vmul.f32 %v337_v5, %v307_v9 }
 0x168   :  { %v1282_v15 = vpop.permute.xlu0 %624  ;;  %v303_v16 = vpop.permute.xlu1 %302 }
 0x169   :  { %v309_v17 = vsel %vm306_vm2, %v295_v50, %v303_v16  ;;  %v313_v23 = vsel %vm306_vm2, %v303_v16, %v295_v50 }
 0x16a   :  { %v344_v24 = vmul.f32 %v336_v4, %v313_v23  ;;  %v345_v25 = vmul.f32 %v337_v5, %v309_v17  ;;  %v1303_v5 = vrot.slane %v250_v54, %v1243_v61  ;;  %v888_v17 = vld [vmem:[%s1667_s3 + $0x2] ss:$8 sm:$0x3] }
 0x16c   :  { %v1293_v32 = vpop.permute.xlu0 %686  ;;  %v431_v48 = vpop.permute.xlu1 %430  ;;  %v270_v23 = vmul.f32 %v1303_v5, %v1201_v45 }
 0x16d   :  { %1677 = vst [vmem:[#allocation7_spill] sm:$0xff] %v1293_v32  ;;  %v439_v50 = vsel %vm438_vm3, %v423_v55, %v431_v48  ;;  %v443_v57 = vsel %vm438_vm3, %v431_v48, %v423_v55  ;;  %v271_v48 = vmul.f32 %v1306_v37, %v1201_v45  ;;  %v1339_v45 = vrot.slane %v888_v17, %v1243_v61 }
 0x16e   :  { %v472_v63 = vmul.f32 %v468_v27, %v443_v57  ;;  %v473_v4 = vmul.f32 %v469_v28, %v439_v50  ;;  %v216_v57 = vmul.f32 %v1041_v18, %v1051_v21 }
 0x170   :  { %v1308_v7 = vpop.permute.xlu0 %690  ;;  %v435_v8 = vpop.permute.xlu1 %434 }
 0x171   :  { %1678 = vst [vmem:[#allocation8_spill] sm:$0xff] %v1308_v7  ;;  %v441_v9 = vsel %vm438_vm3, %v427_v58, %v435_v8  ;;  %v445_v10 = vsel %vm438_vm3, %v435_v8, %v427_v58  ;;  %v219_v7 = vmul.f32 %v1041_v18, %v1045_v20 }
 0x172   :  { %v1314_v16 = vmul.f32 %v468_v27, %v445_v10  ;;  %v1316_v55 = vmul.f32 %v469_v28, %v441_v9  ;;  %v215_v28 = vmul.f32 %v1041_v18, %v1043_v19  ;;  %v1342_v10 = vrot.slane %v888_v17, %v1245_v62 }
 0x173   :  { %v220_v19 = vmul.f32 %v1041_v18, %v1053_v22 }
 0x174   :  { %v232_v54 = vpop.permute.xlu0 %231  ;;  %v1326_v50 = vpop.permute.xlu1 %225  ;;  %v403_v18 = vmul.f32 %v1342_v10, %v1153_v35 }
 0x175   :  { %v242_v58 = vsel %vm241_vm4, %v1219_v49, %v232_v54  ;;  %v246_v27 = vsel %vm241_vm4, %v232_v54, %v1219_v49 }
 0x176   :  { %v274_v8 = vmul.f32 %v270_v23, %v246_v27  ;;  %v275_v9 = vmul.f32 %v271_v48, %v242_v58 }
 0x178   :  { %v282_v43 = vadd.f32 %v274_v8, %v215_v28  ;;  %v283_v44 = vadd.f32 %v275_v9, %v216_v57  ;;  %v236_v49 = vpop.permute.xlu0 %235  ;;  %v1346_v54 = vpop.permute.xlu1 %229  ;;  %v402_v57 = vmul.f32 %v1339_v45, %v1153_v35 }
 0x179   :  { %v244_v21 = vsel %vm241_vm4, %v1225_v51, %v236_v49  ;;  %v248_v17 = vsel %vm241_vm4, %v236_v49, %v1225_v51  ;;  %v890_v51 = vld [vmem:[%s1667_s3 + $0x5] ss:$8 sm:$0x3] }
 0x17a   :  { %v278_v58 = vmul.f32 %v270_v23, %v248_v17  ;;  %v279_v27 = vmul.f32 %v271_v48, %v244_v21  ;;  %v348_v28 = vadd.f32 %v340_v11, %v282_v43  ;;  %v349_v20 = vadd.f32 %v341_v12, %v283_v44 }
 0x17b   :  { %v1373_v23 = vrot.slane %v890_v51, %v1243_v61  ;;  %v1376_v48 = vrot.slane %v890_v51, %v1245_v62 }
 0x17c   :  { %v286_v22 = vadd.f32 %v278_v58, %v219_v7  ;;  %v287_v8 = vadd.f32 %v279_v27, %v220_v19  ;;  %v365_v9 = vpop.permute.xlu0 %364  ;;  %v1361_v32 = vpop.permute.xlu1 %358 }
 0x17d   :  { %v373_v43 = vsel %vm372_vm5, %v1229_v52, %v365_v9  ;;  %v377_v44 = vsel %vm372_vm5, %v365_v9, %v1229_v52 }
 0x17e   :  { %v406_v11 = vmul.f32 %v402_v57, %v377_v44  ;;  %v407_v12 = vmul.f32 %v403_v18, %v373_v43  ;;  %v352_v35 = vadd.f32 %v344_v24, %v286_v22  ;;  %v353_v7 = vadd.f32 %v345_v25, %v287_v8 }
 0x180   :  { %v414_v49 = vadd.f32 %v406_v11, %v348_v28  ;;  %v415_v19 = vadd.f32 %v407_v12, %v349_v20  ;;  %v369_v21 = vpop.permute.xlu0 %368  ;;  %v1378_v17 = vpop.permute.xlu1 %362  ;;  %v534_v28 = vmul.f32 %v1373_v23, %v1159_v36  ;;  %v535_v20 = vmul.f32 %v1376_v48, %v1159_v36 }
 0x181   :  { %v375_v58 = vsel %vm372_vm5, %v1231_v53, %v369_v21  ;;  %v379_v52 = vsel %vm372_vm5, %v369_v21, %v1231_v53  ;;  %v891_v53 = vld [vmem:[%s1667_s3 + $0x6] ss:$8 sm:$0x3] }
 0x182   :  { %v410_v24 = vmul.f32 %v402_v57, %v379_v52  ;;  %v411_v25 = vmul.f32 %v403_v18, %v375_v58  ;;  %v480_v27 = vadd.f32 %v472_v63, %v414_v49  ;;  %v481_v22 = vadd.f32 %v473_v4, %v415_v19 }
 0x183   :  { %v1405_v11 = vrot.slane %v891_v53, %v1243_v61  ;;  %v1408_v12 = vrot.slane %v891_v53, %v1245_v62 }
 0x184   :  { %v418_v8 = vadd.f32 %v410_v24, %v352_v35  ;;  %v419_v9 = vadd.f32 %v411_v25, %v353_v7  ;;  %v497_v51 = vpop.permute.xlu0 %496  ;;  %v1391_v43 = vpop.permute.xlu1 %490 }
 0x185   :  { %v505_v63 = vsel %vm504_vm6, %v1252_v0, %v497_v51  ;;  %v509_v4 = vsel %vm504_vm6, %v497_v51, %v1252_v0  ;;  %v600_v58 = vmul.f32 %v1405_v11, %v1191_v42  ;;  %v601_v52 = vmul.f32 %v1408_v12, %v1191_v42 }
 0x186   :  { %v538_v57 = vmul.f32 %v534_v28, %v505_v63  ;;  %v539_v18 = vmul.f32 %v535_v20, %v509_v4  ;;  %v484_v36 = vadd.f32 %v1314_v16, %v418_v8  ;;  %v485_v44 = vadd.f32 %v1316_v55, %v419_v9  ;;  %v892_v8 = vld [vmem:[%s1667_s3 + $0x7] ss:$8 sm:$0x3] }
 0x187   :  { %v1435_v42 = vrot.slane %v892_v8, %v1243_v61  ;;  %v1438_v51 = vrot.slane %v892_v8, %v1245_v62 }
 0x188   :  { %v546_v35 = vadd.f32 %v538_v57, %v480_v27  ;;  %v547_v7 = vadd.f32 %v539_v18, %v481_v22  ;;  %v501_v49 = vpop.permute.xlu0 %500  ;;  %v1410_v19 = vpop.permute.xlu1 %494 }
 0x189   :  { %v507_v0 = vsel %vm504_vm6, %v1235_v56, %v501_v49  ;;  %v511_v16 = vsel %vm504_vm6, %v501_v49, %v1235_v56  ;;  %v666_v49 = vmul.f32 %v1435_v42, %v1181_v41 }
 0x18a   :  { %v542_v55 = vmul.f32 %v534_v28, %v507_v0  ;;  %v543_v21 = vmul.f32 %v535_v20, %v511_v16 }
 0x18c   :  { %v550_v24 = vadd.f32 %v542_v55, %v484_v36  ;;  %v551_v25 = vadd.f32 %v543_v21, %v485_v44  ;;  %v563_v27 = vpop.permute.xlu0 %562  ;;  %v1423_v22 = vpop.permute.xlu1 %556 }
 0x18d   :  { %v571_v56 = vsel %vm570_vm7, %v1239_v59, %v563_v27  ;;  %v575_v28 = vsel %vm570_vm7, %v563_v27, %v1239_v59 }
 0x18e   :  { %v604_v20 = vmul.f32 %v600_v58, %v571_v56  ;;  %v605_v9 = vmul.f32 %v601_v52, %v575_v28 }
 0x190   :  { %v612_v53 = vadd.f32 %v604_v20, %v546_v35  ;;  %v613_v63 = vadd.f32 %v605_v9, %v547_v7  ;;  %v567_v4 = vpop.permute.xlu0 %566  ;;  %v1440_v57 = vpop.permute.xlu1 %560  ;;  %v667_v35 = vmul.f32 %v1438_v51, %v1181_v41 }
 0x191   :  { %v573_v18 = vsel %vm570_vm7, %v1254_v1, %v567_v4  ;;  %v577_v59 = vsel %vm570_vm7, %v567_v4, %v1254_v1 }
 0x192   :  { %v608_v36 = vmul.f32 %v600_v58, %v573_v18  ;;  %v609_v44 = vmul.f32 %v601_v52, %v577_v59  ;;  %v272_v59 = vmul.f32 %v1303_v5, %v1211_v46 }
 0x194   :  { %v616_v7 = vadd.f32 %v608_v36, %v550_v24  ;;  %v617_v0 = vadd.f32 %v609_v44, %v551_v25  ;;  %v629_v16 = vpop.permute.xlu0 %628  ;;  %v1453_v55 = vpop.permute.xlu1 %622  ;;  %v273_v36 = vmul.f32 %v1306_v37, %v1211_v46 }
 0x195   :  { %v637_v21 = vsel %vm636_vm8, %v1267_v6, %v629_v16  ;;  %v641_v1 = vsel %vm636_vm8, %v629_v16, %v1267_v6 }
 0x196   :  { %v670_v58 = vmul.f32 %v666_v49, %v637_v21  ;;  %v671_v52 = vmul.f32 %v667_v35, %v641_v1 }
 0x198   :  { %v1461_v27 = vadd.f32 %v670_v58, %v612_v53  ;;  %v1463_v8 = vadd.f32 %v671_v52, %v613_v63  ;;  %v633_v41 = vpop.permute.xlu0 %632  ;;  %v1465_v24 = vpop.permute.xlu1 %626 }
 0x199   :  { %v639_v25 = vsel %vm636_vm8, %v1282_v15, %v633_v41  ;;  %v643_v56 = vsel %vm636_vm8, %v633_v41, %v1282_v15  ;;  %v405_v41 = vmul.f32 %v1342_v10, %v1151_v34 }
 0x19a   :  { %v674_v28 = vmul.f32 %v666_v49, %v639_v25  ;;  %v675_v20 = vmul.f32 %v667_v35, %v643_v56 }
 0x19c   :  { %v1473_v6 = vadd.f32 %v674_v28, %v616_v7  ;;  %v1475_v9 = vadd.f32 %v675_v20, %v617_v0  ;;  %v293_v53 = vpop.permute.xlu0 %292  ;;  %v1477_v63 = vpop.permute.xlu1 %688 }
 0x1a0   :  { %v297_v4 = vpop.permute.xlu0 %296  ;;  %v1479_v18 = vpop.permute.xlu1 %692 }
 0x1a4   :  { %v425_v44 = vpop.permute.xlu0 %424  ;;  %v234_v15 = vpop.permute.xlu1 %233 }
 0x1a5   :  { %v243_v49 = vsel %vm241_vm4, %v1326_v50, %v234_v15  ;;  %v247_v35 = vsel %vm241_vm4, %v234_v15, %v1326_v50  ;;  %v338_v50 = vmul.f32 %v1257_v2, %v1145_v33 }
 0x1a6   :  { %v276_v7 = vmul.f32 %v272_v59, %v247_v35  ;;  %v277_v0 = vmul.f32 %v273_v36, %v243_v49 }
 0x1a8   :  { %v284_v16 = vadd.f32 %v276_v7, %v1064_v26  ;;  %v285_v21 = vadd.f32 %v277_v0, %v1074_v30  ;;  %v1493_v5 = vpop.permute.xlu0 %428  ;;  %v238_v1 = vpop.permute.xlu1 %237  ;;  %v339_v26 = vmul.f32 %v1260_v3, %v1145_v33  ;;  %v404_v30 = vmul.f32 %v1339_v45, %v1151_v34 }
 0x1a9   :  { %v245_v46 = vsel %vm241_vm4, %v1346_v54, %v238_v1  ;;  %v249_v37 = vsel %vm241_vm4, %v238_v1, %v1346_v54  ;;  %v470_v1 = vmul.f32 %v1277_v13, %v1173_v39 }
 0x1aa   :  { %v280_v58 = vmul.f32 %v272_v59, %v249_v37  ;;  %v281_v52 = vmul.f32 %v273_v36, %v245_v46  ;;  %v471_v46 = vmul.f32 %v1280_v14, %v1173_v39 }
 0x1ac   :  { %v288_v25 = vadd.f32 %v280_v58, %v1071_v29  ;;  %v289_v56 = vadd.f32 %v281_v52, %v1077_v31  ;;  %v301_v28 = vpop.permute.xlu0 %300  ;;  %v367_v54 = vpop.permute.xlu1 %366  ;;  %v536_v58 = vmul.f32 %v1373_v23, %v1179_v40  ;;  %v537_v52 = vmul.f32 %v1376_v48, %v1179_v40 }
 0x1ad   :  { %v308_v20 = vsel %vm306_vm2, %v293_v53, %v301_v28  ;;  %v312_v2 = vsel %vm306_vm2, %v301_v28, %v293_v53  ;;  %v374_v33 = vsel %vm372_vm5, %v1361_v32, %v367_v54  ;;  %v378_v34 = vsel %vm372_vm5, %v367_v54, %v1361_v32 }
 0x1ae   :  { %v342_v3 = vmul.f32 %v338_v50, %v312_v2  ;;  %v343_v29 = vmul.f32 %v339_v26, %v308_v20  ;;  %v408_v45 = vmul.f32 %v404_v30, %v378_v34  ;;  %v409_v31 = vmul.f32 %v405_v41, %v374_v33 }
 0x1b0   :  { %v350_v10 = vadd.f32 %v342_v3, %v284_v16  ;;  %v351_v59 = vadd.f32 %v343_v29, %v285_v21  ;;  %v305_v36 = vpop.permute.xlu0 %304  ;;  %v371_v15 = vpop.permute.xlu1 %370 }
 0x1b1   :  { %v310_v49 = vsel %vm306_vm2, %v297_v4, %v305_v36  ;;  %v314_v53 = vsel %vm306_vm2, %v305_v36, %v297_v4  ;;  %v376_v35 = vsel %vm372_vm5, %v1378_v17, %v371_v15  ;;  %v380_v32 = vsel %vm372_vm5, %v371_v15, %v1378_v17  ;;  %v893_v17 = vld [vmem:[%s1667_s3 + $0x10] ss:$8 sm:$0x3] }
 0x1b2   :  { %v416_v7 = vadd.f32 %v408_v45, %v350_v10  ;;  %v417_v0 = vadd.f32 %v409_v31, %v351_v59  ;;  %v346_v16 = vmul.f32 %v338_v50, %v314_v53  ;;  %v347_v21 = vmul.f32 %v339_v26, %v310_v49 }
 0x1b3   :  { %v412_v37 = vmul.f32 %v404_v30, %v380_v32  ;;  %v413_v4 = vmul.f32 %v405_v41, %v376_v35  ;;  %v1556_v2 = vrot.slane %v893_v17, %v1245_v62  ;;  %v602_v36 = vmul.f32 %v1405_v11, %v1171_v38 }
 0x1b4   :  { %v354_v50 = vadd.f32 %v346_v16, %v288_v25  ;;  %v355_v26 = vadd.f32 %v347_v21, %v289_v56  ;;  %v433_v28 = vpop.permute.xlu0 %432  ;;  %v499_v54 = vpop.permute.xlu1 %498  ;;  %v1553_v25 = vrot.slane %v893_v17, %v1243_v61  ;;  %v603_v15 = vmul.f32 %v1408_v12, %v1171_v38  ;;  %v1679_v16 = vld [vmem:[#allocation7_spill] sm:$0xff] }
 0x1b5   :  { %v440_v13 = vsel %vm438_vm3, %v425_v44, %v433_v28  ;;  %v444_v39 = vsel %vm438_vm3, %v433_v28, %v425_v44  ;;  %v506_v14 = vsel %vm504_vm6, %v1391_v43, %v499_v54  ;;  %v510_v40 = vsel %vm504_vm6, %v499_v54, %v1391_v43 }
 0x1b6   :  { %v420_v23 = vadd.f32 %v412_v37, %v354_v50  ;;  %v421_v48 = vadd.f32 %v413_v4, %v355_v26  ;;  %v474_v30 = vmul.f32 %v470_v1, %v444_v39  ;;  %v475_v41 = vmul.f32 %v471_v46, %v440_v13  ;;  %v1680_v13 = vld [vmem:[#allocation8_spill] sm:$0xff] }
 0x1b7   :  { %v540_v56 = vmul.f32 %v536_v58, %v506_v14  ;;  %v541_v20 = vmul.f32 %v537_v52, %v510_v40  ;;  %v732_v53 = vmul.f32 %v1553_v25, %v1213_v47  ;;  %v733_v35 = vmul.f32 %v1556_v2, %v1213_v47 }
 0x1b8   :  { %v482_v44 = vadd.f32 %v474_v30, %v416_v7  ;;  %v483_v33 = vadd.f32 %v475_v41, %v417_v0  ;;  %v437_v34 = vpop.permute.xlu0 %436  ;;  %v503_v3 = vpop.permute.xlu1 %502  ;;  %v1681_v41 = vld [vmem:[#allocation6_spill] sm:$0xff] }
 0x1b9   :  { %v442_v43 = vsel %vm438_vm3, %v1493_v5, %v437_v34  ;;  %v446_v61 = vsel %vm438_vm3, %v437_v34, %v1493_v5  ;;  %v508_v29 = vsel %vm504_vm6, %v1410_v19, %v503_v3  ;;  %v512_v62 = vsel %vm504_vm6, %v503_v3, %v1410_v19 }
 0x1ba   :  { %v548_v45 = vadd.f32 %v540_v56, %v482_v44  ;;  %v549_v31 = vadd.f32 %v541_v20, %v483_v33  ;;  %v478_v10 = vmul.f32 %v470_v1, %v446_v61  ;;  %v479_v59 = vmul.f32 %v471_v46, %v442_v43 }
 0x1bb   :  { %v544_v49 = vmul.f32 %v536_v58, %v508_v29  ;;  %v545_v5 = vmul.f32 %v537_v52, %v512_v62  ;;  %v668_v56 = vmul.f32 %v1435_v42, %v1681_v41  ;;  %v669_v20 = vmul.f32 %v1438_v51, %v1681_v41 }
 0x1bc   :  { %v486_v32 = vadd.f32 %v478_v10, %v420_v23  ;;  %v487_v19 = vadd.f32 %v479_v59, %v421_v48  ;;  %v695_v7 = vpop.permute.xlu0 %694  ;;  %v565_v0 = vpop.permute.xlu1 %564 }
 0x1bd   :  { %v703_v21 = vsel %vm702_vm9, %v1679_v16, %v695_v7  ;;  %v707_v38 = vsel %vm702_vm9, %v695_v7, %v1679_v16  ;;  %v572_v11 = vsel %vm570_vm7, %v1423_v22, %v565_v0  ;;  %v576_v47 = vsel %vm570_vm7, %v565_v0, %v1423_v22 }
 0x1be   :  { %v552_v12 = vadd.f32 %v544_v49, %v486_v32  ;;  %v553_v1 = vadd.f32 %v545_v5, %v487_v19  ;;  %v736_v46 = vmul.f32 %v732_v53, %v703_v21  ;;  %v737_v37 = vmul.f32 %v733_v35, %v707_v38 }
 0x1bf   :  { %v606_v4 = vmul.f32 %v602_v36, %v572_v11  ;;  %v607_v58 = vmul.f32 %v603_v15, %v576_v47 }
 0x1c0   :  { %v699_v52 = vpop.permute.xlu0 %698  ;;  %v569_v17 = vpop.permute.xlu1 %568  ;;  %v744_v50 = vadd.f32 %v736_v46, %v1461_v27  ;;  %v745_v26 = vadd.f32 %v737_v37, %v1463_v8 }
 0x1c1   :  { %v614_v28 = vadd.f32 %v606_v4, %v548_v45  ;;  %v615_v54 = vadd.f32 %v607_v58, %v549_v31  ;;  %v705_v39 = vsel %vm702_vm9, %v1680_v13, %v699_v52  ;;  %v709_v22 = vsel %vm702_vm9, %v699_v52, %v1680_v13 }
 0x1c2   :  { %v740_v14 = vmul.f32 %v732_v53, %v705_v39  ;;  %v741_v40 = vmul.f32 %v733_v35, %v709_v22  ;;  %v574_v23 = vsel %vm570_vm7, %v1440_v57, %v569_v17  ;;  %v578_v27 = vsel %vm570_vm7, %v569_v17, %v1440_v57 }
 0x1c3   :  { %v610_v8 = vmul.f32 %v602_v36, %v574_v23  ;;  %v611_v48 = vmul.f32 %v603_v15, %v578_v27  ;;  %v752_v30 = vadd.f32 %v745_v26, %v744_v50  ;;  %v1682_v36 = vld [vmem:[#allocation5_spill] sm:$0xff] }
 0x1c4   :  { %v631_v44 = vpop.permute.xlu1 %630  ;;  %v748_v33 = vadd.f32 %v740_v14, %v1473_v6  ;;  %v749_v34 = vadd.f32 %v741_v40, %v1475_v9  ;;  %v735_v15 = vmul.f32 %v1556_v2, %v1682_v36 }
 0x1c5   :  { %v618_v3 = vadd.f32 %v610_v8, %v552_v12  ;;  %v619_v43 = vadd.f32 %v611_v48, %v553_v1  ;;  %753 = vadd.xlane.f32.xlu0 %v752_v30  ;;  %v638_v57 = vsel %vm636_vm8, %v1453_v55, %v631_v44  ;;  %v642_v61 = vsel %vm636_vm8, %v631_v44, %v1453_v55 }
 0x1c6   :  { %v672_v42 = vmul.f32 %v668_v56, %v638_v57  ;;  %v673_v29 = vmul.f32 %v669_v20, %v642_v61  ;;  %v758_v62 = vadd.f32 %v749_v34, %v748_v33  ;;  %v734_v55 = vmul.f32 %v1553_v25, %v1682_v36  ;;  %v801_v36 = vld [vmem:[%s1668_s4 + $0x8] sm:$0xff] }
 0x1c8   :  { %v680_v51 = vadd.f32 %v672_v42, %v614_v28  ;;  %v681_v45 = vadd.f32 %v673_v29, %v615_v54  ;;  %v635_v31 = vpop.permute.xlu1 %634 }
 0x1c9   :  { %759 = vadd.xlane.f32.xlu0 %v758_v62  ;;  %v640_v6 = vsel %vm636_vm8, %v1465_v24, %v635_v31  ;;  %v644_v9 = vsel %vm636_vm8, %v635_v31, %v1465_v24  ;;  %v800_v62 = vld [vmem:[%s1668_s4] sm:$0xff]  ;;  %s978_s4 = smov [#allocation2]  }
 0x1ca   :  { %v676_v10 = vmul.f32 %v668_v56, %v640_v6  ;;  %v677_v59 = vmul.f32 %v669_v20, %v644_v9 }
 0x1cc   :  { %v684_v49 = vadd.f32 %v676_v10, %v618_v3  ;;  %v685_v5 = vadd.f32 %v677_v59, %v619_v43  ;;  %v697_v53 = vpop.permute.xlu1 %696  ;;  %v808_v10 = vld [vmem:[%s1669_s5] sm:$0xff]  ;;  %v809_v59 = vld [vmem:[%s1669_s5 + $0x8] sm:$0xff]  ;;  %s867_s5 = sshll.u32 %s978_s4, 4  ;;  %s868_s5 = int_to_ptr.vmem [resolvable:$true] %s867_s5 }
 0x1cd   :  { %v704_v35 = vsel %vm702_vm9, %v1477_v63, %v697_v53  ;;  %v708_v32 = vsel %vm702_vm9, %v697_v53, %v1477_v63  ;;  %s936_s11 = scalar_lea.vmem %s868_s5, 1024  ;;  %p941_p1 = scmp.lt.s32.totalorder %s868_s5, %s868_s5 }
 0x1ce   :  { %v738_v24 = vmul.f32 %v734_v55, %v704_v35  ;;  %v739_v19 = vmul.f32 %v735_v15, %v708_v32  ;;  %p937_p0 = scmp.ne.s32.totalorder %s868_s5, %s936_s11  ;;  %p942_p2 = scmp.lt.s32.totalorder %s936_s11, %s936_s11 }
 0x1d0   :  { %v701_v7 = vpop.permute.xlu1 %700  ;;  %v746_v0 = vadd.f32 %v738_v24, %v680_v51  ;;  %v747_v16 = vadd.f32 %v739_v19, %v681_v45  ;;  %p943_p3 = por %p942_p2, %p941_p1 }
 0x1d1   :  { %v706_v25 = vsel %vm702_vm9, %v1479_v18, %v701_v7  ;;  %v710_v2 = vsel %vm702_vm9, %v701_v7, %v1479_v18 }
 0x1d2   :  { %v742_v21 = vmul.f32 %v734_v55, %v706_v25  ;;  %v743_v38 = vmul.f32 %v735_v15, %v710_v2  ;;  %v755_v11 = vadd.f32 %v747_v16, %v746_v0  ;;  %p944_p4 = pnand %p943_p3, %p937_p0 }
 0x1d4   :  { %756 = vadd.xlane.f32.xlu1 %v755_v11  ;;  %v750_v47 = vadd.f32 %v742_v21, %v684_v49  ;;  %v751_v12 = vadd.f32 %v743_v38, %v685_v5 }
 0x1d6   :  { %v761_v63 = vadd.f32 %v751_v12, %v750_v47 }
 0x1d8   :  { %762 = vadd.xlane.f32.xlu0 %v761_v63 }
 0x252   :  { %v754_v1 = vpop.xlane.xlu0 %753 }
 0x256   :  { %v760_v46 = vpop.xlane.xlu0 %759 }
 0x257   :  { %v764_v37 = vadd.f32 %v760_v46, %v754_v1 }
 0x259   :  { %v766_v4 = vmul.f32 0.001953125, %v764_v37 }
 0x25b   :  { %v768_v58 = vsub.f32 %v744_v50, %v766_v4  ;;  %v769_v52 = vsub.f32 %v745_v26, %v766_v4  ;;  %v772_v17 = vsub.f32 %v748_v33, %v766_v4  ;;  %v773_v28 = vsub.f32 %v749_v34, %v766_v4 }
 0x25d   :  { %v776_v54 = vmul.f32 %v768_v58, %v768_v58  ;;  %v777_v13 = vmul.f32 %v769_v52, %v769_v52  ;;  %v780_v18 = vmul.f32 %v772_v17, %v772_v17  ;;  %v781_v39 = vmul.f32 %v773_v28, %v773_v28 }
 0x25f   :  { %v784_v60 = vadd.f32 %v777_v13, %v776_v54  ;;  %v790_v22 = vadd.f32 %v781_v39, %v780_v18 }
 0x261   :  { %785 = vadd.xlane.f32.xlu1 %v784_v60  ;;  %v757_v14 = vpop.xlane.xlu1 %756 }
 0x265   :  { %791 = vadd.xlane.f32.xlu1 %v790_v22  ;;  %v763_v40 = vpop.xlane.xlu0 %762 }
 0x266   :  { %v765_v23 = vadd.f32 %v763_v40, %v757_v14 }
 0x268   :  { %v767_v27 = vmul.f32 0.001953125, %v765_v23 }
 0x26a   :  { %v770_v8 = vsub.f32 %v746_v0, %v767_v27  ;;  %v771_v48 = vsub.f32 %v747_v16, %v767_v27  ;;  %v774_v30 = vsub.f32 %v750_v47, %v767_v27  ;;  %v775_v41 = vsub.f32 %v751_v12, %v767_v27 }
 0x26c   :  { %v778_v50 = vmul.f32 %v770_v8, %v770_v8  ;;  %v779_v26 = vmul.f32 %v771_v48, %v771_v48  ;;  %v782_v20 = vmul.f32 %v774_v30, %v774_v30  ;;  %v783_v44 = vmul.f32 %v775_v41, %v775_v41 }
 0x26e   :  { %v787_v56 = vadd.f32 %v779_v26, %v778_v50  ;;  %v793_v33 = vadd.f32 %v783_v44, %v782_v20 }
 0x270   :  { %788 = vadd.xlane.f32.xlu0 %v787_v56 }
 0x274   :  { %794 = vadd.xlane.f32.xlu0 %v793_v33 }
 0x2ee   :  { %v786_v34 = vpop.xlane.xlu1 %785 }
 0x2f2   :  { %v792_v3 = vpop.xlane.xlu1 %791 }
 0x2f3   :  { %v796_v43 = vadd.f32 %v792_v3, %v786_v34 }
 0x2f5   :  { %v798_v57 = vmul.f32 0.001953125, %v796_v43 }
 0x2f7   :  { %v802_v61 = vadd.f32 1e-05, %v798_v57 }
 0x2f9   :  { %932 = vrsqrt.f32 %v802_v61 }
 0x2fd   :  { %v789_v42 = vpop.xlane.xlu0 %788 }
 0x301   :  { %v795_v29 = vpop.xlane.xlu0 %794 }
 0x302   :  { %v797_v51 = vadd.f32 %v795_v29, %v789_v42 }
 0x303   :  { %v933_v45 = vpop.eup %932 }
 0x304   :  { %v799_v31 = vmul.f32 0.001953125, %v797_v51  ;;  %v806_v6 = vmul.f32 %v933_v45, %v800_v62 }
 0x306   :  { %v803_v9 = vadd.f32 1e-05, %v799_v31  ;;  %812 = vperm.xlu1 %929, %v806_v6  }
 0x308   :  { %934 = vrsqrt.f32 %v803_v9 }
 0x30a   :  { %830 = vperm.xlu1 %929, %v808_v10  }
 0x30e   :  { %835 = vperm.xlu1 %929, %v809_v59  }
 0x312   :  { %v935_v55 = vpop.eup %934 }
 0x313   :  { %v807_v15 = vmul.f32 %v935_v55, %v801_v36 }
 0x315   :  { %817 = vperm.xlu0 %928, %v807_v15  }
 0x385   :  { %v813_v49 = vpop.permute.xlu1 %812 }
 0x386   :  { %v820_v5 = vmul.f32 %v813_v49, %v768_v58  ;;  %v821_v53 = vmul.f32 %v813_v49, %v769_v52  ;;  %v824_v35 = vmul.f32 %v813_v49, %v772_v17  ;;  %v825_v32 = vmul.f32 %v813_v49, %v773_v28 }
 0x389   :  { %v831_v24 = vpop.permute.xlu1 %830 }
 0x38a   :  { %v838_v19 = vadd.f32 %v831_v24, %v820_v5  ;;  %v839_v7 = vadd.f32 %v831_v24, %v821_v53  ;;  %v842_v0 = vadd.f32 %v831_v24, %v824_v35  ;;  %v843_v16 = vadd.f32 %v831_v24, %v825_v32 }
 0x38c   :  { %v846_v25 = vmax.f32 %v838_v19, 0.0  ;;  %v847_v2 = vmax.f32 %v839_v7, 0.0  ;;  %v850_v21 = vmax.f32 %v842_v0, 0.0  ;;  %v851_v38 = vmax.f32 %v843_v16, 0.0 }
 0x38d   :  { %v836_v46 = vpop.permute.xlu1 %835 }
 0x38e   :  { %854 = vst [vmem:[#allocation2] sm:$0xff] %v846_v25  ;;  %855 = vst [vmem:[#allocation2 + $0x8] sm:$0xff] %v847_v2 }
 0x38f   :  { %858 = vst [vmem:[#allocation2 + $0x20] sm:$0xff] %v850_v21  ;;  %859 = vst [vmem:[#allocation2 + $0x28] sm:$0xff] %v851_v38 }
 0x394   :  { %v818_v11 = vpop.permute.xlu0 %817 }
 0x395   :  { %v822_v47 = vmul.f32 %v818_v11, %v770_v8  ;;  %v823_v12 = vmul.f32 %v818_v11, %v771_v48  ;;  %v826_v63 = vmul.f32 %v818_v11, %v774_v30  ;;  %v827_v1 = vmul.f32 %v818_v11, %v775_v41 }
 0x397   :  { %v840_v37 = vadd.f32 %v836_v46, %v822_v47  ;;  %v841_v4 = vadd.f32 %v836_v46, %v823_v12  ;;  %v844_v58 = vadd.f32 %v836_v46, %v826_v63  ;;  %v845_v52 = vadd.f32 %v836_v46, %v827_v1 }
 0x399   :  { %v848_v17 = vmax.f32 %v840_v37, 0.0  ;;  %v849_v28 = vmax.f32 %v841_v4, 0.0  ;;  %v852_v54 = vmax.f32 %v844_v58, 0.0  ;;  %v853_v13 = vmax.f32 %v845_v52, 0.0 }
 0x39b   :  { %856 = vst [vmem:[#allocation2 + $0x10] sm:$0xff] %v848_v17  ;;  %857 = vst [vmem:[#allocation2 + $0x18] sm:$0xff] %v849_v28 }
 0x39c   :  { %860 = vst [vmem:[#allocation2 + $0x30] sm:$0xff] %v852_v54  ;;  %861 = vst [vmem:[#allocation2 + $0x38] sm:$0xff] %v853_v13 }
 0x39d   :  { %947 = shalt.err (!%p944_p4)
}
 0x39e   :  { %s948_s14 = scalar_lea.hbm %s1670_s6, 1024 }
 0x39f   :  { %p949_p5 = scmp.ne.s32.totalorder %s1670_s6, %s948_s14  ;;  %p952_p6 = scmp.lt.u32.totalorder %s948_s14, %s1670_s6 }
 0x3a1   :  { %p954_p7 = pnand %p952_p6, %p949_p5 }
 0x3a3   :  { %957 = shalt.err (!%p954_p7)
}
 0x3a4   :  { %s979_s19 = smov 256  }
 0x3a5   :  { %873 = dma.vmem_to_hbm [thread:$0]  %s868_s5, 1024, %s1670_s6, [#allocation3], %s979_s19, %s979_s19, %s970_s1  }
 0x3a6   :  { %958 = dma.done.wait [#allocation3], 1024  }
 0x3a7   :  { %959 = vsyncadd [#allocation3], 4294966272 }
 0x3a8   :  { %877 = vsyncpa [#allocation3], 1 }

// kernel: tpu_custom_call.1
= control target key start
LH: loop header
LB: loop body
LE: loop exit
PB: predicated region body
PF: predicated region fallthrough
CT: control target
= control target key end

     0   :  { %v1025_v1 = vmov 2   ;;  %v1026_v2 = vmov 1   ;;  %s1572_s0 = inlined_call_operand.vmem [shape: f32[2,4,256], index: 0, kind: input, shape index: {}]   ;;  %s1573_s1 = inlined_call_operand.vmem [shape: f32[16,4], index: 1, kind: input, shape index: {}]   ;;  %s1574_s2 = inlined_call_operand.vmem [shape: f32[16,9], index: 2, kind: input, shape index: {}]   ;;  %s1575_s3 = inlined_call_operand.vmem [shape: f32[9,256], index: 3, kind: input, shape index: {}]   ;;  %s1576_s4 = inlined_call_operand.vmem [shape: f32[16,1], index: 4, kind: input, shape index: {}]   ;;  %s1577_s5 = inlined_call_operand.vmem [shape: f32[16,1], index: 5, kind: input, shape index: {}]   ;;  %s1578_s6 = inlined_call_operand.hbm [shape: f32[2,16,256], index: 6, kind: output, shape index: {}]  }
   0x1   :  { %v24_v0 = vld [vmem:[%s1573_s1] sm:$0xff]  ;;  %976 = vset.pattern.permute.xlu0 %v1025_v1  ;;  %975 = vset.pattern.permute.xlu1 %v1026_v2 }
   0x2   :  { %99 = vperm.xlu0 %976, %v24_v0   ;;  %65 = vperm.xlu1 %975, %v24_v0  }
   0x3   :  { %11 = vsyncpa [#allocation3], 0  ;;  %v273_v3 = vld [vmem:[%s1574_s2] sm:$0xff]  ;;  %v25_v4 = vld [vmem:[%s1573_s1 + $0x8] sm:$0xff]  ;;  %v1027_v5 = vmov 4   ;;  %v1028_v7 = vmov 3   ;;  %v38_v19 = vlaneseq }
   0x4   :  { %v274_v6 = vld [vmem:[%s1574_s2 + $0x8] sm:$0xff]  ;;  %v1029_v8 = vmov 0   ;;  %v1030_v9 = vmov 5   ;;  %v1031_v10 = vmov 6   ;;  %v1032_v11 = vmov 7   ;;  %v26_v25 = vld [vmem:[%s1572_s0] sm:$0xff] }
   0x5   :  { %v1033_v12 = vmov 8   ;;  %v1106_v21 = vshrl.u32 %v38_v19, 7  ;;  %v1126_v29 = vld [vmem:[%s1572_s0 + $0x8] sm:$0xff]  ;;  %s1034_s0 = smov 17   ;;  %s1035_s7 = smov 16  }
   0x6   :  { %980 = vset.pattern.permute.xlu0 %v1027_v5  ;;  %69 = vperm.xlu1 %975, %v25_v4   ;;  %s1036_s8 = smov 15   ;;  %s1037_s9 = smov 1  }
   0x7   :  { %277 = vperm.xlu0 %980, %v273_v3   ;;  %v108_v23 = vsub.s32 2, %v1106_v21  ;;  %v1117_v26 = vsub.s32 0, %v1106_v21  ;;  %v1120_v27 = vsub.s32 1, %v1106_v21  ;;  %v44_v28 = vsub.s32 4, %v1106_v21  ;;  %s1038_s10 = smov 127   ;;  %s1039_s11 = smov 113  }
   0x8   :  { %v1129_v30 = vsub.s32 3, %v1106_v21  ;;  %v78_v31 = vsub.s32 5, %v1106_v21  ;;  %v112_v38 = vsub.s32 6, %v1106_v21  ;;  %v146_v54 = vsub.s32 7, %v1106_v21  ;;  %s1040_s12 = smov 112   ;;  %s1041_s13 = smov 111  }
   0x9   :  { %v75_v33 = vrot.slane %v26_v25, %v1120_v27  ;;  %v198_v34 = vrot.slane %v1126_v29, %v1120_v27  ;;  %v41_v35 = vrot.slane %v26_v25, %v1117_v26  ;;  %v172_v36 = vrot.slane %v1126_v29, %v1117_v26 }
   0xa   :  { %977 = vset.pattern.permute.xlu1 %v1025_v1  ;;  %v109_v37 = vrot.slane %v26_v25, %v108_v23  ;;  %v224_v39 = vrot.slane %v1126_v29, %v108_v23  ;;  %v45_v41 = vrot.slane %v26_v25, %v44_v28  ;;  %v143_v42 = vrot.slane %v26_v25, %v1129_v30 }
   0xb   :  { %983 = vset.pattern.permute.xlu0 %v1026_v2  ;;  %103 = vperm.xlu1 %977, %v25_v4   ;;  %v79_v43 = vrot.slane %v26_v25, %v78_v31  ;;  %v85_v45 = vrot.slane %v75_v33, %v1120_v27  ;;  %v208_v46 = vrot.slane %v198_v34, %v1120_v27 }
   0xc   :  { %392 = vperm.xlu0 %983, %v274_v6   ;;  %v51_v47 = vrot.slane %v41_v35, %v1117_v26  ;;  %v182_v48 = vrot.slane %v172_v36, %v1117_v26  ;;  %v113_v49 = vrot.slane %v26_v25, %v112_v38  ;;  %v119_v50 = vrot.slane %v109_v37, %v108_v23 }
   0xd   :  { %v176_v51 = vrot.slane %v1126_v29, %v44_v28  ;;  %v228_v52 = vrot.slane %v1126_v29, %v112_v38  ;;  %v234_v53 = vrot.slane %v224_v39, %v108_v23  ;;  %v55_v55 = vrot.slane %v45_v41, %v1117_v26 }
   0xe   :  { %v153_v56 = vrot.slane %v143_v42, %v1129_v30  ;;  %v250_v57 = vrot.slane %v1126_v29, %v1129_v30  ;;  %v89_v58 = vrot.slane %v79_v43, %v1120_v27  ;;  %v202_v59 = vrot.slane %v1126_v29, %v78_v31 }
   0xf   :  { %978 = vset.pattern.permute.xlu1 %v1028_v7 }
  0x10   :  { %984 = vset.pattern.permute.xlu0 %v1028_v7  ;;  %133 = vperm.xlu1 %978, %v24_v0  }
  0x11   :  { %137 = vperm.xlu0 %984, %v25_v4  }
  0x14   :  { %979 = vset.pattern.permute.xlu1 %v1029_v8 }
  0x15   :  { %520 = vperm.xlu0 %984, %v273_v3   ;;  %322 = vperm.xlu1 %979, %v273_v3  }
  0x19   :  { %988 = vset.pattern.permute.xlu0 %v1030_v9  ;;  %326 = vperm.xlu1 %979, %v274_v6  }
  0x1a   :  { %590 = vperm.xlu0 %988, %v274_v6  }
  0x1d   :  { %981 = vset.pattern.permute.xlu1 %v1027_v5 }
  0x1e   :  { %989 = vset.pattern.permute.xlu0 %v1031_v10  ;;  %282 = vperm.xlu1 %981, %v274_v6  }
  0x1f   :  { %652 = vperm.xlu0 %989, %v273_v3  }
  0x22   :  { %982 = vset.pattern.permute.xlu1 %v1026_v2 }
  0x23   :  { %992 = vset.pattern.permute.xlu0 %v1032_v11  ;;  %388 = vperm.xlu1 %982, %v273_v3  }
  0x24   :  { %722 = vperm.xlu0 %992, %v274_v6  }
  0x27   :  { %985 = vset.pattern.permute.xlu1 %v1025_v1  ;;  %v123_v1 = vrot.slane %v113_v49, %v108_v23 }
  0x28   :  { %993 = vset.pattern.permute.xlu0 %v1033_v12  ;;  %454 = vperm.xlu1 %985, %v273_v3  }
  0x29   :  { %784 = vperm.xlu0 %993, %v273_v3  }
  0x2c   :  { %458 = vperm.xlu1 %985, %v274_v6  }
  0x2d   :  { %994 = vset.pattern.permute.xlu0 %v1029_v8 }
  0x2e   :  { %29 = vperm.xlu0 %994, %v24_v0  }
  0x30   :  { %986 = vset.pattern.permute.xlu1 %v1028_v7 }
  0x31   :  { %524 = vperm.xlu1 %986, %v274_v6  }
  0x32   :  { %34 = vperm.xlu0 %994, %v25_v4  }
  0x35   :  { %987 = vset.pattern.permute.xlu1 %v1030_v9  ;;  %v238_v9 = vrot.slane %v228_v52, %v108_v23 }
  0x36   :  { %586 = vperm.xlu1 %987, %v273_v3  }
  0x3a   :  { %990 = vset.pattern.permute.xlu1 %v1031_v10  ;;  %v147_v10 = vrot.slane %v26_v25, %v146_v54 }
  0x3b   :  { %656 = vperm.xlu1 %990, %v274_v6  }
  0x3f   :  { %991 = vset.pattern.permute.xlu1 %v1032_v11  ;;  %v260_v11 = vrot.slane %v250_v57, %v1129_v30  ;;  %v254_v57 = vrot.slane %v1126_v29, %v146_v54 }
  0x40   :  { %718 = vperm.xlu1 %991, %v273_v3   ;;  %v186_v3 = vrot.slane %v176_v51, %v1117_v26 }
  0x44   :  { %995 = vset.pattern.permute.xlu1 %v1033_v12  ;;  %v212_v12 = vrot.slane %v202_v59, %v1120_v27 }
  0x45   :  { %788 = vperm.xlu1 %995, %v274_v6  }
  0x49   :  { %996 = vset.pattern.permute.xlu1 %v1029_v8 }
  0x81   :  { %v1091_v13 = vpop.permute.xlu0 %99  ;;  %v1108_v22 = vpop.permute.xlu1 %65 }
  0x82   :  { %v90_v61 = vmul.f32 %v85_v45, %v1108_v22  ;;  %v213_v62 = vmul.f32 %v208_v46, %v1108_v22  ;;  %v124_v2 = vmul.f32 %v119_v50, %v1091_v13  ;;  %v239_v28 = vmul.f32 %v234_v53, %v1091_v13 }
  0x83   :  { %v91_v31 = vmul.f32 %v89_v58, %v1108_v22  ;;  %v125_v52 = vmul.f32 %v123_v1, %v1091_v13 }
  0x85   :  { %v1132_v32 = vpop.permute.xlu1 %69 }
  0x86   :  { %v1093_v14 = vpop.permute.xlu0 %277  ;;  %v92_v33 = vmul.f32 %v85_v45, %v1132_v32  ;;  %v215_v35 = vmul.f32 %v208_v46, %v1132_v32  ;;  %v157_v45 = vrot.slane %v147_v10, %v1129_v30  ;;  %v214_v46 = vmul.f32 %v212_v12, %v1108_v22 }
  0x8a   :  { %v1145_v44 = vpop.permute.xlu1 %103 }
  0x8b   :  { %v1095_v15 = vpop.permute.xlu0 %392  ;;  %v126_v42 = vmul.f32 %v119_v50, %v1145_v44  ;;  %v241_v50 = vmul.f32 %v234_v53, %v1145_v44 }
  0x8f   :  { %v134_v4 = vpop.permute.xlu1 %133 }
  0x90   :  { %v1097_v16 = vpop.permute.xlu0 %137  ;;  %v158_v8 = vmul.f32 %v153_v56, %v134_v4  ;;  %v265_v36 = vmul.f32 %v260_v11, %v134_v4 }
  0x91   :  { %v267_v53 = vmul.f32 %v260_v11, %v1097_v16 }
  0x94   :  { %v1099_v17 = vpop.permute.xlu0 %520 }
  0x99   :  { %v1101_v18 = vpop.permute.xlu0 %590 }
  0x9e   :  { %v1103_v20 = vpop.permute.xlu0 %652 }
  0xa3   :  { %v1111_v24 = vpop.permute.xlu0 %722 }
  0xa8   :  { %v1142_v40 = vpop.permute.xlu0 %784 }
  0xad   :  { %v30_v60 = vpop.permute.xlu0 %29 }
  0xae   :  { %v56_v63 = vmul.f32 %v51_v47, %v30_v60  ;;  %v187_v0 = vmul.f32 %v182_v48, %v30_v60  ;;  %v57_v5 = vmul.f32 %v55_v55, %v30_v60  ;;  %v188_v23 = vmul.f32 %v186_v3, %v30_v60 }
  0xb0   :  { %v94_v6 = vadd.f32 %v90_v61, %v56_v63  ;;  %v217_v7 = vadd.f32 %v213_v62, %v187_v0  ;;  %v95_v39 = vadd.f32 %v91_v31, %v57_v5  ;;  %v218_v60 = vadd.f32 %v214_v46, %v188_v23 }
  0xb1   :  { %v35_v21 = vpop.permute.xlu0 %34  ;;  %v159_v61 = vmul.f32 %v157_v45, %v134_v4  ;;  %v240_v0 = vmul.f32 %v238_v9, %v1091_v13  ;;  %v1301_v23 = vand.u32 127, %v38_v19 }
  0xb2   :  { %v128_v34 = vadd.f32 %v124_v2, %v94_v6  ;;  %v58_v37 = vmul.f32 %v51_v47, %v35_v21  ;;  %v189_v38 = vmul.f32 %v182_v48, %v35_v21  ;;  %v243_v25 = vadd.f32 %v239_v28, %v217_v7 }
  0xb3   :  { %v59_v43 = vmul.f32 %v55_v55, %v35_v21  ;;  %v160_v47 = vmul.f32 %v153_v56, %v1097_v16  ;;  %v93_v48 = vmul.f32 %v89_v58, %v1132_v32  ;;  %v129_v59 = vadd.f32 %v125_v52, %v95_v39  ;;  %v320_v39 = vld [vmem:[%s1575_s3] ss:$8 sm:$0x3] }
  0xb4   :  { %v1170_v41 = vadd.f32 %v158_v8, %v128_v34  ;;  %v96_v49 = vadd.f32 %v92_v33, %v58_v37  ;;  %v219_v51 = vadd.f32 %v215_v35, %v189_v38  ;;  %v1182_v62 = vadd.f32 %v265_v36, %v243_v25 }
  0xb5   :  { %v97_v63 = vadd.f32 %v93_v48, %v59_v43  ;;  %v190_v22 = vmul.f32 %v186_v3, %v35_v21  ;;  %v264_v2 = vrot.slane %v254_v57, %v1129_v30  ;;  %v216_v56 = vmul.f32 %v212_v12, %v1132_v32 }
  0xb6   :  { %293 = vrot.lane.b32.xlu1 %v1170_v41, %s1034_s0  ;;  %v130_v55 = vadd.f32 %v126_v42, %v96_v49  ;;  %v245_v54 = vadd.f32 %v241_v50, %v219_v51  ;;  %v127_v58 = vmul.f32 %v123_v1, %v1145_v44  ;;  %v244_v5 = vadd.f32 %v240_v0, %v218_v60 }
  0xb7   :  { %v1195_v6 = vadd.f32 %v159_v61, %v129_v59  ;;  %v266_v3 = vmul.f32 %v264_v2, %v134_v4  ;;  %v220_v13 = vadd.f32 %v216_v56, %v190_v22  ;;  %v161_v30 = vmul.f32 %v157_v45, %v1097_v16 }
  0xb8   :  { %v1184_v29 = vadd.f32 %v160_v47, %v130_v55  ;;  %v131_v7 = vadd.f32 %v127_v58, %v97_v63  ;;  %v1197_v8 = vadd.f32 %v267_v53, %v245_v54  ;;  %v242_v32 = vmul.f32 %v238_v9, %v1145_v44 }
  0xb9   :  { %v1205_v1 = vadd.f32 %v266_v3, %v244_v5  ;;  %v268_v4 = vmul.f32 %v264_v2, %v1097_v16  ;;  %v323_v16 = vpop.permute.xlu1 %322  ;;  %v333_v25 = vrot.slane %v320_v39, %v1117_v26  ;;  %v337_v42 = vrot.slane %v320_v39, %v1120_v27 }
  0xba   :  { %297 = vrot.lane.b32.xlu1 %v1182_v62, %s1034_s0  ;;  %295 = vrot.lane.b32.xlu0 %v1184_v29, %s1034_s0  ;;  %v1207_v10 = vadd.f32 %v161_v30, %v131_v7  ;;  %v246_v11 = vadd.f32 %v242_v32, %v220_v13  ;;  %vm311_vm0 = vcmp.lt.s32.totalorder %v1301_v23, 17  ;;  %v285_v47 = vmul.f32 %v1093_v14, %v1170_v41  ;;  %v949_v30 = vld [vmem:[%s1575_s3 + $0x1] ss:$8 sm:$0x3] }
  0xbb   :  { %v340_v19 = vmul.f32 %v333_v25, %v323_v16  ;;  %v341_v51 = vmul.f32 %v337_v42, %v323_v16  ;;  %v286_v48 = vmul.f32 %v1093_v14, %v1195_v6  ;;  %v289_v22 = vmul.f32 %v1093_v14, %v1182_v62 }
  0xbc   :  { %v1214_v12 = vadd.f32 %v268_v4, %v246_v11  ;;  %v290_v54 = vmul.f32 %v1093_v14, %v1205_v1  ;;  %v399_v16 = vrot.slane %v949_v30, %v1117_v26  ;;  %vm376_vm1 = vcmp.lt.s32.totalorder %v1301_v23, 16 }
  0xbd   :  { %v1247_v44 = vpop.permute.xlu1 %326  ;;  %vm442_vm2 = vcmp.lt.s32.totalorder %v1301_v23, 15  ;;  %vm508_vm3 = vcmp.lt.s32.totalorder %v1301_v23, 1  ;;  %vm574_vm4 = vcmp.lt.s32.totalorder %v1301_v23, 127  ;;  %vm640_vm5 = vcmp.lt.s32.totalorder %v1301_v23, 113 }
  0xbe   :  { %301 = vrot.lane.b32.xlu1 %v1195_v6, %s1034_s0  ;;  %299 = vrot.lane.b32.xlu0 %v1197_v8, %s1034_s0  ;;  %v343_v4 = vmul.f32 %v337_v42, %v1247_v44  ;;  %vm706_vm6 = vcmp.lt.s32.totalorder %v1301_v23, 112  ;;  %vm772_vm7 = vcmp.lt.s32.totalorder %v1301_v23, 111 }
  0xc1   :  { %v1251_v9 = vpop.permute.xlu1 %282 }
  0xc2   :  { %305 = vrot.lane.b32.xlu1 %v1205_v1, %s1034_s0  ;;  %303 = vrot.lane.b32.xlu0 %v1207_v10, %s1034_s0 }
  0xc5   :  { %v1256_v21 = vpop.permute.xlu1 %388 }
  0xc6   :  { %360 = vrot.lane.b32.xlu1 %v1170_v41, %s1035_s7  ;;  %307 = vrot.lane.b32.xlu0 %v1214_v12, %s1034_s0 }
  0xc9   :  { %v1261_v28 = vpop.permute.xlu1 %454 }
  0xca   :  { %362 = vrot.lane.b32.xlu1 %v1184_v29, %s1035_s7  ;;  %364 = vrot.lane.b32.xlu0 %v1182_v62, %s1035_s7 }
  0xcd   :  { %v1266_v31 = vpop.permute.xlu1 %458 }
  0xce   :  { %366 = vrot.lane.b32.xlu1 %v1197_v8, %s1035_s7  ;;  %368 = vrot.lane.b32.xlu0 %v1195_v6, %s1035_s7 }
  0xd1   :  { %v1270_v33 = vpop.permute.xlu1 %524 }
  0xd2   :  { %370 = vrot.lane.b32.xlu1 %v1207_v10, %s1035_s7  ;;  %372 = vrot.lane.b32.xlu0 %v1205_v1, %s1035_s7 }
  0xd5   :  { %v1275_v34 = vpop.permute.xlu1 %586 }
  0xd6   :  { %374 = vrot.lane.b32.xlu1 %v1214_v12, %s1035_s7  ;;  %428 = vrot.lane.b32.xlu0 %v1184_v29, %s1036_s8 }
  0xd9   :  { %v1280_v35 = vpop.permute.xlu1 %656 }
  0xda   :  { %426 = vrot.lane.b32.xlu1 %v1170_v41, %s1036_s8  ;;  %432 = vrot.lane.b32.xlu0 %v1197_v8, %s1036_s8 }
  0xdd   :  { %v1285_v36 = vpop.permute.xlu1 %718 }
  0xde   :  { %430 = vrot.lane.b32.xlu1 %v1182_v62, %s1036_s8  ;;  %436 = vrot.lane.b32.xlu0 %v1207_v10, %s1036_s8 }
  0xe1   :  { %v1290_v37 = vpop.permute.xlu1 %788 }
  0xe2   :  { %434 = vrot.lane.b32.xlu1 %v1195_v6, %s1036_s8  ;;  %440 = vrot.lane.b32.xlu0 %v1214_v12, %s1036_s8 }
  0xe6   :  { %438 = vrot.lane.b32.xlu1 %v1205_v1, %s1036_s8  ;;  %496 = vrot.lane.b32.xlu0 %v1182_v62, %s1037_s9 }
  0xea   :  { %492 = vrot.lane.b32.xlu1 %v1170_v41, %s1037_s9  ;;  %500 = vrot.lane.b32.xlu0 %v1195_v6, %s1037_s9 }
  0xee   :  { %494 = vrot.lane.b32.xlu1 %v1184_v29, %s1037_s9  ;;  %504 = vrot.lane.b32.xlu0 %v1205_v1, %s1037_s9 }
  0xf2   :  { %498 = vrot.lane.b32.xlu1 %v1197_v8, %s1037_s9  ;;  %560 = vrot.lane.b32.xlu0 %v1184_v29, %s1038_s10 }
  0xf6   :  { %502 = vrot.lane.b32.xlu1 %v1207_v10, %s1037_s9  ;;  %564 = vrot.lane.b32.xlu0 %v1197_v8, %s1038_s10 }
  0xfa   :  { %506 = vrot.lane.b32.xlu1 %v1214_v12, %s1037_s9  ;;  %568 = vrot.lane.b32.xlu0 %v1207_v10, %s1038_s10 }
  0xfe   :  { %558 = vrot.lane.b32.xlu1 %v1170_v41, %s1038_s10  ;;  %572 = vrot.lane.b32.xlu0 %v1214_v12, %s1038_s10 }
 0x102   :  { %562 = vrot.lane.b32.xlu1 %v1182_v62, %s1038_s10  ;;  %626 = vrot.lane.b32.xlu0 %v1184_v29, %s1039_s11 }
 0x106   :  { %566 = vrot.lane.b32.xlu1 %v1195_v6, %s1038_s10  ;;  %630 = vrot.lane.b32.xlu0 %v1197_v8, %s1039_s11 }
 0x10a   :  { %570 = vrot.lane.b32.xlu1 %v1205_v1, %s1038_s10  ;;  %634 = vrot.lane.b32.xlu0 %v1207_v10, %s1039_s11 }
 0x10e   :  { %624 = vrot.lane.b32.xlu1 %v1170_v41, %s1039_s11  ;;  %638 = vrot.lane.b32.xlu0 %v1214_v12, %s1039_s11 }
 0x112   :  { %628 = vrot.lane.b32.xlu1 %v1182_v62, %s1039_s11  ;;  %692 = vrot.lane.b32.xlu0 %v1184_v29, %s1040_s12 }
 0x116   :  { %632 = vrot.lane.b32.xlu1 %v1195_v6, %s1039_s11  ;;  %696 = vrot.lane.b32.xlu0 %v1197_v8, %s1040_s12 }
 0x11a   :  { %636 = vrot.lane.b32.xlu1 %v1205_v1, %s1039_s11  ;;  %700 = vrot.lane.b32.xlu0 %v1207_v10, %s1040_s12 }
 0x11e   :  { %690 = vrot.lane.b32.xlu1 %v1170_v41, %s1040_s12  ;;  %704 = vrot.lane.b32.xlu0 %v1214_v12, %s1040_s12 }
 0x122   :  { %694 = vrot.lane.b32.xlu1 %v1182_v62, %s1040_s12  ;;  %758 = vrot.lane.b32.xlu0 %v1184_v29, %s1041_s13 }
 0x126   :  { %698 = vrot.lane.b32.xlu1 %v1195_v6, %s1040_s12  ;;  %762 = vrot.lane.b32.xlu0 %v1197_v8, %s1041_s13 }
 0x128   :  { %v294_v38 = vpop.permute.xlu1 %293 }
 0x12a   :  { %702 = vrot.lane.b32.xlu1 %v1205_v1, %s1040_s12  ;;  %766 = vrot.lane.b32.xlu0 %v1207_v10, %s1041_s13 }
 0x12c   :  { %v298_v43 = vpop.permute.xlu1 %297  ;;  %v296_v49 = vpop.permute.xlu0 %295 }
 0x12e   :  { %756 = vrot.lane.b32.xlu1 %v1170_v41, %s1041_s13  ;;  %770 = vrot.lane.b32.xlu0 %v1214_v12, %s1041_s13 }
 0x130   :  { %v302_v52 = vpop.permute.xlu1 %301  ;;  %v300_v45 = vpop.permute.xlu0 %299 }
 0x131   :  { %v312_v57 = vsel %vm311_vm0, %v294_v38, %v302_v52  ;;  %v316_v46 = vsel %vm311_vm0, %v302_v52, %v294_v38  ;;  %v403_v38 = vrot.slane %v949_v30, %v1120_v27  ;;  %v287_v52 = vmul.f32 %v1251_v9, %v1184_v29 }
 0x132   :  { %v344_v50 = vmul.f32 %v340_v19, %v316_v46  ;;  %v345_v55 = vmul.f32 %v341_v51, %v312_v57  ;;  %760 = vrot.lane.b32.xlu1 %v1182_v62, %s1041_s13 }
 0x133   :  { %v409_v57 = vmul.f32 %v403_v38, %v1095_v15 }
 0x134   :  { %v352_v59 = vadd.f32 %v344_v50, %v285_v47  ;;  %v353_v60 = vadd.f32 %v345_v55, %v286_v48  ;;  %v306_v61 = vpop.permute.xlu1 %305  ;;  %v304_v63 = vpop.permute.xlu0 %303 }
 0x135   :  { %v314_v41 = vsel %vm311_vm0, %v298_v43, %v306_v61  ;;  %v318_v0 = vsel %vm311_vm0, %v306_v61, %v298_v43  ;;  %v313_v2 = vsel %vm311_vm0, %v296_v49, %v304_v63  ;;  %v317_v53 = vsel %vm311_vm0, %v304_v63, %v296_v49 }
 0x136   :  { %v348_v56 = vmul.f32 %v340_v19, %v318_v0  ;;  %v349_v58 = vmul.f32 %v341_v51, %v314_v41  ;;  %764 = vrot.lane.b32.xlu1 %v1195_v6, %s1041_s13  ;;  %v342_v6 = vmul.f32 %v333_v25, %v1247_v44  ;;  %v347_v43 = vmul.f32 %v343_v4, %v313_v2 }
 0x137   :  { %v407_v19 = vmul.f32 %v403_v38, %v1256_v21  ;;  %v288_v44 = vmul.f32 %v1251_v9, %v1207_v10 }
 0x138   :  { %v356_v62 = vadd.f32 %v348_v56, %v289_v22  ;;  %v357_v5 = vadd.f32 %v349_v58, %v290_v54  ;;  %v361_v14 = vpop.permute.xlu1 %360  ;;  %v308_v3 = vpop.permute.xlu0 %307  ;;  %v346_v39 = vmul.f32 %v342_v6, %v317_v53 }
 0x139   :  { %v315_v7 = vsel %vm311_vm0, %v300_v45, %v308_v3  ;;  %v319_v13 = vsel %vm311_vm0, %v308_v3, %v300_v45  ;;  %v408_v45 = vmul.f32 %v399_v16, %v1095_v15  ;;  %v355_v48 = vadd.f32 %v347_v43, %v288_v44 }
 0x13a   :  { %768 = vrot.lane.b32.xlu1 %v1205_v1, %s1041_s13  ;;  %v406_v1 = vmul.f32 %v399_v16, %v1256_v21  ;;  %v354_v21 = vadd.f32 %v346_v39, %v287_v52  ;;  %v350_v50 = vmul.f32 %v342_v6, %v319_v13  ;;  %v351_v55 = vmul.f32 %v343_v4, %v315_v7  ;;  %v950_v6 = vld [vmem:[%s1575_s3 + $0x2] ss:$8 sm:$0x3] }
 0x13c   :  { %v363_v32 = vpop.permute.xlu1 %362  ;;  %v365_v11 = vpop.permute.xlu0 %364 }
 0x140   :  { %v367_v49 = vpop.permute.xlu1 %366  ;;  %v369_v51 = vpop.permute.xlu0 %368 }
 0x141   :  { %v377_v25 = vsel %vm376_vm1, %v361_v14, %v369_v51  ;;  %v381_v42 = vsel %vm376_vm1, %v369_v51, %v361_v14 }
 0x142   :  { %v410_v46 = vmul.f32 %v406_v1, %v381_v42  ;;  %v411_v47 = vmul.f32 %v407_v19, %v377_v25 }
 0x144   :  { %v371_v29 = vpop.permute.xlu1 %370  ;;  %v418_v61 = vadd.f32 %v410_v46, %v352_v59  ;;  %v419_v63 = vadd.f32 %v411_v47, %v353_v60  ;;  %v373_v10 = vpop.permute.xlu0 %372  ;;  %v291_v59 = vmul.f32 %v1251_v9, %v1197_v8  ;;  %v292_v60 = vmul.f32 %v1251_v9, %v1214_v12  ;;  %v951_v47 = vld [vmem:[%s1575_s3 + $0x3] ss:$8 sm:$0x3] }
 0x145   :  { %v378_v22 = vsel %vm376_vm1, %v363_v32, %v371_v29  ;;  %v382_v54 = vsel %vm376_vm1, %v371_v29, %v363_v32  ;;  %v379_v41 = vsel %vm376_vm1, %v365_v11, %v373_v10  ;;  %v383_v15 = vsel %vm376_vm1, %v373_v10, %v365_v11 }
 0x146   :  { %v412_v0 = vmul.f32 %v408_v45, %v382_v54  ;;  %v413_v2 = vmul.f32 %v409_v57, %v378_v22  ;;  %v414_v53 = vmul.f32 %v406_v1, %v383_v15  ;;  %v415_v56 = vmul.f32 %v407_v19, %v379_v41 }
 0x147   :  { %v358_v8 = vadd.f32 %v350_v50, %v291_v59  ;;  %v359_v4 = vadd.f32 %v351_v55, %v292_v60  ;;  %v531_v15 = vrot.slane %v951_v47, %v1117_v26 }
 0x148   :  { %v420_v58 = vadd.f32 %v412_v0, %v354_v21  ;;  %v421_v14 = vadd.f32 %v413_v2, %v355_v48  ;;  %v375_v3 = vpop.permute.xlu1 %374  ;;  %v422_v7 = vadd.f32 %v414_v53, %v356_v62  ;;  %v423_v13 = vadd.f32 %v415_v56, %v357_v5  ;;  %v429_v30 = vpop.permute.xlu0 %428 }
 0x149   :  { %v380_v32 = vsel %vm376_vm1, %v367_v49, %v375_v3  ;;  %v384_v11 = vsel %vm376_vm1, %v375_v3, %v367_v49  ;;  %v465_v62 = vrot.slane %v950_v6, %v1117_v26  ;;  %v469_v5 = vrot.slane %v950_v6, %v1120_v27 }
 0x14a   :  { %v416_v16 = vmul.f32 %v408_v45, %v384_v11  ;;  %v417_v12 = vmul.f32 %v409_v57, %v380_v32  ;;  %v535_v0 = vrot.slane %v951_v47, %v1120_v27 }
 0x14b   :  { %v474_v49 = vmul.f32 %v465_v62, %v1266_v31  ;;  %v475_v19 = vmul.f32 %v469_v5, %v1266_v31  ;;  %v472_v45 = vmul.f32 %v465_v62, %v1261_v28  ;;  %v473_v57 = vmul.f32 %v469_v5, %v1261_v28 }
 0x14c   :  { %v424_v9 = vadd.f32 %v416_v16, %v358_v8  ;;  %v425_v38 = vadd.f32 %v417_v12, %v359_v4  ;;  %v427_v39 = vpop.permute.xlu1 %426  ;;  %v433_v43 = vpop.permute.xlu0 %432 }
 0x150   :  { %v431_v1 = vpop.permute.xlu1 %430  ;;  %v437_v51 = vpop.permute.xlu0 %436 }
 0x151   :  { %v444_v52 = vsel %vm442_vm2, %v429_v30, %v437_v51  ;;  %v448_v44 = vsel %vm442_vm2, %v437_v51, %v429_v30 }
 0x152   :  { %v478_v25 = vmul.f32 %v474_v49, %v448_v44  ;;  %v479_v42 = vmul.f32 %v475_v19, %v444_v52  ;;  %v952_v44 = vld [vmem:[%s1575_s3 + $0x5] ss:$8 sm:$0x3] }
 0x154   :  { %v435_v46 = vpop.permute.xlu1 %434  ;;  %v486_v21 = vadd.f32 %v478_v25, %v420_v58  ;;  %v487_v31 = vadd.f32 %v479_v42, %v421_v14  ;;  %v441_v48 = vpop.permute.xlu0 %440  ;;  %v540_v25 = vmul.f32 %v531_v15, %v1270_v33  ;;  %v541_v42 = vmul.f32 %v535_v0, %v1270_v33 }
 0x155   :  { %v443_v50 = vsel %vm442_vm2, %v427_v39, %v435_v46  ;;  %v447_v55 = vsel %vm442_vm2, %v435_v46, %v427_v39  ;;  %v446_v29 = vsel %vm442_vm2, %v433_v43, %v441_v48  ;;  %v450_v28 = vsel %vm442_vm2, %v441_v48, %v433_v43 }
 0x156   :  { %v476_v10 = vmul.f32 %v472_v45, %v447_v55  ;;  %v477_v22 = vmul.f32 %v473_v57, %v443_v50  ;;  %v482_v54 = vmul.f32 %v474_v49, %v450_v28  ;;  %v483_v41 = vmul.f32 %v475_v19, %v446_v29 }
 0x157   :  { %v601_v46 = vrot.slane %v952_v44, %v1120_v27 }
 0x158   :  { %v484_v2 = vadd.f32 %v476_v10, %v418_v61  ;;  %v485_v53 = vadd.f32 %v477_v22, %v419_v63  ;;  %v439_v56 = vpop.permute.xlu1 %438  ;;  %v490_v59 = vadd.f32 %v482_v54, %v424_v9  ;;  %v491_v60 = vadd.f32 %v483_v41, %v425_v38  ;;  %v497_v58 = vpop.permute.xlu0 %496 }
 0x159   :  { %v445_v14 = vsel %vm442_vm2, %v431_v1, %v439_v56  ;;  %v449_v3 = vsel %vm442_vm2, %v439_v56, %v431_v1  ;;  %v538_v61 = vmul.f32 %v531_v15, %v1099_v17  ;;  %v539_v63 = vmul.f32 %v535_v0, %v1099_v17 }
 0x15a   :  { %v480_v30 = vmul.f32 %v472_v45, %v449_v3  ;;  %v481_v32 = vmul.f32 %v473_v57, %v445_v14  ;;  %v597_v57 = vrot.slane %v952_v44, %v1117_v26  ;;  %v607_v54 = vmul.f32 %v601_v46, %v1101_v18 }
 0x15c   :  { %v488_v11 = vadd.f32 %v480_v30, %v422_v7  ;;  %v489_v6 = vadd.f32 %v481_v32, %v423_v13  ;;  %v493_v8 = vpop.permute.xlu1 %492  ;;  %v501_v4 = vpop.permute.xlu0 %500  ;;  %v606_v33 = vmul.f32 %v597_v57, %v1101_v18 }
 0x15d   :  { %v509_v16 = vsel %vm508_vm3, %v493_v8, %v501_v4  ;;  %v513_v12 = vsel %vm508_vm3, %v501_v4, %v493_v8 }
 0x15e   :  { %v542_v9 = vmul.f32 %v538_v61, %v513_v12  ;;  %v543_v38 = vmul.f32 %v539_v63, %v509_v16 }
 0x160   :  { %v495_v39 = vpop.permute.xlu1 %494  ;;  %v1417_v62 = vadd.f32 %v542_v9, %v484_v2  ;;  %v1419_v5 = vadd.f32 %v543_v38, %v485_v53  ;;  %v505_v7 = vpop.permute.xlu0 %504  ;;  %v605_v38 = vmul.f32 %v601_v46, %v1275_v34 }
 0x161   :  { %v511_v13 = vsel %vm508_vm3, %v497_v58, %v505_v7  ;;  %v515_v17 = vsel %vm508_vm3, %v505_v7, %v497_v58 }
 0x162   :  { %v546_v43 = vmul.f32 %v538_v61, %v515_v17  ;;  %v547_v1 = vmul.f32 %v539_v63, %v511_v13 }
 0x164   :  { %v499_v49 = vpop.permute.xlu1 %498  ;;  %v1425_v19 = vadd.f32 %v546_v43, %v488_v11  ;;  %v1427_v51 = vadd.f32 %v547_v1, %v489_v6  ;;  %v561_v52 = vpop.permute.xlu0 %560 }
 0x168   :  { %v503_v45 = vpop.permute.xlu1 %502  ;;  %v565_v47 = vpop.permute.xlu0 %564 }
 0x169   :  { %v510_v48 = vsel %vm508_vm3, %v495_v39, %v503_v45  ;;  %v514_v50 = vsel %vm508_vm3, %v503_v45, %v495_v39 }
 0x16a   :  { %v544_v55 = vmul.f32 %v540_v25, %v514_v50  ;;  %v545_v29 = vmul.f32 %v541_v42, %v510_v48 }
 0x16c   :  { %v552_v28 = vadd.f32 %v544_v55, %v486_v21  ;;  %v553_v10 = vadd.f32 %v545_v29, %v487_v31  ;;  %v507_v22 = vpop.permute.xlu1 %506  ;;  %v569_v41 = vpop.permute.xlu0 %568 }
 0x16d   :  { %v512_v15 = vsel %vm508_vm3, %v499_v49, %v507_v22  ;;  %v516_v0 = vsel %vm508_vm3, %v507_v22, %v499_v49  ;;  %v576_v2 = vsel %vm574_vm4, %v561_v52, %v569_v41  ;;  %v580_v53 = vsel %vm574_vm4, %v569_v41, %v561_v52 }
 0x16e   :  { %v548_v21 = vmul.f32 %v540_v25, %v516_v0  ;;  %v549_v31 = vmul.f32 %v541_v42, %v512_v15  ;;  %v610_v56 = vmul.f32 %v606_v33, %v576_v2  ;;  %v611_v58 = vmul.f32 %v607_v54, %v580_v53 }
 0x170   :  { %v556_v14 = vadd.f32 %v548_v21, %v490_v59  ;;  %v557_v3 = vadd.f32 %v549_v31, %v491_v60  ;;  %v559_v18 = vpop.permute.xlu1 %558  ;;  %v618_v30 = vadd.f32 %v610_v56, %v552_v28  ;;  %v619_v32 = vadd.f32 %v611_v58, %v553_v10  ;;  %v573_v11 = vpop.permute.xlu0 %572  ;;  %v953_v59 = vld [vmem:[%s1575_s3 + $0x6] ss:$8 sm:$0x3] }
 0x171   :  { %v578_v6 = vsel %vm574_vm4, %v565_v47, %v573_v11  ;;  %v582_v8 = vsel %vm574_vm4, %v573_v11, %v565_v47  ;;  %v604_v60 = vmul.f32 %v597_v57, %v1275_v34  ;;  %v663_v49 = vrot.slane %v953_v59, %v1117_v26 }
 0x172   :  { %v614_v61 = vmul.f32 %v606_v33, %v578_v6  ;;  %v615_v63 = vmul.f32 %v607_v54, %v582_v8  ;;  %v667_v52 = vrot.slane %v953_v59, %v1120_v27 }
 0x173   :  { %v672_v42 = vmul.f32 %v663_v49, %v1280_v35 }
 0x174   :  { %v563_v4 = vpop.permute.xlu1 %562  ;;  %v622_v16 = vadd.f32 %v614_v61, %v556_v14  ;;  %v623_v12 = vadd.f32 %v615_v63, %v557_v3  ;;  %v627_v9 = vpop.permute.xlu0 %626  ;;  %v673_v45 = vmul.f32 %v667_v52, %v1280_v35  ;;  %v671_v58 = vmul.f32 %v667_v52, %v1103_v20 }
 0x178   :  { %v567_v39 = vpop.permute.xlu1 %566  ;;  %v631_v7 = vpop.permute.xlu0 %630 }
 0x179   :  { %v575_v13 = vsel %vm574_vm4, %v559_v18, %v567_v39  ;;  %v579_v17 = vsel %vm574_vm4, %v567_v39, %v559_v18 }
 0x17a   :  { %v608_v43 = vmul.f32 %v604_v60, %v575_v13  ;;  %v609_v1 = vmul.f32 %v605_v38, %v579_v17 }
 0x17c   :  { %v616_v44 = vadd.f32 %v608_v43, %v1417_v62  ;;  %v617_v34 = vadd.f32 %v609_v1, %v1419_v5  ;;  %v571_v25 = vpop.permute.xlu1 %570  ;;  %v635_v57 = vpop.permute.xlu0 %634 }
 0x17d   :  { %v577_v46 = vsel %vm574_vm4, %v563_v4, %v571_v25  ;;  %v581_v47 = vsel %vm574_vm4, %v571_v25, %v563_v4  ;;  %v642_v48 = vsel %vm640_vm5, %v627_v9, %v635_v57  ;;  %v646_v62 = vsel %vm640_vm5, %v635_v57, %v627_v9 }
 0x17e   :  { %v612_v50 = vmul.f32 %v604_v60, %v577_v46  ;;  %v613_v5 = vmul.f32 %v605_v38, %v581_v47  ;;  %v676_v55 = vmul.f32 %v672_v42, %v642_v48  ;;  %v677_v29 = vmul.f32 %v673_v45, %v646_v62  ;;  %v955_v62 = vld [vmem:[%s1575_s3 + $0x10] ss:$8 sm:$0x3] }
 0x180   :  { %v620_v28 = vadd.f32 %v612_v50, %v1425_v19  ;;  %v621_v35 = vadd.f32 %v613_v5, %v1427_v51  ;;  %v625_v10 = vpop.permute.xlu1 %624  ;;  %v684_v22 = vadd.f32 %v676_v55, %v618_v30  ;;  %v685_v33 = vadd.f32 %v677_v29, %v619_v32  ;;  %v639_v54 = vpop.permute.xlu0 %638  ;;  %v954_v19 = vld [vmem:[%s1575_s3 + $0x7] ss:$8 sm:$0x3] }
 0x181   :  { %v644_v41 = vsel %vm640_vm5, %v631_v7, %v639_v54  ;;  %v648_v15 = vsel %vm640_vm5, %v639_v54, %v631_v7  ;;  %v670_v51 = vmul.f32 %v663_v49, %v1103_v20  ;;  %v729_v3 = vrot.slane %v954_v19, %v1117_v26 }
 0x182   :  { %v680_v0 = vmul.f32 %v672_v42, %v644_v41  ;;  %v681_v2 = vmul.f32 %v673_v45, %v648_v15  ;;  %v733_v18 = vrot.slane %v954_v19, %v1120_v27  ;;  %v799_v54 = vrot.slane %v955_v62, %v1120_v27 }
 0x183   :  { %v738_v20 = vmul.f32 %v729_v3, %v1111_v24  ;;  %v736_v50 = vmul.f32 %v729_v3, %v1285_v36 }
 0x184   :  { %v629_v53 = vpop.permute.xlu1 %628  ;;  %v688_v21 = vadd.f32 %v680_v0, %v622_v16  ;;  %v689_v31 = vadd.f32 %v681_v2, %v623_v12  ;;  %v693_v56 = vpop.permute.xlu0 %692  ;;  %v739_v16 = vmul.f32 %v733_v18, %v1111_v24  ;;  %v737_v5 = vmul.f32 %v733_v18, %v1285_v36 }
 0x185   :  { %v805_v2 = vmul.f32 %v799_v54, %v1290_v37 }
 0x188   :  { %v633_v14 = vpop.permute.xlu1 %632  ;;  %v697_v30 = vpop.permute.xlu0 %696 }
 0x189   :  { %v641_v32 = vsel %vm640_vm5, %v625_v10, %v633_v14  ;;  %v645_v11 = vsel %vm640_vm5, %v633_v14, %v625_v10 }
 0x18a   :  { %v674_v6 = vmul.f32 %v670_v51, %v641_v32  ;;  %v675_v8 = vmul.f32 %v671_v58, %v645_v11 }
 0x18c   :  { %v682_v61 = vadd.f32 %v674_v6, %v616_v44  ;;  %v683_v63 = vadd.f32 %v675_v8, %v617_v34  ;;  %v637_v4 = vpop.permute.xlu1 %636  ;;  %v701_v12 = vpop.permute.xlu0 %700 }
 0x18d   :  { %v643_v9 = vsel %vm640_vm5, %v629_v53, %v637_v4  ;;  %v647_v59 = vsel %vm640_vm5, %v637_v4, %v629_v53  ;;  %v708_v60 = vsel %vm706_vm6, %v693_v56, %v701_v12  ;;  %v712_v38 = vsel %vm706_vm6, %v701_v12, %v693_v56 }
 0x18e   :  { %v678_v39 = vmul.f32 %v670_v51, %v643_v9  ;;  %v679_v7 = vmul.f32 %v671_v58, %v647_v59  ;;  %v742_v13 = vmul.f32 %v738_v20, %v708_v60  ;;  %v743_v17 = vmul.f32 %v739_v16, %v712_v38 }
 0x18f   :  { %v803_v9 = vmul.f32 %v799_v54, %v1142_v40 }
 0x190   :  { %v686_v43 = vadd.f32 %v678_v39, %v620_v28  ;;  %v687_v1 = vadd.f32 %v679_v7, %v621_v35  ;;  %v691_v24 = vpop.permute.xlu1 %690  ;;  %v750_v49 = vadd.f32 %v742_v13, %v684_v22  ;;  %v751_v52 = vadd.f32 %v743_v17, %v685_v33  ;;  %v705_v44 = vpop.permute.xlu0 %704 }
 0x191   :  { %v710_v34 = vsel %vm706_vm6, %v697_v30, %v705_v44  ;;  %v714_v25 = vsel %vm706_vm6, %v705_v44, %v697_v30  ;;  %v795_v33 = vrot.slane %v955_v62, %v1117_v26 }
 0x192   :  { %v746_v42 = vmul.f32 %v738_v20, %v710_v34  ;;  %v747_v45 = vmul.f32 %v739_v16, %v714_v25 }
 0x193   :  { %v804_v36 = vmul.f32 %v795_v33, %v1290_v37  ;;  %v802_v12 = vmul.f32 %v795_v33, %v1142_v40 }
 0x194   :  { %v695_v57 = vpop.permute.xlu1 %694  ;;  %v754_v46 = vadd.f32 %v746_v42, %v688_v21  ;;  %v755_v47 = vadd.f32 %v747_v45, %v689_v31  ;;  %v759_v48 = vpop.permute.xlu0 %758 }
 0x198   :  { %v699_v55 = vpop.permute.xlu1 %698  ;;  %v763_v29 = vpop.permute.xlu0 %762 }
 0x199   :  { %v707_v28 = vsel %vm706_vm6, %v691_v24, %v699_v55  ;;  %v711_v35 = vsel %vm706_vm6, %v699_v55, %v691_v24 }
 0x19a   :  { %v740_v10 = vmul.f32 %v736_v50, %v707_v28  ;;  %v741_v22 = vmul.f32 %v737_v5, %v711_v35 }
 0x19c   :  { %v748_v41 = vadd.f32 %v740_v10, %v682_v61  ;;  %v749_v15 = vadd.f32 %v741_v22, %v683_v63  ;;  %v703_v0 = vpop.permute.xlu1 %702  ;;  %v767_v53 = vpop.permute.xlu0 %766 }
 0x19d   :  { %v709_v21 = vsel %vm706_vm6, %v695_v57, %v703_v0  ;;  %v713_v31 = vsel %vm706_vm6, %v703_v0, %v695_v57  ;;  %v774_v26 = vsel %vm772_vm7, %v759_v48, %v767_v53  ;;  %v778_v27 = vsel %vm772_vm7, %v767_v53, %v759_v48 }
 0x19e   :  { %v744_v56 = vmul.f32 %v736_v50, %v709_v21  ;;  %v745_v19 = vmul.f32 %v737_v5, %v713_v31  ;;  %v808_v51 = vmul.f32 %v804_v36, %v774_v26  ;;  %v809_v58 = vmul.f32 %v805_v2, %v778_v27 }
 0x1a0   :  { %v752_v14 = vadd.f32 %v744_v56, %v686_v43  ;;  %v753_v3 = vadd.f32 %v745_v19, %v687_v1  ;;  %v757_v37 = vpop.permute.xlu1 %756  ;;  %v771_v18 = vpop.permute.xlu0 %770  ;;  %v816_v30 = vadd.f32 %v808_v51, %v750_v49  ;;  %v817_v32 = vadd.f32 %v809_v58, %v751_v52  ;;  %v878_v19 = vld [vmem:[%s1577_s5] sm:$0xff] }
 0x1a1   :  { %v776_v11 = vsel %vm772_vm7, %v763_v29, %v771_v18  ;;  %v780_v6 = vsel %vm772_vm7, %v771_v18, %v763_v29 }
 0x1a2   :  { %v812_v8 = vmul.f32 %v804_v36, %v776_v11  ;;  %v813_v61 = vmul.f32 %v805_v2, %v780_v6  ;;  %v825_v63 = vadd.f32 %v817_v32, %v816_v30 }
 0x1a4   :  { %v761_v4 = vpop.permute.xlu1 %760  ;;  %v820_v20 = vadd.f32 %v812_v8, %v754_v46  ;;  %v821_v16 = vadd.f32 %v813_v61, %v755_v47  ;;  %826 = vadd.xlane.f32.xlu0 %v825_v63  ;;  %v870_v8 = vld [vmem:[%s1576_s4] sm:$0xff]  ;;  %v871_v61 = vld [vmem:[%s1576_s4 + $0x8] sm:$0xff]  ;;  %s1042_s4 = smov [#allocation2]  }
 0x1a6   :  { %v831_v25 = vadd.f32 %v821_v16, %v820_v20 }
 0x1a8   :  { %v765_v59 = vpop.permute.xlu1 %764 }
 0x1a9   :  { %v773_v60 = vsel %vm772_vm7, %v757_v37, %v765_v59  ;;  %v777_v38 = vsel %vm772_vm7, %v765_v59, %v757_v37 }
 0x1aa   :  { %v806_v39 = vmul.f32 %v802_v12, %v773_v60  ;;  %v807_v7 = vmul.f32 %v803_v9, %v777_v38 }
 0x1ac   :  { %v814_v13 = vadd.f32 %v806_v39, %v748_v41  ;;  %v815_v17 = vadd.f32 %v807_v7, %v749_v15  ;;  %v769_v43 = vpop.permute.xlu1 %768 }
 0x1ad   :  { %v775_v1 = vsel %vm772_vm7, %v761_v4, %v769_v43  ;;  %v779_v24 = vsel %vm772_vm7, %v769_v43, %v761_v4 }
 0x1ae   :  { %v810_v49 = vmul.f32 %v802_v12, %v775_v1  ;;  %v811_v40 = vmul.f32 %v803_v9, %v779_v24  ;;  %v822_v52 = vadd.f32 %v815_v17, %v814_v13  ;;  %v879_v12 = vld [vmem:[%s1577_s5 + $0x8] sm:$0xff]  ;;  %s937_s5 = sshll.u32 %s1042_s4, 4  ;;  %s938_s5 = int_to_ptr.vmem [resolvable:$true] %s937_s5 }
 0x1af   :  { %s1001_s11 = scalar_lea.vmem %s938_s5, 1024  ;;  %p1006_p1 = scmp.lt.s32.totalorder %s938_s5, %s938_s5 }
 0x1b0   :  { %823 = vadd.xlane.f32.xlu1 %v822_v52  ;;  %v818_v44 = vadd.f32 %v810_v49, %v752_v14  ;;  %v819_v34 = vadd.f32 %v811_v40, %v753_v3  ;;  %p1002_p0 = scmp.ne.s32.totalorder %s938_s5, %s1001_s11  ;;  %p1007_p2 = scmp.lt.s32.totalorder %s1001_s11, %s1001_s11 }
 0x1b2   :  { %v828_v42 = vadd.f32 %v819_v34, %v818_v44  ;;  %p1008_p3 = por %p1007_p2, %p1006_p1 }
 0x1b4   :  { %832 = vadd.xlane.f32.xlu1 %v831_v25  ;;  %829 = vadd.xlane.f32.xlu0 %v828_v42  ;;  %p1009_p4 = pnand %p1008_p3, %p1002_p0 }
 0x231   :  { %v827_v45 = vpop.xlane.xlu0 %826 }
 0x23d   :  { %v824_v57 = vpop.xlane.xlu1 %823 }
 0x241   :  { %v830_v46 = vpop.xlane.xlu0 %829  ;;  %v833_v47 = vpop.xlane.xlu1 %832 }
 0x242   :  { %v834_v48 = vadd.f32 %v830_v46, %v824_v57  ;;  %v835_v62 = vadd.f32 %v833_v47, %v827_v45 }
 0x244   :  { %v836_v50 = vmul.f32 0.001953125, %v834_v48  ;;  %v837_v5 = vmul.f32 0.001953125, %v835_v62 }
 0x246   :  { %v838_v23 = vsub.f32 %v814_v13, %v836_v50  ;;  %v839_v55 = vsub.f32 %v815_v17, %v836_v50  ;;  %v840_v29 = vsub.f32 %v816_v30, %v837_v5  ;;  %v841_v28 = vsub.f32 %v817_v32, %v837_v5 }
 0x247   :  { %v842_v35 = vsub.f32 %v818_v44, %v836_v50  ;;  %v843_v10 = vsub.f32 %v819_v34, %v836_v50  ;;  %v844_v22 = vsub.f32 %v820_v20, %v837_v5  ;;  %v845_v33 = vsub.f32 %v821_v16, %v837_v5 }
 0x248   :  { %v846_v54 = vmul.f32 %v838_v23, %v838_v23  ;;  %v847_v41 = vmul.f32 %v839_v55, %v839_v55  ;;  %v848_v15 = vmul.f32 %v840_v29, %v840_v29  ;;  %v849_v0 = vmul.f32 %v841_v28, %v841_v28 }
 0x249   :  { %v850_v36 = vmul.f32 %v842_v35, %v842_v35  ;;  %v851_v2 = vmul.f32 %v843_v10, %v843_v10  ;;  %v852_v31 = vmul.f32 %v844_v22, %v844_v22  ;;  %v853_v26 = vmul.f32 %v845_v33, %v845_v33 }
 0x24a   :  { %v854_v53 = vadd.f32 %v847_v41, %v846_v54  ;;  %v857_v21 = vadd.f32 %v849_v0, %v848_v15 }
 0x24b   :  { %v860_v27 = vadd.f32 %v851_v2, %v850_v36  ;;  %v863_v56 = vadd.f32 %v853_v26, %v852_v31 }
 0x24c   :  { %855 = vadd.xlane.f32.xlu0 %v854_v53  ;;  %858 = vadd.xlane.f32.xlu1 %v857_v21 }
 0x250   :  { %861 = vadd.xlane.f32.xlu0 %v860_v27  ;;  %864 = vadd.xlane.f32.xlu1 %v863_v56 }
 0x261   :  { %900 = vperm.xlu1 %996, %v878_v19  }
 0x2d9   :  { %v856_v51 = vpop.xlane.xlu0 %855  ;;  %v859_v58 = vpop.xlane.xlu1 %858 }
 0x2dd   :  { %v862_v14 = vpop.xlane.xlu0 %861  ;;  %v865_v3 = vpop.xlane.xlu1 %864 }
 0x2de   :  { %v866_v37 = vadd.f32 %v862_v14, %v856_v51  ;;  %v867_v18 = vadd.f32 %v865_v3, %v859_v58 }
 0x2e0   :  { %v868_v30 = vmul.f32 0.001953125, %v866_v37  ;;  %v869_v32 = vmul.f32 0.001953125, %v867_v18 }
 0x2e1   :  { %v901_v9 = vpop.permute.xlu1 %900 }
 0x2e2   :  { %v872_v11 = vadd.f32 1e-05, %v868_v30  ;;  %v873_v6 = vadd.f32 1e-05, %v869_v32 }
 0x2e4   :  { %997 = vrsqrt.f32 %v872_v11 }
 0x2e5   :  { %999 = vrsqrt.f32 %v873_v6 }
 0x2ee   :  { %v998_v63 = vpop.eup %997 }
 0x2ef   :  { %v1000_v4 = vpop.eup %999  ;;  %v876_v20 = vmul.f32 %v998_v63, %v870_v8 }
 0x2f0   :  { %v877_v16 = vmul.f32 %v1000_v4, %v871_v61 }
 0x2f1   :  { %882 = vperm.xlu0 %994, %v876_v20  }
 0x2f2   :  { %887 = vperm.xlu1 %996, %v877_v16  }
 0x2f6   :  { %905 = vperm.xlu1 %996, %v879_v12  }
 0x370   :  { %v883_v59 = vpop.permute.xlu0 %882 }
 0x371   :  { %v890_v60 = vmul.f32 %v883_v59, %v838_v23  ;;  %v891_v38 = vmul.f32 %v883_v59, %v839_v55  ;;  %v894_v39 = vmul.f32 %v883_v59, %v842_v35  ;;  %v895_v7 = vmul.f32 %v883_v59, %v843_v10  ;;  %v888_v13 = vpop.permute.xlu1 %887 }
 0x372   :  { %v892_v49 = vmul.f32 %v888_v13, %v840_v29  ;;  %v893_v40 = vmul.f32 %v888_v13, %v841_v28  ;;  %v896_v52 = vmul.f32 %v888_v13, %v844_v22  ;;  %v897_v44 = vmul.f32 %v888_v13, %v845_v33 }
 0x373   :  { %v908_v17 = vadd.f32 %v901_v9, %v890_v60  ;;  %v909_v43 = vadd.f32 %v901_v9, %v891_v38  ;;  %v912_v1 = vadd.f32 %v901_v9, %v894_v39  ;;  %v913_v24 = vadd.f32 %v901_v9, %v895_v7 }
 0x375   :  { %v916_v34 = vmax.f32 %v908_v17, 0.0  ;;  %v917_v25 = vmax.f32 %v909_v43, 0.0  ;;  %v920_v42 = vmax.f32 %v912_v1, 0.0  ;;  %v921_v45 = vmax.f32 %v913_v24, 0.0  ;;  %v906_v57 = vpop.permute.xlu1 %905 }
 0x376   :  { %v910_v46 = vadd.f32 %v906_v57, %v892_v49  ;;  %v911_v47 = vadd.f32 %v906_v57, %v893_v40  ;;  %v914_v48 = vadd.f32 %v906_v57, %v896_v52  ;;  %v915_v62 = vadd.f32 %v906_v57, %v897_v44 }
 0x377   :  { %924 = vst [vmem:[#allocation2] sm:$0xff] %v916_v34  ;;  %925 = vst [vmem:[#allocation2 + $0x8] sm:$0xff] %v917_v25 }
 0x378   :  { %928 = vst [vmem:[#allocation2 + $0x20] sm:$0xff] %v920_v42  ;;  %929 = vst [vmem:[#allocation2 + $0x28] sm:$0xff] %v921_v45  ;;  %v918_v50 = vmax.f32 %v910_v46, 0.0  ;;  %v919_v5 = vmax.f32 %v911_v47, 0.0  ;;  %v922_v23 = vmax.f32 %v914_v48, 0.0  ;;  %v923_v55 = vmax.f32 %v915_v62, 0.0 }
 0x37a   :  { %926 = vst [vmem:[#allocation2 + $0x10] sm:$0xff] %v918_v50  ;;  %927 = vst [vmem:[#allocation2 + $0x18] sm:$0xff] %v919_v5 }
 0x37b   :  { %930 = vst [vmem:[#allocation2 + $0x30] sm:$0xff] %v922_v23  ;;  %931 = vst [vmem:[#allocation2 + $0x38] sm:$0xff] %v923_v55 }
 0x37c   :  { %1012 = shalt.err (!%p1009_p4)
}
 0x37d   :  { %s1013_s14 = scalar_lea.hbm %s1578_s6, 1024 }
 0x37e   :  { %p1014_p5 = scmp.ne.s32.totalorder %s1578_s6, %s1013_s14  ;;  %p1017_p6 = scmp.lt.u32.totalorder %s1013_s14, %s1578_s6 }
 0x380   :  { %p1019_p7 = pnand %p1017_p6, %p1014_p5 }
 0x382   :  { %1022 = shalt.err (!%p1019_p7)
}
 0x383   :  { %s1043_s19 = smov 256  }
 0x384   :  { %943 = dma.vmem_to_hbm [thread:$0]  %s938_s5, 1024, %s1578_s6, [#allocation3], %s1043_s19, %s1043_s19, %s1035_s7  }
 0x385   :  { %1023 = dma.done.wait [#allocation3], 1024  }
 0x386   :  { %1024 = vsyncadd [#allocation3], 4294966272 }
 0x387   :  { %947 = vsyncpa [#allocation3], 1 }

</bundles_post_ra>
